<compile_context>
chip_gen: v7x
topology: tpu7x:2x2x1
jax: 0.10.0
libtpu: 0.0.40
codegen_flags: <defaults>
</compile_context>

<pallas_src>
import jax
import jax.numpy as jnp
from jax.experimental import pallas as pl
from jax.experimental.pallas import tpu as pltpu


def _round_up(n, m):
    return ((n + m - 1) // m) * m


def _mlp_kernel(x_ref, w1_ref, b1_ref, w2_ref, b2_ref, w3_ref, b3_ref, o_ref):
    # Transposed formulation: activations are (features, TILE_B) so the batch
    # dimension sits on lanes everywhere (lane-dense stores).
    x_t = x_ref[...]                       # (4, TILE_B)  f32
    w1 = w1_ref[...]                       # (512, 4)     torch layout (out, in)
    d_in = x_ref.shape[0]

    # ---- Layer 1: Linear(4, 512) + ReLU, as 4 VPU broadcast multiply-adds ----
    h1 = w1[:, 0:1] * x_t[0:1, :]          # (512, TILE_B)
    for k in range(1, d_in):
        h1 = h1 + w1[:, k:k + 1] * x_t[k:k + 1, :]
    h1 = jnp.maximum(h1 + b1_ref[...], 0.0)            # bias (512,1) broadcasts over lanes

    # ---- Layer 2: Linear(512, 128) + ReLU, dense MXU matmul (f32 acc) ----
    h2 = jnp.dot(w2_ref[...], h1, preferred_element_type=jnp.float32)
    h2 = jnp.maximum(h2 + b2_ref[...], 0.0)             # (128, TILE_B)

    # ---- Layer 3: Linear(128, 1) + ReLU, VPU multiply + cross-sublane reduce ----
    out = jnp.sum(w3_ref[...] * h2, axis=0, keepdims=True) + b3_ref[0, 0]  # (1, TILE_B)
    o_ref[...] = jnp.maximum(out, 0.0)


def poswise_ffn2(x, w1, b1, w2, b2, w3, b3, *, tile_b=512):
    """x: (B, 4) float32; weights in torch nn.Linear layout. Returns (B, 1) float32."""
    B, d_in = x.shape
    h1d = w1.shape[0]          # 512
    h2d = w2.shape[0]          # 128

    # Batch tile: lane-dense => multiple of 128; don't over-pad tiny batches.
    tile_b = max(128, min(_round_up(tile_b, 128), _round_up(B, 128)))
    n_tiles = pl.cdiv(B, tile_b)
    b_pad = n_tiles * tile_b

    x_t = x.T                                   # (4, B)
    if b_pad != B:
        x_t = jnp.pad(x_t, ((0, 0), (0, b_pad - B)))

    b1c = b1.reshape(h1d, 1)
    b2c = b2.reshape(h2d, 1)
    w3c = w3.reshape(h2d, 1)                    # torch (1,128) -> column (128,1)
    b3s = b3.reshape(1, 1)                      # scalar -> SMEM

    out = pl.pallas_call(
        _mlp_kernel,
        out_shape=jax.ShapeDtypeStruct((1, b_pad), jnp.float32),
        grid=(n_tiles,),
        in_specs=[
            pl.BlockSpec((d_in, tile_b), lambda i: (0, i)),     # x tile (streamed)
            pl.BlockSpec((h1d, d_in), lambda i: (0, 0)),        # w1 (resident)
            pl.BlockSpec((h1d, 1), lambda i: (0, 0)),           # b1
            pl.BlockSpec((h2d, h1d), lambda i: (0, 0)),         # w2
            pl.BlockSpec((h2d, 1), lambda i: (0, 0)),           # b2
            pl.BlockSpec((h2d, 1), lambda i: (0, 0)),           # w3 column
            pl.BlockSpec(memory_space=pltpu.MemorySpace.SMEM),  # b3 scalar
        ],
        out_specs=pl.BlockSpec((1, tile_b), lambda i: (0, i)),  # lane-dense output
        compiler_params=pltpu.CompilerParams(
            dimension_semantics=("parallel",),
            vmem_limit_bytes=32 * 1024 * 1024,
        ),
    )(x_t, w1, b1c, w2, b2c, w3c, b3s)

    return out[0, :B].reshape(B, 1)


def init_params(key):
    """PyTorch-style init (uniform +/- 1/sqrt(fan_in)), torch nn.Linear layout."""
    dims = [(4, 512), (512, 128), (128, 1)]
    params = []
    for fan_in, fan_out in dims:
        kw, kb, key = jax.random.split(key, 3)
        bound = 1.0 / (fan_in ** 0.5)
        w = jax.random.uniform(kw, (fan_out, fan_in), jnp.float32, -bound, bound)
        b = jax.random.uniform(kb, (fan_out,), jnp.float32, -bound, bound)
        params += [w, b]
    return params


def reference(x, w1, b1, w2, b2, w3, b3):
    h1 = jnp.maximum(x @ w1.T + b1, 0.0)
    h2 = jnp.maximum(h1 @ w2.T + b2, 0.0)
    return jnp.maximum(h2 @ w3.T + b3, 0.0)


if __name__ == "__main__":
    key = jax.random.PRNGKey(0)
    kx, kp = jax.random.split(key)

    batch = 8
    x = jax.random.normal(kx, (batch, 4), jnp.float32)
    params = init_params(kp)

    out = jax.block_until_ready(poswise_ffn2(x, *params))
    ref = reference(x, *params)

    assert out.shape == (batch, 1), out.shape
    # f32 roundoff headroom (kernel uses exact-f32 VPU path for layers 1/3,
    # MXU f32 accumulation for layer 2; XLA reference uses its default algo).
    assert jnp.allclose(out, ref, atol=1e-4, rtol=1e-4), "mismatch vs JAX reference"

    print("KERNEL_OK")
</pallas_src>

<mosaic_0001>
module attributes {stable_mosaic.version = 11 : i64} {
  func.func @_mlp_kernel(%arg0: i32, %arg1: memref<4x128xf32, #tpu.memory_space<vmem>>, %arg2: memref<512x4xf32, #tpu.memory_space<vmem>>, %arg3: memref<512x1xf32, #tpu.memory_space<vmem>>, %arg4: memref<128x512xf32, #tpu.memory_space<vmem>>, %arg5: memref<128x1xf32, #tpu.memory_space<vmem>>, %arg6: memref<128x1xf32, #tpu.memory_space<vmem>>, %arg7: memref<1x1xf32, #tpu.memory_space<smem>>, %arg8: memref<1x128xf32, #tpu.memory_space<vmem>>) attributes {dimension_semantics = [#tpu.dimension_semantics<parallel>], iteration_bounds = array<i64: 1>, scalar_prefetch = 0 : i64, scratch_operands = 0 : i64, tpu.core_type = #tpu.core_type<tc>, window_params = [{transform_indices = @transform_0, window_bounds = array<i64: 4, 128>}, {pipeline_mode = #tpu.pipeline_mode<synchronous>, transform_indices = @transform_1, window_bounds = array<i64: 512, 4>}, {pipeline_mode = #tpu.pipeline_mode<synchronous>, transform_indices = @transform_2, window_bounds = array<i64: 512, 1>}, {pipeline_mode = #tpu.pipeline_mode<synchronous>, transform_indices = @transform_3, window_bounds = array<i64: 128, 512>}, {pipeline_mode = #tpu.pipeline_mode<synchronous>, transform_indices = @transform_4, window_bounds = array<i64: 128, 1>}, {pipeline_mode = #tpu.pipeline_mode<synchronous>, transform_indices = @transform_5, window_bounds = array<i64: 128, 1>}, {transform_indices = @transform_6, window_bounds = array<i64: 1, 1>}, {transform_indices = @transform_7, window_bounds = array<i64: 1, 128>}]} {
    %c0 = arith.constant 0 : index
    %c0_0 = arith.constant 0 : index
    %0 = vector.load %arg1[%c0, %c0_0] : memref<4x128xf32, #tpu.memory_space<vmem>>, vector<4x128xf32>
    %c0_1 = arith.constant 0 : index
    %c0_2 = arith.constant 0 : index
    %1 = vector.load %arg2[%c0_1, %c0_2] : memref<512x4xf32, #tpu.memory_space<vmem>>, vector<512x4xf32>
    %2 = vector.extract_strided_slice %1 {offsets = [0, 0], sizes = [512, 1], strides = [1, 1]} : vector<512x4xf32> to vector<512x1xf32>
    %3 = vector.extract_strided_slice %0 {offsets = [0, 0], sizes = [1, 128], strides = [1, 1]} : vector<4x128xf32> to vector<1x128xf32>
    %4 = vector.broadcast %2 : vector<512x1xf32> to vector<512x128xf32>
    %5 = vector.broadcast %3 : vector<1x128xf32> to vector<512x128xf32>
    %6 = arith.mulf %4, %5 : vector<512x128xf32>
    %7 = vector.extract_strided_slice %1 {offsets = [0, 1], sizes = [512, 1], strides = [1, 1]} : vector<512x4xf32> to vector<512x1xf32>
    %8 = vector.extract_strided_slice %0 {offsets = [1, 0], sizes = [1, 128], strides = [1, 1]} : vector<4x128xf32> to vector<1x128xf32>
    %9 = vector.broadcast %7 : vector<512x1xf32> to vector<512x128xf32>
    %10 = vector.broadcast %8 : vector<1x128xf32> to vector<512x128xf32>
    %11 = arith.mulf %9, %10 : vector<512x128xf32>
    %12 = arith.addf %6, %11 : vector<512x128xf32>
    %13 = vector.extract_strided_slice %1 {offsets = [0, 2], sizes = [512, 1], strides = [1, 1]} : vector<512x4xf32> to vector<512x1xf32>
    %14 = vector.extract_strided_slice %0 {offsets = [2, 0], sizes = [1, 128], strides = [1, 1]} : vector<4x128xf32> to vector<1x128xf32>
    %15 = vector.broadcast %13 : vector<512x1xf32> to vector<512x128xf32>
    %16 = vector.broadcast %14 : vector<1x128xf32> to vector<512x128xf32>
    %17 = arith.mulf %15, %16 : vector<512x128xf32>
    %18 = arith.addf %12, %17 : vector<512x128xf32>
    %19 = vector.extract_strided_slice %1 {offsets = [0, 3], sizes = [512, 1], strides = [1, 1]} : vector<512x4xf32> to vector<512x1xf32>
    %20 = vector.extract_strided_slice %0 {offsets = [3, 0], sizes = [1, 128], strides = [1, 1]} : vector<4x128xf32> to vector<1x128xf32>
    %21 = vector.broadcast %19 : vector<512x1xf32> to vector<512x128xf32>
    %22 = vector.broadcast %20 : vector<1x128xf32> to vector<512x128xf32>
    %23 = arith.mulf %21, %22 : vector<512x128xf32>
    %24 = arith.addf %18, %23 : vector<512x128xf32>
    %c0_3 = arith.constant 0 : index
    %c0_4 = arith.constant 0 : index
    %25 = vector.load %arg3[%c0_3, %c0_4] : memref<512x1xf32, #tpu.memory_space<vmem>>, vector<512x1xf32>
    %26 = vector.broadcast %25 : vector<512x1xf32> to vector<512x128xf32>
    %27 = arith.addf %24, %26 : vector<512x128xf32>
    %cst = arith.constant 0.000000e+00 : f32
    %28 = vector.broadcast %cst : f32 to vector<512x128xf32>
    %29 = arith.maximumf %27, %28 : vector<512x128xf32>
    %c0_5 = arith.constant 0 : index
    %c0_6 = arith.constant 0 : index
    %30 = vector.load %arg4[%c0_5, %c0_6] : memref<128x512xf32, #tpu.memory_space<vmem>>, vector<128x512xf32>
    %cst_7 = arith.constant dense<0.000000e+00> : vector<128x128xf32>
    %31 = tpu.matmul %30, %29, %cst_7 {dimension_numbers = #tpu.dot_dimension_numbers<[1], [0], [0], [1], [0, 0, 1, 1], [], []>} : vector<128x512xf32>, vector<512x128xf32>, vector<128x128xf32> -> vector<128x128xf32>
    %c0_8 = arith.constant 0 : index
    %c0_9 = arith.constant 0 : index
    %32 = vector.load %arg5[%c0_8, %c0_9] : memref<128x1xf32, #tpu.memory_space<vmem>>, vector<128x1xf32>
    %33 = vector.broadcast %32 : vector<128x1xf32> to vector<128x128xf32>
    %34 = arith.addf %31, %33 : vector<128x128xf32>
    %cst_10 = arith.constant 0.000000e+00 : f32
    %35 = vector.broadcast %cst_10 : f32 to vector<128x128xf32>
    %36 = arith.maximumf %34, %35 : vector<128x128xf32>
    %c0_11 = arith.constant 0 : index
    %c0_12 = arith.constant 0 : index
    %37 = vector.load %arg6[%c0_11, %c0_12] : memref<128x1xf32, #tpu.memory_space<vmem>>, vector<128x1xf32>
    %38 = vector.broadcast %37 : vector<128x1xf32> to vector<128x128xf32>
    %39 = arith.mulf %38, %36 : vector<128x128xf32>
    %cst_13 = arith.constant dense<0.000000e+00> : vector<128xf32>
    %40 = vector.multi_reduction <add>, %39, %cst_13 [0] : vector<128x128xf32> to vector<128xf32>
    %41 = vector.shape_cast %40 : vector<128xf32> to vector<1x128xf32>
    %c0_14 = arith.constant 0 : index
    %c0_15 = arith.constant 0 : index
    %42 = memref.load %arg7[%c0_14, %c0_15] : memref<1x1xf32, #tpu.memory_space<smem>>
    %43 = vector.broadcast %42 : f32 to vector<1x128xf32>
    %44 = arith.addf %41, %43 : vector<1x128xf32>
    %cst_16 = arith.constant 0.000000e+00 : f32
    %45 = vector.broadcast %cst_16 : f32 to vector<1x128xf32>
    %46 = arith.maximumf %44, %45 : vector<1x128xf32>
    %c0_17 = arith.constant 0 : index
    %c0_18 = arith.constant 0 : index
    %47 = vector.load %arg8[%c0_17, %c0_18] : memref<1x128xf32, #tpu.memory_space<vmem>>, vector<1x128xf32>
    tpu.vector_store %arg8[%c0_17, %c0_18], %46 {strides = array<i32>} : memref<1x128xf32, #tpu.memory_space<vmem>>, vector<1x128xf32>,
    return
  }
  func.func @transform_0(%arg0: i32) -> (i32, i32) {
    %c0_i32 = arith.constant 0 : i32
    %c0_i32_0 = arith.constant 0 : i32
    return %c0_i32, %arg0 : i32, i32
  }
  func.func @transform_1(%arg0: i32) -> (i32, i32) {
    %c0_i32 = arith.constant 0 : i32
    %c0_i32_0 = arith.constant 0 : i32
    %c0_i32_1 = arith.constant 0 : i32
    return %c0_i32, %c0_i32_0 : i32, i32
  }
  func.func @transform_2(%arg0: i32) -> (i32, i32) {
    %c0_i32 = arith.constant 0 : i32
    %c0_i32_0 = arith.constant 0 : i32
    %c0_i32_1 = arith.constant 0 : i32
    return %c0_i32, %c0_i32_0 : i32, i32
  }
  func.func @transform_3(%arg0: i32) -> (i32, i32) {
    %c0_i32 = arith.constant 0 : i32
    %c0_i32_0 = arith.constant 0 : i32
    %c0_i32_1 = arith.constant 0 : i32
    return %c0_i32, %c0_i32_0 : i32, i32
  }
  func.func @transform_4(%arg0: i32) -> (i32, i32) {
    %c0_i32 = arith.constant 0 : i32
    %c0_i32_0 = arith.constant 0 : i32
    %c0_i32_1 = arith.constant 0 : i32
    return %c0_i32, %c0_i32_0 : i32, i32
  }
  func.func @transform_5(%arg0: i32) -> (i32, i32) {
    %c0_i32 = arith.constant 0 : i32
    %c0_i32_0 = arith.constant 0 : i32
    %c0_i32_1 = arith.constant 0 : i32
    return %c0_i32, %c0_i32_0 : i32, i32
  }
  func.func @transform_6(%arg0: i32) -> (i32, i32) {
    %c0_i32 = arith.constant 0 : i32
    %c0_i32_0 = arith.constant 0 : i32
    %c0_i32_1 = arith.constant 0 : i32
    return %c0_i32, %c0_i32_0 : i32, i32
  }
  func.func @transform_7(%arg0: i32) -> (i32, i32) {
    %c0_i32 = arith.constant 0 : i32
    %c0_i32_0 = arith.constant 0 : i32
    return %c0_i32, %arg0 : i32, i32
  }
}

</mosaic_0001>

<bundles_post_ra>
// kernel: tpu_custom_call.1
= control target key start
LH: loop header
LB: loop body
LE: loop exit
PB: predicated region body
PF: predicated region fallthrough
CT: control target
= control target key end

     0   :  { %v3046_v2 = vmov 1   ;;  %v5340_v3 = vmov 0   ;;  %s5332_s0 = inlined_call_operand.vmem [shape: f32[4,128], index: 0, kind: input, shape index: {}]   ;;  %s5333_s1 = inlined_call_operand.vmem [shape: f32[512,4], index: 1, kind: input, shape index: {}]   ;;  %s5334_s2 = inlined_call_operand.vmem [shape: f32[512,1], index: 2, kind: input, shape index: {}]   ;;  %s5335_s3 = inlined_call_operand.vmem [shape: f32[128,512], index: 3, kind: input, shape index: {}]   ;;  %s5336_s4 = inlined_call_operand.vmem [shape: f32[128,1], index: 4, kind: input, shape index: {}]   ;;  %s5337_s5 = inlined_call_operand.vmem [shape: f32[128,1], index: 5, kind: input, shape index: {}]   ;;  %s5338_s6 = inlined_call_operand.<no memory space> [shape: f32[1,1], index: 6, kind: input, shape index: {}]   ;;  %s5339_s7 = inlined_call_operand.hbm [shape: f32[1,128], index: 7, kind: output, shape index: {}]  }
   0x1   :  { %v3094_v0 = vld [vmem:[%s5333_s1 + $0x10] sm:$0xff]  ;;  %v3099_v1 = vld [vmem:[%s5333_s1] sm:$0xff]  ;;  %3005 = vset.pattern.permute.xlu0 %v3046_v2  ;;  %3004 = vset.pattern.permute.xlu1 %v5340_v3  ;;  %v3108_v4 = vld [vmem:[%s5333_s1 + $0x18] sm:$0xff] }
   0x2   :  { %105 = vperm.xlu1 %3004, %v3094_v0   ;;  %482 = vperm.xlu0 %3005, %v3099_v1   ;;  %v3115_v5 = vld [vmem:[%s5333_s1 + $0x28] sm:$0xff]  ;;  %v3122_v6 = vld [vmem:[%s5333_s1 + $0x38] sm:$0xff] }
   0x6   :  { %110 = vperm.xlu1 %3004, %v3108_v4   ;;  %494 = vperm.xlu0 %3005, %v3108_v4  }
   0xa   :  { %120 = vperm.xlu1 %3004, %v3115_v5   ;;  %502 = vperm.xlu0 %3005, %v3115_v5  }
   0xb   :  { %13 = vsyncpa [#allocation4], 0  ;;  %v3129_v7 = vld [vmem:[%s5333_s1 + $0x48] sm:$0xff]  ;;  %v3136_v8 = vld [vmem:[%s5333_s1 + $0x58] sm:$0xff]  ;;  %v5342_v38 = vmov 2  }
   0xc   :  { %v3143_v9 = vld [vmem:[%s5333_s1 + $0x68] sm:$0xff]  ;;  %v3150_v10 = vld [vmem:[%s5333_s1 + $0x78] sm:$0xff]  ;;  %v3338_v39 = vld [vmem:[%s5333_s1 + $0x20] sm:$0xff] }
   0xd   :  { %v3157_v11 = vld [vmem:[%s5333_s1 + $0x88] sm:$0xff]  ;;  %v3164_v12 = vld [vmem:[%s5333_s1 + $0x98] sm:$0xff]  ;;  %v3349_v42 = vld [vmem:[%s5333_s1 + $0x30] sm:$0xff] }
   0xe   :  { %130 = vperm.xlu1 %3004, %v3122_v6   ;;  %510 = vperm.xlu0 %3005, %v3122_v6   ;;  %v3171_v13 = vld [vmem:[%s5333_s1 + $0xa8] sm:$0xff]  ;;  %v3178_v14 = vld [vmem:[%s5333_s1 + $0xb8] sm:$0xff]  ;;  %v3360_v45 = vld [vmem:[%s5333_s1 + $0x40] sm:$0xff] }
   0xf   :  { %v3185_v15 = vld [vmem:[%s5333_s1 + $0xc8] sm:$0xff]  ;;  %v3192_v16 = vld [vmem:[%s5333_s1 + $0xd8] sm:$0xff]  ;;  %v3371_v48 = vld [vmem:[%s5333_s1 + $0x50] sm:$0xff] }
  0x10   :  { %v3199_v17 = vld [vmem:[%s5333_s1 + $0xe8] sm:$0xff]  ;;  %v3206_v18 = vld [vmem:[%s5333_s1 + $0xf8] sm:$0xff]  ;;  %v3382_v51 = vld [vmem:[%s5333_s1 + $0x60] sm:$0xff] }
  0x11   :  { %v3213_v19 = vld [vmem:[%s5333_s1 + $0x108] sm:$0xff]  ;;  %v3220_v20 = vld [vmem:[%s5333_s1 + $0x118] sm:$0xff]  ;;  %v3393_v54 = vld [vmem:[%s5333_s1 + $0x70] sm:$0xff] }
  0x12   :  { %140 = vperm.xlu1 %3004, %v3129_v7   ;;  %518 = vperm.xlu0 %3005, %v3129_v7   ;;  %v3227_v21 = vld [vmem:[%s5333_s1 + $0x128] sm:$0xff]  ;;  %v3234_v22 = vld [vmem:[%s5333_s1 + $0x138] sm:$0xff]  ;;  %v3404_v57 = vld [vmem:[%s5333_s1 + $0x80] sm:$0xff] }
  0x13   :  { %v3241_v23 = vld [vmem:[%s5333_s1 + $0x148] sm:$0xff]  ;;  %v3248_v24 = vld [vmem:[%s5333_s1 + $0x158] sm:$0xff]  ;;  %v3415_v60 = vld [vmem:[%s5333_s1 + $0x90] sm:$0xff] }
  0x14   :  { %v3255_v25 = vld [vmem:[%s5333_s1 + $0x168] sm:$0xff]  ;;  %v3262_v26 = vld [vmem:[%s5333_s1 + $0x178] sm:$0xff]  ;;  %v3426_v63 = vld [vmem:[%s5333_s1 + $0xa0] sm:$0xff] }
  0x15   :  { %v3269_v27 = vld [vmem:[%s5333_s1 + $0x188] sm:$0xff]  ;;  %v3276_v28 = vld [vmem:[%s5333_s1 + $0x198] sm:$0xff] }
  0x16   :  { %150 = vperm.xlu1 %3004, %v3136_v8   ;;  %526 = vperm.xlu0 %3005, %v3136_v8   ;;  %v3283_v29 = vld [vmem:[%s5333_s1 + $0x1a8] sm:$0xff]  ;;  %v3290_v30 = vld [vmem:[%s5333_s1 + $0x1b8] sm:$0xff] }
  0x17   :  { %v3297_v31 = vld [vmem:[%s5333_s1 + $0x1c8] sm:$0xff]  ;;  %v3304_v32 = vld [vmem:[%s5333_s1 + $0x1d8] sm:$0xff] }
  0x18   :  { %v3311_v33 = vld [vmem:[%s5333_s1 + $0x1e8] sm:$0xff]  ;;  %v3318_v34 = vld [vmem:[%s5333_s1 + $0x1f8] sm:$0xff] }
  0x19   :  { %v3325_v35 = vld [vmem:[%s5333_s1 + $0x8] sm:$0xff] }
  0x1a   :  { %160 = vperm.xlu1 %3004, %v3143_v9   ;;  %534 = vperm.xlu0 %3005, %v3143_v9  }
  0x1e   :  { %170 = vperm.xlu1 %3004, %v3150_v10   ;;  %542 = vperm.xlu0 %3005, %v3150_v10  }
  0x22   :  { %180 = vperm.xlu1 %3004, %v3157_v11   ;;  %550 = vperm.xlu0 %3005, %v3157_v11  }
  0x26   :  { %190 = vperm.xlu1 %3004, %v3164_v12   ;;  %558 = vperm.xlu0 %3005, %v3164_v12  }
  0x2a   :  { %200 = vperm.xlu1 %3004, %v3171_v13   ;;  %566 = vperm.xlu0 %3005, %v3171_v13  }
  0x2e   :  { %210 = vperm.xlu1 %3004, %v3178_v14   ;;  %574 = vperm.xlu0 %3005, %v3178_v14  }
  0x32   :  { %220 = vperm.xlu1 %3004, %v3185_v15   ;;  %582 = vperm.xlu0 %3005, %v3185_v15  }
  0x36   :  { %230 = vperm.xlu1 %3004, %v3192_v16   ;;  %590 = vperm.xlu0 %3005, %v3192_v16  }
  0x3a   :  { %240 = vperm.xlu1 %3004, %v3199_v17   ;;  %598 = vperm.xlu0 %3005, %v3199_v17  }
  0x3e   :  { %250 = vperm.xlu1 %3004, %v3206_v18   ;;  %606 = vperm.xlu0 %3005, %v3206_v18  }
  0x42   :  { %260 = vperm.xlu1 %3004, %v3213_v19   ;;  %614 = vperm.xlu0 %3005, %v3213_v19  }
  0x46   :  { %270 = vperm.xlu1 %3004, %v3220_v20   ;;  %622 = vperm.xlu0 %3005, %v3220_v20  }
  0x4a   :  { %280 = vperm.xlu1 %3004, %v3227_v21   ;;  %630 = vperm.xlu0 %3005, %v3227_v21  }
  0x4e   :  { %290 = vperm.xlu1 %3004, %v3234_v22   ;;  %638 = vperm.xlu0 %3005, %v3234_v22  }
  0x52   :  { %300 = vperm.xlu1 %3004, %v3241_v23   ;;  %646 = vperm.xlu0 %3005, %v3241_v23  }
  0x56   :  { %310 = vperm.xlu1 %3004, %v3248_v24   ;;  %654 = vperm.xlu0 %3005, %v3248_v24  }
  0x5a   :  { %320 = vperm.xlu1 %3004, %v3255_v25   ;;  %662 = vperm.xlu0 %3005, %v3255_v25  }
  0x5e   :  { %330 = vperm.xlu1 %3004, %v3262_v26   ;;  %670 = vperm.xlu0 %3005, %v3262_v26  }
  0x62   :  { %340 = vperm.xlu1 %3004, %v3269_v27   ;;  %678 = vperm.xlu0 %3005, %v3269_v27  }
  0x66   :  { %350 = vperm.xlu1 %3004, %v3276_v28   ;;  %686 = vperm.xlu0 %3005, %v3276_v28  }
  0x6a   :  { %360 = vperm.xlu1 %3004, %v3283_v29   ;;  %694 = vperm.xlu0 %3005, %v3283_v29  }
  0x6e   :  { %370 = vperm.xlu1 %3004, %v3290_v30   ;;  %702 = vperm.xlu0 %3005, %v3290_v30  }
  0x72   :  { %380 = vperm.xlu1 %3004, %v3297_v31   ;;  %710 = vperm.xlu0 %3005, %v3297_v31  }
  0x76   :  { %390 = vperm.xlu1 %3004, %v3304_v32   ;;  %718 = vperm.xlu0 %3005, %v3304_v32  }
  0x7a   :  { %400 = vperm.xlu1 %3004, %v3311_v33   ;;  %726 = vperm.xlu0 %3005, %v3311_v33  }
  0x7e   :  { %410 = vperm.xlu1 %3004, %v3318_v34   ;;  %734 = vperm.xlu0 %3005, %v3318_v34  }
  0x81   :  { %v3327_v36 = vpop.permute.xlu1 %105  ;;  %v3329_v37 = vpop.permute.xlu0 %482 }
  0x82   :  { %5359 = vst [vmem:[#allocation6_spill] sm:$0xff] %v3327_v36  ;;  %5360 = vst [vmem:[#allocation7_spill] sm:$0xff] %v3329_v37  ;;  %3006 = vset.pattern.permute.xlu1 %v3046_v2  ;;  %3008 = vset.pattern.permute.xlu0 %v5342_v38  ;;  %v3437_v38 = vld [vmem:[%s5333_s1 + $0xb0] sm:$0xff] }
  0x83   :  { %486 = vperm.xlu1 %3006, %v3325_v35   ;;  %874 = vperm.xlu0 %3008, %v3325_v35  }
  0x85   :  { %v3340_v40 = vpop.permute.xlu1 %110  ;;  %v3342_v41 = vpop.permute.xlu0 %494 }
  0x86   :  { %5361 = vst [vmem:[#allocation8_spill] sm:$0xff] %v3340_v40  ;;  %5362 = vst [vmem:[#allocation9_spill] sm:$0xff] %v3342_v41 }
  0x87   :  { %490 = vperm.xlu1 %3006, %v3094_v0   ;;  %886 = vperm.xlu0 %3008, %v3338_v39  }
  0x89   :  { %v3351_v43 = vpop.permute.xlu1 %120  ;;  %v3353_v44 = vpop.permute.xlu0 %502 }
  0x8a   :  { %5363 = vst [vmem:[#allocation10_spill] sm:$0xff] %v3351_v43  ;;  %5364 = vst [vmem:[#allocation11_spill] sm:$0xff] %v3353_v44 }
  0x8b   :  { %498 = vperm.xlu1 %3006, %v3338_v39   ;;  %894 = vperm.xlu0 %3008, %v3349_v42  }
  0x8d   :  { %v3362_v46 = vpop.permute.xlu1 %130  ;;  %v3364_v47 = vpop.permute.xlu0 %510 }
  0x8e   :  { %5365 = vst [vmem:[#allocation12_spill] sm:$0xff] %v3362_v46  ;;  %5366 = vst [vmem:[#allocation13_spill] sm:$0xff] %v3364_v47 }
  0x8f   :  { %506 = vperm.xlu1 %3006, %v3349_v42   ;;  %902 = vperm.xlu0 %3008, %v3360_v45  }
  0x91   :  { %v3373_v49 = vpop.permute.xlu1 %140  ;;  %v3375_v50 = vpop.permute.xlu0 %518 }
  0x92   :  { %5367 = vst [vmem:[#allocation14_spill] sm:$0xff] %v3373_v49  ;;  %5368 = vst [vmem:[#allocation15_spill] sm:$0xff] %v3375_v50 }
  0x93   :  { %514 = vperm.xlu1 %3006, %v3360_v45   ;;  %910 = vperm.xlu0 %3008, %v3371_v48  }
  0x95   :  { %v3384_v52 = vpop.permute.xlu1 %150  ;;  %v3386_v53 = vpop.permute.xlu0 %526 }
  0x96   :  { %5369 = vst [vmem:[#allocation16_spill] sm:$0xff] %v3384_v52  ;;  %5370 = vst [vmem:[#allocation17_spill] sm:$0xff] %v3386_v53  ;;  %v3459_v52 = vld [vmem:[%s5333_s1 + $0xd0] sm:$0xff] }
  0x97   :  { %522 = vperm.xlu1 %3006, %v3371_v48   ;;  %918 = vperm.xlu0 %3008, %v3382_v51  }
  0x99   :  { %v3395_v55 = vpop.permute.xlu1 %160  ;;  %v3397_v56 = vpop.permute.xlu0 %534 }
  0x9a   :  { %5371 = vst [vmem:[#allocation18_spill] sm:$0xff] %v3395_v55  ;;  %5372 = vst [vmem:[#allocation19_spill] sm:$0xff] %v3397_v56  ;;  %v3448_v56 = vld [vmem:[%s5333_s1 + $0xc0] sm:$0xff] }
  0x9b   :  { %530 = vperm.xlu1 %3006, %v3382_v51   ;;  %926 = vperm.xlu0 %3008, %v3393_v54  }
  0x9d   :  { %v3406_v58 = vpop.permute.xlu1 %170  ;;  %v3408_v59 = vpop.permute.xlu0 %542 }
  0x9e   :  { %5373 = vst [vmem:[#allocation20_spill] sm:$0xff] %v3406_v58  ;;  %5374 = vst [vmem:[#allocation21_spill] sm:$0xff] %v3408_v59 }
  0x9f   :  { %538 = vperm.xlu1 %3006, %v3393_v54   ;;  %934 = vperm.xlu0 %3008, %v3404_v57  }
  0xa1   :  { %v3417_v61 = vpop.permute.xlu1 %180  ;;  %v3419_v62 = vpop.permute.xlu0 %550 }
  0xa2   :  { %5375 = vst [vmem:[#allocation22_spill] sm:$0xff] %v3417_v61  ;;  %5376 = vst [vmem:[#allocation23_spill] sm:$0xff] %v3419_v62 }
  0xa3   :  { %546 = vperm.xlu1 %3006, %v3404_v57   ;;  %942 = vperm.xlu0 %3008, %v3415_v60  }
  0xa5   :  { %v3428_v2 = vpop.permute.xlu1 %190  ;;  %v3430_v3 = vpop.permute.xlu0 %558 }
  0xa6   :  { %5377 = vst [vmem:[#allocation24_spill] sm:$0xff] %v3428_v2  ;;  %5378 = vst [vmem:[#allocation25_spill] sm:$0xff] %v3430_v3 }
  0xa7   :  { %554 = vperm.xlu1 %3006, %v3415_v60   ;;  %950 = vperm.xlu0 %3008, %v3426_v63  }
  0xa9   :  { %v3439_v59 = vpop.permute.xlu1 %200  ;;  %v3441_v58 = vpop.permute.xlu0 %566 }
  0xaa   :  { %5379 = vst [vmem:[#allocation26_spill] sm:$0xff] %v3439_v59  ;;  %5380 = vst [vmem:[#allocation27_spill] sm:$0xff] %v3441_v58 }
  0xab   :  { %562 = vperm.xlu1 %3006, %v3426_v63   ;;  %958 = vperm.xlu0 %3008, %v3437_v38  }
  0xad   :  { %v3450_v55 = vpop.permute.xlu1 %210  ;;  %v3452_v53 = vpop.permute.xlu0 %574 }
  0xae   :  { %5381 = vst [vmem:[#allocation28_spill] sm:$0xff] %v3450_v55  ;;  %5382 = vst [vmem:[#allocation29_spill] sm:$0xff] %v3452_v53  ;;  %v3470_v53 = vld [vmem:[%s5333_s1 + $0xe0] sm:$0xff] }
  0xaf   :  { %570 = vperm.xlu1 %3006, %v3437_v38   ;;  %966 = vperm.xlu0 %3008, %v3448_v56  }
  0xb1   :  { %v3461_v37 = vpop.permute.xlu1 %220  ;;  %v3463_v36 = vpop.permute.xlu0 %582 }
  0xb2   :  { %5383 = vst [vmem:[#allocation30_spill] sm:$0xff] %v3461_v37  ;;  %5384 = vst [vmem:[#allocation31_spill] sm:$0xff] %v3463_v36  ;;  %v3481_v36 = vld [vmem:[%s5333_s1 + $0xf0] sm:$0xff] }
  0xb3   :  { %578 = vperm.xlu1 %3006, %v3448_v56   ;;  %974 = vperm.xlu0 %3008, %v3459_v52  }
  0xb5   :  { %v3472_v55 = vpop.permute.xlu1 %230  ;;  %v3474_v58 = vpop.permute.xlu0 %590 }
  0xb6   :  { %5385 = vst [vmem:[#allocation32_spill] sm:$0xff] %v3472_v55  ;;  %5386 = vst [vmem:[#allocation33_spill] sm:$0xff] %v3474_v58  ;;  %v3492_v58 = vld [vmem:[%s5333_s1 + $0x100] sm:$0xff] }
  0xb7   :  { %586 = vperm.xlu1 %3006, %v3459_v52   ;;  %982 = vperm.xlu0 %3008, %v3470_v53  }
  0xb9   :  { %v3483_v37 = vpop.permute.xlu1 %240  ;;  %v3485_v59 = vpop.permute.xlu0 %598 }
  0xba   :  { %5387 = vst [vmem:[#allocation34_spill] sm:$0xff] %v3483_v37  ;;  %5388 = vst [vmem:[#allocation35_spill] sm:$0xff] %v3485_v59  ;;  %v3503_v59 = vld [vmem:[%s5333_s1 + $0x110] sm:$0xff] }
  0xbb   :  { %594 = vperm.xlu1 %3006, %v3470_v53   ;;  %990 = vperm.xlu0 %3008, %v3481_v36  }
  0xbd   :  { %v3494_v55 = vpop.permute.xlu1 %250  ;;  %v3496_v3 = vpop.permute.xlu0 %606 }
  0xbe   :  { %5389 = vst [vmem:[#allocation36_spill] sm:$0xff] %v3494_v55  ;;  %5390 = vst [vmem:[#allocation37_spill] sm:$0xff] %v3496_v3  ;;  %v3514_v3 = vld [vmem:[%s5333_s1 + $0x120] sm:$0xff] }
  0xbf   :  { %602 = vperm.xlu1 %3006, %v3481_v36   ;;  %998 = vperm.xlu0 %3008, %v3492_v58  }
  0xc1   :  { %v3505_v37 = vpop.permute.xlu1 %260  ;;  %v3507_v2 = vpop.permute.xlu0 %614 }
  0xc2   :  { %5391 = vst [vmem:[#allocation38_spill] sm:$0xff] %v3505_v37  ;;  %5392 = vst [vmem:[#allocation39_spill] sm:$0xff] %v3507_v2  ;;  %v3525_v2 = vld [vmem:[%s5333_s1 + $0x130] sm:$0xff] }
  0xc3   :  { %610 = vperm.xlu1 %3006, %v3492_v58   ;;  %1006 = vperm.xlu0 %3008, %v3503_v59  }
  0xc5   :  { %v3516_v55 = vpop.permute.xlu1 %270  ;;  %v3518_v62 = vpop.permute.xlu0 %622 }
  0xc6   :  { %5393 = vst [vmem:[#allocation40_spill] sm:$0xff] %v3516_v55  ;;  %5394 = vst [vmem:[#allocation41_spill] sm:$0xff] %v3518_v62  ;;  %v3536_v62 = vld [vmem:[%s5333_s1 + $0x140] sm:$0xff] }
  0xc7   :  { %618 = vperm.xlu1 %3006, %v3503_v59   ;;  %1014 = vperm.xlu0 %3008, %v3514_v3  }
  0xc9   :  { %v3527_v37 = vpop.permute.xlu1 %280  ;;  %v3529_v61 = vpop.permute.xlu0 %630 }
  0xca   :  { %5395 = vst [vmem:[#allocation42_spill] sm:$0xff] %v3527_v37  ;;  %5396 = vst [vmem:[#allocation43_spill] sm:$0xff] %v3529_v61  ;;  %v3547_v61 = vld [vmem:[%s5333_s1 + $0x150] sm:$0xff] }
  0xcb   :  { %626 = vperm.xlu1 %3006, %v3514_v3   ;;  %1022 = vperm.xlu0 %3008, %v3525_v2  }
  0xcd   :  { %v3538_v55 = vpop.permute.xlu1 %290  ;;  %v3540_v50 = vpop.permute.xlu0 %638 }
  0xce   :  { %5397 = vst [vmem:[#allocation44_spill] sm:$0xff] %v3538_v55  ;;  %5398 = vst [vmem:[#allocation45_spill] sm:$0xff] %v3540_v50  ;;  %v3558_v50 = vld [vmem:[%s5333_s1 + $0x160] sm:$0xff] }
  0xcf   :  { %634 = vperm.xlu1 %3006, %v3525_v2   ;;  %1030 = vperm.xlu0 %3008, %v3536_v62  }
  0xd1   :  { %v3549_v37 = vpop.permute.xlu1 %300  ;;  %v3551_v49 = vpop.permute.xlu0 %646 }
  0xd2   :  { %5399 = vst [vmem:[#allocation46_spill] sm:$0xff] %v3549_v37  ;;  %5400 = vst [vmem:[#allocation47_spill] sm:$0xff] %v3551_v49  ;;  %v3569_v49 = vld [vmem:[%s5333_s1 + $0x170] sm:$0xff] }
  0xd3   :  { %642 = vperm.xlu1 %3006, %v3536_v62   ;;  %1038 = vperm.xlu0 %3008, %v3547_v61   ;;  %5403 = vst [vmem:[#allocation50_spill] sm:$0xff] %v3569_v49 }
  0xd5   :  { %v3560_v55 = vpop.permute.xlu1 %310  ;;  %v3562_v47 = vpop.permute.xlu0 %654 }
  0xd6   :  { %5401 = vst [vmem:[#allocation48_spill] sm:$0xff] %v3560_v55  ;;  %5402 = vst [vmem:[#allocation49_spill] sm:$0xff] %v3562_v47  ;;  %v3580_v47 = vld [vmem:[%s5333_s1 + $0x180] sm:$0xff] }
  0xd7   :  { %650 = vperm.xlu1 %3006, %v3547_v61   ;;  %1046 = vperm.xlu0 %3008, %v3558_v50   ;;  %5406 = vst [vmem:[#allocation53_spill] sm:$0xff] %v3580_v47 }
  0xd9   :  { %v3571_v37 = vpop.permute.xlu1 %320  ;;  %v3573_v46 = vpop.permute.xlu0 %662 }
  0xda   :  { %5404 = vst [vmem:[#allocation51_spill] sm:$0xff] %v3571_v37  ;;  %5405 = vst [vmem:[#allocation52_spill] sm:$0xff] %v3573_v46  ;;  %v3591_v46 = vld [vmem:[%s5333_s1 + $0x190] sm:$0xff] }
  0xdb   :  { %658 = vperm.xlu1 %3006, %v3558_v50   ;;  %1054 = vperm.xlu0 %3008, %v3569_v49   ;;  %5409 = vst [vmem:[#allocation56_spill] sm:$0xff] %v3591_v46 }
  0xdd   :  { %v3582_v55 = vpop.permute.xlu1 %330  ;;  %v3584_v44 = vpop.permute.xlu0 %670 }
  0xde   :  { %5407 = vst [vmem:[#allocation54_spill] sm:$0xff] %v3582_v55  ;;  %5408 = vst [vmem:[#allocation55_spill] sm:$0xff] %v3584_v44  ;;  %v3602_v44 = vld [vmem:[%s5333_s1 + $0x1a0] sm:$0xff] }
  0xdf   :  { %666 = vperm.xlu1 %3006, %v3569_v49   ;;  %1062 = vperm.xlu0 %3008, %v3580_v47   ;;  %5412 = vst [vmem:[#allocation59_spill] sm:$0xff] %v3602_v44 }
  0xe1   :  { %v3593_v37 = vpop.permute.xlu1 %340  ;;  %v3595_v43 = vpop.permute.xlu0 %678 }
  0xe2   :  { %5410 = vst [vmem:[#allocation57_spill] sm:$0xff] %v3593_v37  ;;  %5411 = vst [vmem:[#allocation58_spill] sm:$0xff] %v3595_v43  ;;  %v3613_v43 = vld [vmem:[%s5333_s1 + $0x1b0] sm:$0xff] }
  0xe3   :  { %674 = vperm.xlu1 %3006, %v3580_v47   ;;  %1070 = vperm.xlu0 %3008, %v3591_v46   ;;  %5415 = vst [vmem:[#allocation62_spill] sm:$0xff] %v3613_v43 }
  0xe5   :  { %v3604_v55 = vpop.permute.xlu1 %350  ;;  %v3606_v41 = vpop.permute.xlu0 %686 }
  0xe6   :  { %5413 = vst [vmem:[#allocation60_spill] sm:$0xff] %v3604_v55  ;;  %5414 = vst [vmem:[#allocation61_spill] sm:$0xff] %v3606_v41  ;;  %v3624_v41 = vld [vmem:[%s5333_s1 + $0x1c0] sm:$0xff] }
  0xe7   :  { %682 = vperm.xlu1 %3006, %v3591_v46   ;;  %1078 = vperm.xlu0 %3008, %v3602_v44   ;;  %5418 = vst [vmem:[#allocation65_spill] sm:$0xff] %v3624_v41 }
  0xe9   :  { %v3615_v37 = vpop.permute.xlu1 %360  ;;  %v3617_v40 = vpop.permute.xlu0 %694 }
  0xea   :  { %5416 = vst [vmem:[#allocation63_spill] sm:$0xff] %v3615_v37  ;;  %5417 = vst [vmem:[#allocation64_spill] sm:$0xff] %v3617_v40  ;;  %v3635_v40 = vld [vmem:[%s5333_s1 + $0x1d0] sm:$0xff] }
  0xeb   :  { %690 = vperm.xlu1 %3006, %v3602_v44   ;;  %1086 = vperm.xlu0 %3008, %v3613_v43   ;;  %5421 = vst [vmem:[#allocation68_spill] sm:$0xff] %v3635_v40 }
  0xed   :  { %v3626_v55 = vpop.permute.xlu1 %370  ;;  %v3628_v46 = vpop.permute.xlu0 %702 }
  0xee   :  { %5419 = vst [vmem:[#allocation66_spill] sm:$0xff] %v3626_v55  ;;  %5420 = vst [vmem:[#allocation67_spill] sm:$0xff] %v3628_v46  ;;  %v3646_v46 = vld [vmem:[%s5333_s1 + $0x1e0] sm:$0xff] }
  0xef   :  { %698 = vperm.xlu1 %3006, %v3613_v43   ;;  %1094 = vperm.xlu0 %3008, %v3624_v41  }
  0xf1   :  { %v3637_v37 = vpop.permute.xlu1 %380  ;;  %v3639_v44 = vpop.permute.xlu0 %710 }
  0xf2   :  { %5422 = vst [vmem:[#allocation69_spill] sm:$0xff] %v3637_v37  ;;  %5423 = vst [vmem:[#allocation70_spill] sm:$0xff] %v3639_v44  ;;  %v3657_v44 = vld [vmem:[%s5333_s1 + $0x1f0] sm:$0xff] }
  0xf3   :  { %706 = vperm.xlu1 %3006, %v3624_v41   ;;  %1102 = vperm.xlu0 %3008, %v3635_v40  }
  0xf5   :  { %v3648_v55 = vpop.permute.xlu1 %390  ;;  %v3650_v43 = vpop.permute.xlu0 %718 }
  0xf6   :  { %5424 = vst [vmem:[#allocation71_spill] sm:$0xff] %v3648_v55  ;;  %5425 = vst [vmem:[#allocation72_spill] sm:$0xff] %v3650_v43 }
  0xf7   :  { %714 = vperm.xlu1 %3006, %v3635_v40   ;;  %1110 = vperm.xlu0 %3008, %v3646_v46   ;;  %v5355_v40 = vmov 3  }
  0xf9   :  { %v3659_v37 = vpop.permute.xlu1 %400  ;;  %v3661_v41 = vpop.permute.xlu0 %726 }
  0xfa   :  { %5426 = vst [vmem:[#allocation73_spill] sm:$0xff] %v3659_v37  ;;  %5427 = vst [vmem:[#allocation74_spill] sm:$0xff] %v3661_v41  ;;  %v5431_v41 = vmov 2  }
  0xfb   :  { %722 = vperm.xlu1 %3006, %v3646_v46   ;;  %1118 = vperm.xlu0 %3008, %v3657_v44  }
  0xfd   :  { %v3665_v55 = vpop.permute.xlu1 %410  ;;  %v3667_v43 = vpop.permute.xlu0 %734 }
  0xfe   :  { %5428 = vst [vmem:[#allocation75_spill] sm:$0xff] %v3665_v55  ;;  %5429 = vst [vmem:[#allocation76_spill] sm:$0xff] %v3667_v43 }
  0xff   :  { %730 = vperm.xlu1 %3006, %v3657_v44   ;;  %3009 = vset.pattern.permute.xlu0 %v5355_v40 }
 0x100   :  { %1258 = vperm.xlu0 %3009, %v3099_v1  }
 0x102   :  { %v3672_v47 = vpop.permute.xlu1 %486  ;;  %v3674_v37 = vpop.permute.xlu0 %874 }
 0x103   :  { %5430 = vst [vmem:[#allocation77_spill] sm:$0xff] %v3674_v37  ;;  %3007 = vset.pattern.permute.xlu1 %v5431_v41 }
 0x104   :  { %870 = vperm.xlu1 %3007, %v3099_v1   ;;  %1270 = vperm.xlu0 %3009, %v3108_v4  }
 0x106   :  { %v3679_v55 = vpop.permute.xlu1 %490  ;;  %v3681_v43 = vpop.permute.xlu0 %886 }
 0x107   :  { %5432 = vst [vmem:[#allocation78_spill] sm:$0xff] %v3679_v55  ;;  %5433 = vst [vmem:[#allocation79_spill] sm:$0xff] %v3681_v43 }
 0x108   :  { %878 = vperm.xlu1 %3007, %v3094_v0   ;;  %1278 = vperm.xlu0 %3009, %v3115_v5  }
 0x10a   :  { %v3685_v40 = vpop.permute.xlu1 %498  ;;  %v3687_v49 = vpop.permute.xlu0 %894 }
 0x10b   :  { %5434 = vst [vmem:[#allocation80_spill] sm:$0xff] %v3685_v40  ;;  %5435 = vst [vmem:[#allocation81_spill] sm:$0xff] %v3687_v49 }
 0x10c   :  { %882 = vperm.xlu1 %3007, %v3108_v4   ;;  %1286 = vperm.xlu0 %3009, %v3122_v6  }
 0x10e   :  { %v3691_v41 = vpop.permute.xlu1 %506  ;;  %v3693_v37 = vpop.permute.xlu0 %902 }
 0x10f   :  { %5436 = vst [vmem:[#allocation82_spill] sm:$0xff] %v3691_v41  ;;  %5437 = vst [vmem:[#allocation83_spill] sm:$0xff] %v3693_v37  ;;  %v1703_v41 = vld [vmem:[%s5334_s2 + $0x1d0] sm:$0xff] }
 0x110   :  { %890 = vperm.xlu1 %3007, %v3115_v5   ;;  %1294 = vperm.xlu0 %3009, %v3129_v7  }
 0x112   :  { %v3697_v43 = vpop.permute.xlu1 %514  ;;  %v3699_v55 = vpop.permute.xlu0 %910 }
 0x113   :  { %5438 = vst [vmem:[#allocation84_spill] sm:$0xff] %v3697_v43  ;;  %5439 = vst [vmem:[#allocation85_spill] sm:$0xff] %v3699_v55 }
 0x114   :  { %898 = vperm.xlu1 %3007, %v3122_v6   ;;  %1302 = vperm.xlu0 %3009, %v3136_v8  }
 0x116   :  { %v3703_v49 = vpop.permute.xlu1 %522  ;;  %v3705_v4 = vpop.permute.xlu0 %918 }
 0x117   :  { %5440 = vst [vmem:[#allocation86_spill] sm:$0xff] %v3703_v49  ;;  %5441 = vst [vmem:[#allocation87_spill] sm:$0xff] %v3705_v4 }
 0x118   :  { %906 = vperm.xlu1 %3007, %v3129_v7   ;;  %1310 = vperm.xlu0 %3009, %v3143_v9  }
 0x11a   :  { %v3709_v37 = vpop.permute.xlu1 %530  ;;  %v3711_v5 = vpop.permute.xlu0 %926 }
 0x11b   :  { %5442 = vst [vmem:[#allocation88_spill] sm:$0xff] %v3709_v37  ;;  %5443 = vst [vmem:[#allocation89_spill] sm:$0xff] %v3711_v5 }
 0x11c   :  { %914 = vperm.xlu1 %3007, %v3136_v8   ;;  %1318 = vperm.xlu0 %3009, %v3150_v10  }
 0x11e   :  { %v3715_v55 = vpop.permute.xlu1 %538  ;;  %v3717_v6 = vpop.permute.xlu0 %934 }
 0x11f   :  { %5444 = vst [vmem:[#allocation90_spill] sm:$0xff] %v3715_v55 }
 0x120   :  { %922 = vperm.xlu1 %3007, %v3143_v9   ;;  %1326 = vperm.xlu0 %3009, %v3157_v11  }
 0x122   :  { %v3721_v4 = vpop.permute.xlu1 %546  ;;  %v3723_v7 = vpop.permute.xlu0 %942 }
 0x123   :  { %5445 = vst [vmem:[#allocation91_spill] sm:$0xff] %v3723_v7 }
 0x124   :  { %930 = vperm.xlu1 %3007, %v3150_v10   ;;  %1334 = vperm.xlu0 %3009, %v3164_v12  }
 0x126   :  { %v3727_v5 = vpop.permute.xlu1 %554  ;;  %v3729_v8 = vpop.permute.xlu0 %950 }
 0x127   :  { %5446 = vst [vmem:[#allocation92_spill] sm:$0xff] %v3729_v8 }
 0x128   :  { %938 = vperm.xlu1 %3007, %v3157_v11   ;;  %1342 = vperm.xlu0 %3009, %v3171_v13  }
 0x12a   :  { %v3733_v55 = vpop.permute.xlu1 %562  ;;  %v3735_v9 = vpop.permute.xlu0 %958 }
 0x12b   :  { %5447 = vst [vmem:[#allocation93_spill] sm:$0xff] %v3733_v55  ;;  %5448 = vst [vmem:[#allocation94_spill] sm:$0xff] %v3735_v9 }
 0x12c   :  { %946 = vperm.xlu1 %3007, %v3164_v12   ;;  %1350 = vperm.xlu0 %3009, %v3178_v14  }
 0x12e   :  { %v3739_v37 = vpop.permute.xlu1 %570  ;;  %v3741_v10 = vpop.permute.xlu0 %966 }
 0x12f   :  { %5449 = vst [vmem:[#allocation95_spill] sm:$0xff] %v3739_v37  ;;  %5450 = vst [vmem:[#allocation96_spill] sm:$0xff] %v3741_v10 }
 0x130   :  { %954 = vperm.xlu1 %3007, %v3171_v13   ;;  %1358 = vperm.xlu0 %3009, %v3185_v15  }
 0x132   :  { %v3745_v49 = vpop.permute.xlu1 %578  ;;  %v3747_v11 = vpop.permute.xlu0 %974 }
 0x133   :  { %5451 = vst [vmem:[#allocation97_spill] sm:$0xff] %v3745_v49  ;;  %5452 = vst [vmem:[#allocation98_spill] sm:$0xff] %v3747_v11 }
 0x134   :  { %962 = vperm.xlu1 %3007, %v3178_v14   ;;  %1366 = vperm.xlu0 %3009, %v3192_v16  }
 0x136   :  { %v3751_v43 = vpop.permute.xlu1 %586  ;;  %v3753_v12 = vpop.permute.xlu0 %982 }
 0x137   :  { %5453 = vst [vmem:[#allocation99_spill] sm:$0xff] %v3751_v43  ;;  %5454 = vst [vmem:[#allocation100_spill] sm:$0xff] %v3753_v12 }
 0x138   :  { %970 = vperm.xlu1 %3007, %v3185_v15   ;;  %1374 = vperm.xlu0 %3009, %v3199_v17  }
 0x13a   :  { %v3757_v10 = vpop.permute.xlu1 %594  ;;  %v3759_v13 = vpop.permute.xlu0 %990 }
 0x13b   :  { %5455 = vst [vmem:[#allocation101_spill] sm:$0xff] %v3757_v10  ;;  %5456 = vst [vmem:[#allocation102_spill] sm:$0xff] %v3759_v13 }
 0x13c   :  { %978 = vperm.xlu1 %3007, %v3192_v16   ;;  %1382 = vperm.xlu0 %3009, %v3206_v18  }
 0x13e   :  { %v3763_v11 = vpop.permute.xlu1 %602  ;;  %v3765_v14 = vpop.permute.xlu0 %998 }
 0x13f   :  { %5457 = vst [vmem:[#allocation103_spill] sm:$0xff] %v3763_v11 }
 0x140   :  { %986 = vperm.xlu1 %3007, %v3199_v17   ;;  %1390 = vperm.xlu0 %3009, %v3213_v19  }
 0x142   :  { %v3769_v12 = vpop.permute.xlu1 %610  ;;  %v3771_v15 = vpop.permute.xlu0 %1006 }
 0x143   :  { %5458 = vst [vmem:[#allocation104_spill] sm:$0xff] %v3771_v15 }
 0x144   :  { %994 = vperm.xlu1 %3007, %v3206_v18   ;;  %1398 = vperm.xlu0 %3009, %v3220_v20  }
 0x146   :  { %v3775_v13 = vpop.permute.xlu1 %618  ;;  %v3777_v16 = vpop.permute.xlu0 %1014 }
 0x147   :  { %5459 = vst [vmem:[#allocation105_spill] sm:$0xff] %v3775_v13  ;;  %5460 = vst [vmem:[#allocation106_spill] sm:$0xff] %v3777_v16  ;;  %v5600_v13 = vld [vmem:[#allocation13_spill] sm:$0xff] }
 0x148   :  { %1002 = vperm.xlu1 %3007, %v3213_v19   ;;  %1406 = vperm.xlu0 %3009, %v3227_v21  }
 0x14a   :  { %v3781_v11 = vpop.permute.xlu1 %626  ;;  %v3783_v17 = vpop.permute.xlu0 %1022 }
 0x14b   :  { %5461 = vst [vmem:[#allocation107_spill] sm:$0xff] %v3781_v11  ;;  %5462 = vst [vmem:[#allocation108_spill] sm:$0xff] %v3783_v17 }
 0x14c   :  { %1010 = vperm.xlu1 %3007, %v3220_v20   ;;  %1414 = vperm.xlu0 %3009, %v3234_v22  }
 0x14e   :  { %v3787_v10 = vpop.permute.xlu1 %634  ;;  %v3789_v18 = vpop.permute.xlu0 %1030 }
 0x14f   :  { %5463 = vst [vmem:[#allocation109_spill] sm:$0xff] %v3787_v10  ;;  %5464 = vst [vmem:[#allocation110_spill] sm:$0xff] %v3789_v18 }
 0x150   :  { %1018 = vperm.xlu1 %3007, %v3227_v21   ;;  %1422 = vperm.xlu0 %3009, %v3241_v23  }
 0x152   :  { %v3793_v43 = vpop.permute.xlu1 %642  ;;  %v3795_v19 = vpop.permute.xlu0 %1038 }
 0x153   :  { %5465 = vst [vmem:[#allocation111_spill] sm:$0xff] %v3793_v43  ;;  %5466 = vst [vmem:[#allocation112_spill] sm:$0xff] %v3795_v19 }
 0x154   :  { %1026 = vperm.xlu1 %3007, %v3234_v22   ;;  %1430 = vperm.xlu0 %3009, %v3248_v24  }
 0x156   :  { %v3799_v17 = vpop.permute.xlu1 %650  ;;  %v3801_v20 = vpop.permute.xlu0 %1046 }
 0x157   :  { %5467 = vst [vmem:[#allocation113_spill] sm:$0xff] %v3799_v17  ;;  %5468 = vst [vmem:[#allocation114_spill] sm:$0xff] %v3801_v20 }
 0x158   :  { %1034 = vperm.xlu1 %3007, %v3241_v23   ;;  %1438 = vperm.xlu0 %3009, %v3255_v25  }
 0x15a   :  { %v3805_v18 = vpop.permute.xlu1 %658  ;;  %v3807_v21 = vpop.permute.xlu0 %1054 }
 0x15b   :  { %5469 = vst [vmem:[#allocation115_spill] sm:$0xff] %v3805_v18  ;;  %5470 = vst [vmem:[#allocation116_spill] sm:$0xff] %v3807_v21 }
 0x15c   :  { %1042 = vperm.xlu1 %3007, %v3248_v24   ;;  %1446 = vperm.xlu0 %3009, %v3262_v26  }
 0x15e   :  { %v3811_v19 = vpop.permute.xlu1 %666  ;;  %v3813_v22 = vpop.permute.xlu0 %1062 }
 0x15f   :  { %5471 = vst [vmem:[#allocation117_spill] sm:$0xff] %v3811_v19 }
 0x160   :  { %1050 = vperm.xlu1 %3007, %v3255_v25   ;;  %1454 = vperm.xlu0 %3009, %v3269_v27  }
 0x162   :  { %v3817_v20 = vpop.permute.xlu1 %674  ;;  %v3819_v23 = vpop.permute.xlu0 %1070 }
 0x163   :  { %5472 = vst [vmem:[#allocation118_spill] sm:$0xff] %v3819_v23 }
 0x164   :  { %1058 = vperm.xlu1 %3007, %v3262_v26   ;;  %1462 = vperm.xlu0 %3009, %v3276_v28  }
 0x166   :  { %v3823_v21 = vpop.permute.xlu1 %682  ;;  %v3825_v24 = vpop.permute.xlu0 %1078 }
 0x167   :  { %5473 = vst [vmem:[#allocation119_spill] sm:$0xff] %v3823_v21  ;;  %5474 = vst [vmem:[#allocation120_spill] sm:$0xff] %v3825_v24  ;;  %v5604_v21 = vld [vmem:[#allocation23_spill] sm:$0xff] }
 0x168   :  { %1066 = vperm.xlu1 %3007, %v3269_v27   ;;  %1470 = vperm.xlu0 %3009, %v3283_v29  }
 0x16a   :  { %v3829_v19 = vpop.permute.xlu1 %690  ;;  %v3831_v25 = vpop.permute.xlu0 %1086 }
 0x16b   :  { %5475 = vst [vmem:[#allocation121_spill] sm:$0xff] %v3829_v19  ;;  %5476 = vst [vmem:[#allocation122_spill] sm:$0xff] %v3831_v25  ;;  %v5529_v25 = vld [vmem:[#allocation53_spill] sm:$0xff] }
 0x16c   :  { %1074 = vperm.xlu1 %3007, %v3276_v28   ;;  %1478 = vperm.xlu0 %3009, %v3290_v30  }
 0x16e   :  { %v3835_v18 = vpop.permute.xlu1 %698  ;;  %v3837_v26 = vpop.permute.xlu0 %1094 }
 0x16f   :  { %5477 = vst [vmem:[#allocation123_spill] sm:$0xff] %v3835_v18  ;;  %5478 = vst [vmem:[#allocation124_spill] sm:$0xff] %v3837_v26  ;;  %v5542_v18 = vld [vmem:[#allocation68_spill] sm:$0xff] }
 0x170   :  { %1082 = vperm.xlu1 %3007, %v3283_v29   ;;  %1486 = vperm.xlu0 %3009, %v3297_v31  }
 0x172   :  { %v3841_v17 = vpop.permute.xlu1 %706  ;;  %v3843_v27 = vpop.permute.xlu0 %1102 }
 0x173   :  { %5479 = vst [vmem:[#allocation125_spill] sm:$0xff] %v3841_v17  ;;  %5480 = vst [vmem:[#allocation126_spill] sm:$0xff] %v3843_v27  ;;  %v5485_v17 = vmov 0  }
 0x174   :  { %1090 = vperm.xlu1 %3007, %v3290_v30   ;;  %1498 = vperm.xlu0 %3009, %v3646_v46  }
 0x176   :  { %v3847_v43 = vpop.permute.xlu1 %714  ;;  %v3849_v28 = vpop.permute.xlu0 %1110 }
 0x177   :  { %5481 = vst [vmem:[#allocation127_spill] sm:$0xff] %v3847_v43  ;;  %5482 = vst [vmem:[#allocation128_spill] sm:$0xff] %v3849_v28 }
 0x178   :  { %1098 = vperm.xlu1 %3007, %v3297_v31   ;;  %1506 = vperm.xlu0 %3009, %v3657_v44  }
 0x17a   :  { %v3853_v26 = vpop.permute.xlu1 %722  ;;  %v3855_v29 = vpop.permute.xlu0 %1118 }
 0x17b   :  { %5483 = vst [vmem:[#allocation129_spill] sm:$0xff] %v3853_v26  ;;  %5484 = vst [vmem:[#allocation130_spill] sm:$0xff] %v3855_v29 }
 0x17c   :  { %1106 = vperm.xlu1 %3007, %v3304_v32   ;;  %3016 = vset.pattern.permute.xlu0 %v5485_v17 }
 0x17d   :  { %95 = vperm.xlu0 %3016, %v3099_v1   ;;  %v5490_v1 = vmov 3  }
 0x17e   :  { %v3860_v30 = vpop.permute.xlu1 %730 }
 0x17f   :  { %5486 = vst [vmem:[#allocation131_spill] sm:$0xff] %v3860_v30  ;;  %v3862_v27 = vpop.permute.xlu0 %1258 }
 0x180   :  { %1114 = vperm.xlu1 %3007, %v3311_v33  }
 0x181   :  { %100 = vperm.xlu0 %3016, %v3325_v35  }
 0x183   :  { %v3866_v31 = vpop.permute.xlu1 %870  ;;  %v3868_v28 = vpop.permute.xlu0 %1270 }
 0x184   :  { %5487 = vst [vmem:[#allocation132_spill] sm:$0xff] %v3868_v28  ;;  %1122 = vperm.xlu1 %3007, %v3318_v34  }
 0x185   :  { %115 = vperm.xlu0 %3016, %v3338_v39  }
 0x187   :  { %v3872_v32 = vpop.permute.xlu1 %878  ;;  %v3874_v29 = vpop.permute.xlu0 %1278 }
 0x188   :  { %5488 = vst [vmem:[#allocation133_spill] sm:$0xff] %v3872_v32  ;;  %5489 = vst [vmem:[#allocation134_spill] sm:$0xff] %v3874_v29  ;;  %3010 = vset.pattern.permute.xlu1 %v5490_v1  ;;  %v1707_v29 = vld [vmem:[%s5334_s2 + $0x1f0] sm:$0xff] }
 0x189   :  { %1262 = vperm.xlu1 %3010, %v3325_v35   ;;  %125 = vperm.xlu0 %3016, %v3349_v42  }
 0x18b   :  { %v3879_v33 = vpop.permute.xlu1 %882  ;;  %v3881_v30 = vpop.permute.xlu0 %1286 }
 0x18c   :  { %5491 = vst [vmem:[#allocation135_spill] sm:$0xff] %v3879_v33  ;;  %5492 = vst [vmem:[#allocation136_spill] sm:$0xff] %v3881_v30  ;;  %v1648_v30 = vld [vmem:[%s5334_s2 + $0x18] sm:$0xff] }
 0x18d   :  { %1266 = vperm.xlu1 %3010, %v3094_v0   ;;  %135 = vperm.xlu0 %3016, %v3360_v45  }
 0x18f   :  { %v3885_v34 = vpop.permute.xlu1 %890  ;;  %v3887_v26 = vpop.permute.xlu0 %1294 }
 0x190   :  { %5493 = vst [vmem:[#allocation137_spill] sm:$0xff] %v3885_v34  ;;  %5494 = vst [vmem:[#allocation138_spill] sm:$0xff] %v3887_v26  ;;  %v5594_v34 = vld [vmem:[#allocation9_spill] sm:$0xff] }
 0x191   :  { %1274 = vperm.xlu1 %3010, %v3338_v39   ;;  %145 = vperm.xlu0 %3016, %v3371_v48  }
 0x193   :  { %v3891_v43 = vpop.permute.xlu1 %898  ;;  %v3893_v35 = vpop.permute.xlu0 %1302 }
 0x194   :  { %5495 = vst [vmem:[#allocation139_spill] sm:$0xff] %v3891_v43  ;;  %5496 = vst [vmem:[#allocation140_spill] sm:$0xff] %v3893_v35 }
 0x195   :  { %1282 = vperm.xlu1 %3010, %v3349_v42   ;;  %155 = vperm.xlu0 %3016, %v3382_v51  }
 0x197   :  { %v3897_v49 = vpop.permute.xlu1 %906  ;;  %v3899_v0 = vpop.permute.xlu0 %1310 }
 0x198   :  { %5497 = vst [vmem:[#allocation141_spill] sm:$0xff] %v3897_v49  ;;  %5498 = vst [vmem:[#allocation142_spill] sm:$0xff] %v3899_v0 }
 0x199   :  { %1290 = vperm.xlu1 %3010, %v3360_v45   ;;  %165 = vperm.xlu0 %3016, %v3393_v54  }
 0x19b   :  { %v3903_v26 = vpop.permute.xlu1 %914  ;;  %v3905_v39 = vpop.permute.xlu0 %1318 }
 0x19c   :  { %5499 = vst [vmem:[#allocation143_spill] sm:$0xff] %v3903_v26  ;;  %5500 = vst [vmem:[#allocation144_spill] sm:$0xff] %v3905_v39 }
 0x19d   :  { %1298 = vperm.xlu1 %3010, %v3371_v48   ;;  %175 = vperm.xlu0 %3016, %v3404_v57  }
 0x19f   :  { %v3909_v35 = vpop.permute.xlu1 %922  ;;  %v3911_v42 = vpop.permute.xlu0 %1326 }
 0x1a0   :  { %5501 = vst [vmem:[#allocation145_spill] sm:$0xff] %v3909_v35 }
 0x1a1   :  { %1306 = vperm.xlu1 %3010, %v3382_v51   ;;  %185 = vperm.xlu0 %3016, %v3415_v60  }
 0x1a3   :  { %v3915_v0 = vpop.permute.xlu1 %930  ;;  %v3917_v45 = vpop.permute.xlu0 %1334 }
 0x1a4   :  { %5502 = vst [vmem:[#allocation146_spill] sm:$0xff] %v3915_v0  ;;  %5503 = vst [vmem:[#allocation147_spill] sm:$0xff] %v3917_v45  ;;  %v5614_v45 = vld [vmem:[#allocation7_spill] sm:$0xff] }
 0x1a5   :  { %1314 = vperm.xlu1 %3010, %v3393_v54   ;;  %195 = vperm.xlu0 %3016, %v3426_v63  }
 0x1a7   :  { %v3921_v39 = vpop.permute.xlu1 %938  ;;  %v3923_v48 = vpop.permute.xlu0 %1342 }
 0x1a8   :  { %5504 = vst [vmem:[#allocation148_spill] sm:$0xff] %v3923_v48 }
 0x1a9   :  { %1322 = vperm.xlu1 %3010, %v3404_v57   ;;  %205 = vperm.xlu0 %3016, %v3437_v38  }
 0x1ab   :  { %v3927_v35 = vpop.permute.xlu1 %946  ;;  %v3929_v51 = vpop.permute.xlu0 %1350 }
 0x1ac   :  { %5505 = vst [vmem:[#allocation149_spill] sm:$0xff] %v3929_v51 }
 0x1ad   :  { %1330 = vperm.xlu1 %3010, %v3415_v60   ;;  %215 = vperm.xlu0 %3016, %v3448_v56  }
 0x1af   :  { %v3933_v0 = vpop.permute.xlu1 %954  ;;  %v3935_v54 = vpop.permute.xlu0 %1358 }
 0x1b0   :  { %5506 = vst [vmem:[#allocation150_spill] sm:$0xff] %v3933_v0  ;;  %5507 = vst [vmem:[#allocation151_spill] sm:$0xff] %v3935_v54 }
 0x1b1   :  { %1338 = vperm.xlu1 %3010, %v3426_v63   ;;  %225 = vperm.xlu0 %3016, %v3459_v52  }
 0x1b3   :  { %v3939_v26 = vpop.permute.xlu1 %962  ;;  %v3941_v57 = vpop.permute.xlu0 %1366 }
 0x1b4   :  { %5508 = vst [vmem:[#allocation152_spill] sm:$0xff] %v3939_v26  ;;  %5509 = vst [vmem:[#allocation153_spill] sm:$0xff] %v3941_v57 }
 0x1b5   :  { %1346 = vperm.xlu1 %3010, %v3437_v38   ;;  %235 = vperm.xlu0 %3016, %v3470_v53  }
 0x1b7   :  { %v3945_v49 = vpop.permute.xlu1 %970  ;;  %v3947_v60 = vpop.permute.xlu0 %1374 }
 0x1b8   :  { %5510 = vst [vmem:[#allocation154_spill] sm:$0xff] %v3945_v49  ;;  %5511 = vst [vmem:[#allocation155_spill] sm:$0xff] %v3947_v60  ;;  %v5526_v49 = vld [vmem:[#allocation50_spill] sm:$0xff] }
 0x1b9   :  { %1354 = vperm.xlu1 %3010, %v3448_v56   ;;  %245 = vperm.xlu0 %3016, %v3481_v36  }
 0x1bb   :  { %v3951_v54 = vpop.permute.xlu1 %978  ;;  %v3953_v63 = vpop.permute.xlu0 %1382 }
 0x1bc   :  { %5512 = vst [vmem:[#allocation156_spill] sm:$0xff] %v3951_v54  ;;  %5513 = vst [vmem:[#allocation157_spill] sm:$0xff] %v3953_v63 }
 0x1bd   :  { %1362 = vperm.xlu1 %3010, %v3459_v52   ;;  %255 = vperm.xlu0 %3016, %v3492_v58  }
 0x1bf   :  { %v3957_v57 = vpop.permute.xlu1 %986  ;;  %v3959_v38 = vpop.permute.xlu0 %1390 }
 0x1c0   :  { %5514 = vst [vmem:[#allocation158_spill] sm:$0xff] %v3957_v57 }
 0x1c1   :  { %1370 = vperm.xlu1 %3010, %v3470_v53   ;;  %265 = vperm.xlu0 %3016, %v3503_v59  }
 0x1c3   :  { %v3963_v60 = vpop.permute.xlu1 %994  ;;  %v3965_v56 = vpop.permute.xlu0 %1398 }
 0x1c4   :  { %5515 = vst [vmem:[#allocation159_spill] sm:$0xff] %v3963_v60  ;;  %5516 = vst [vmem:[#allocation160_spill] sm:$0xff] %v3965_v56 }
 0x1c5   :  { %1378 = vperm.xlu1 %3010, %v3481_v36   ;;  %275 = vperm.xlu0 %3016, %v3514_v3  }
 0x1c7   :  { %v3969_v63 = vpop.permute.xlu1 %1002  ;;  %v3971_v52 = vpop.permute.xlu0 %1406 }
 0x1c8   :  { %5517 = vst [vmem:[#allocation161_spill] sm:$0xff] %v3971_v52 }
 0x1c9   :  { %1386 = vperm.xlu1 %3010, %v3492_v58   ;;  %285 = vperm.xlu0 %3016, %v3525_v2  }
 0x1cb   :  { %v3975_v57 = vpop.permute.xlu1 %1010  ;;  %v3977_v53 = vpop.permute.xlu0 %1414 }
 0x1cc   :  { %5518 = vst [vmem:[#allocation162_spill] sm:$0xff] %v3975_v57  ;;  %5519 = vst [vmem:[#allocation163_spill] sm:$0xff] %v3977_v53 }
 0x1cd   :  { %1394 = vperm.xlu1 %3010, %v3503_v59   ;;  %295 = vperm.xlu0 %3016, %v3536_v62  }
 0x1cf   :  { %v3981_v60 = vpop.permute.xlu1 %1018  ;;  %v3983_v36 = vpop.permute.xlu0 %1422 }
 0x1d0   :  { %5520 = vst [vmem:[#allocation164_spill] sm:$0xff] %v3981_v60  ;;  %5521 = vst [vmem:[#allocation165_spill] sm:$0xff] %v3983_v36  ;;  %v1671_v60 = vld [vmem:[%s5334_s2 + $0xd0] sm:$0xff] }
 0x1d1   :  { %1402 = vperm.xlu1 %3010, %v3514_v3   ;;  %305 = vperm.xlu0 %3016, %v3547_v61  }
 0x1d3   :  { %v3987_v54 = vpop.permute.xlu1 %1026  ;;  %v3989_v58 = vpop.permute.xlu0 %1430 }
 0x1d4   :  { %5522 = vst [vmem:[#allocation166_spill] sm:$0xff] %v3987_v54  ;;  %5523 = vst [vmem:[#allocation167_spill] sm:$0xff] %v3989_v58 }
 0x1d5   :  { %1410 = vperm.xlu1 %3010, %v3525_v2   ;;  %315 = vperm.xlu0 %3016, %v3558_v50  }
 0x1d7   :  { %v3993_v53 = vpop.permute.xlu1 %1034  ;;  %v3995_v59 = vpop.permute.xlu0 %1438 }
 0x1d8   :  { %5524 = vst [vmem:[#allocation168_spill] sm:$0xff] %v3993_v53  ;;  %5525 = vst [vmem:[#allocation169_spill] sm:$0xff] %v3995_v59  ;;  %v5531_v53 = vld [vmem:[#allocation56_spill] sm:$0xff] }
 0x1d9   :  { %1418 = vperm.xlu1 %3010, %v3536_v62   ;;  %325 = vperm.xlu0 %3016, %v5526_v49  }
 0x1db   :  { %v3999_v36 = vpop.permute.xlu1 %1042  ;;  %v4001_v3 = vpop.permute.xlu0 %1446 }
 0x1dc   :  { %5527 = vst [vmem:[#allocation50_spill] sm:$0xff] %v3999_v36  ;;  %5528 = vst [vmem:[#allocation170_spill] sm:$0xff] %v4001_v3  ;;  %v5534_v36 = vld [vmem:[#allocation59_spill] sm:$0xff] }
 0x1dd   :  { %1426 = vperm.xlu1 %3010, %v3547_v61   ;;  %335 = vperm.xlu0 %3016, %v5529_v25  }
 0x1df   :  { %v4005_v58 = vpop.permute.xlu1 %1050  ;;  %v4007_v2 = vpop.permute.xlu0 %1454 }
 0x1e0   :  { %5530 = vst [vmem:[#allocation53_spill] sm:$0xff] %v4005_v58  ;;  %v5536_v58 = vld [vmem:[#allocation62_spill] sm:$0xff] }
 0x1e1   :  { %1434 = vperm.xlu1 %3010, %v3558_v50   ;;  %345 = vperm.xlu0 %3016, %v5531_v53  }
 0x1e3   :  { %v4011_v59 = vpop.permute.xlu1 %1058  ;;  %v4013_v62 = vpop.permute.xlu0 %1462 }
 0x1e4   :  { %5532 = vst [vmem:[#allocation56_spill] sm:$0xff] %v4011_v59  ;;  %5533 = vst [vmem:[#allocation171_spill] sm:$0xff] %v4013_v62  ;;  %v5539_v59 = vld [vmem:[#allocation65_spill] sm:$0xff]  ;;  %v5599_v62 = vld [vmem:[#allocation12_spill] sm:$0xff] }
 0x1e5   :  { %1442 = vperm.xlu1 %3010, %v5526_v49   ;;  %355 = vperm.xlu0 %3016, %v5534_v36  }
 0x1e7   :  { %v4017_v3 = vpop.permute.xlu1 %1066  ;;  %v4019_v61 = vpop.permute.xlu0 %1470 }
 0x1e8   :  { %5535 = vst [vmem:[#allocation59_spill] sm:$0xff] %v4019_v61 }
 0x1e9   :  { %1450 = vperm.xlu1 %3010, %v5529_v25   ;;  %365 = vperm.xlu0 %3016, %v5536_v58  }
 0x1eb   :  { %v4023_v10 = vpop.permute.xlu1 %1074  ;;  %v4025_v50 = vpop.permute.xlu0 %1478 }
 0x1ec   :  { %5537 = vst [vmem:[#allocation62_spill] sm:$0xff] %v4023_v10  ;;  %5538 = vst [vmem:[#allocation172_spill] sm:$0xff] %v4025_v50  ;;  %v5610_v10 = vld [vmem:[#allocation29_spill] sm:$0xff] }
 0x1ed   :  { %1458 = vperm.xlu1 %3010, %v5531_v53   ;;  %375 = vperm.xlu0 %3016, %v5539_v59  }
 0x1ef   :  { %v4029_v54 = vpop.permute.xlu1 %1082  ;;  %v4031_v49 = vpop.permute.xlu0 %1486 }
 0x1f0   :  { %5540 = vst [vmem:[#allocation65_spill] sm:$0xff] %v4029_v54  ;;  %5541 = vst [vmem:[#allocation173_spill] sm:$0xff] %v4031_v49 }
 0x1f1   :  { %1466 = vperm.xlu1 %3010, %v5534_v36   ;;  %385 = vperm.xlu0 %3016, %v5542_v18   ;;  %v1661_v36 = vld [vmem:[%s5334_s2 + $0x80] sm:$0xff] }
 0x1f3   :  { %v4035_v51 = vpop.permute.xlu1 %1090  ;;  %v4037_v25 = vpop.permute.xlu0 %1498 }
 0x1f4   :  { %5543 = vst [vmem:[#allocation68_spill] sm:$0xff] %v4035_v51  ;;  %5544 = vst [vmem:[#allocation174_spill] sm:$0xff] %v4037_v25 }
 0x1f5   :  { %1474 = vperm.xlu1 %3010, %v5536_v58   ;;  %395 = vperm.xlu0 %3016, %v3646_v46   ;;  %v1646_v46 = vld [vmem:[%s5334_s2 + $0x8] sm:$0xff] }
 0x1f7   :  { %v4041_v50 = vpop.permute.xlu1 %1098  ;;  %v4043_v53 = vpop.permute.xlu0 %1506 }
 0x1f8   :  { %5545 = vst [vmem:[#allocation175_spill] sm:$0xff] %v4041_v50  ;;  %5546 = vst [vmem:[#allocation176_spill] sm:$0xff] %v4043_v53  ;;  %v1645_v53 = vld [vmem:[%s5334_s2] sm:$0xff] }
 0x1f9   :  { %1482 = vperm.xlu1 %3010, %v5539_v59   ;;  %405 = vperm.xlu0 %3016, %v3657_v44   ;;  %v1662_v44 = vld [vmem:[%s5334_s2 + $0x88] sm:$0xff] }
 0x1fb   :  { %v4050_v49 = vpop.permute.xlu1 %1106 }
 0x1fc   :  { %5547 = vst [vmem:[#allocation177_spill] sm:$0xff] %v4050_v49  ;;  %v4052_v51 = vpop.permute.xlu0 %95 }
 0x1fd   :  { %1490 = vperm.xlu1 %3010, %v5542_v18   ;;  %1791 = vperm.xlu0 %3016, %v1661_v36   ;;  %v1694_v18 = vld [vmem:[%s5334_s2 + $0x188] sm:$0xff] }
 0x1ff   :  { %v4058_v58 = vpop.permute.xlu1 %1114 }
 0x200   :  { %5548 = vst [vmem:[#allocation178_spill] sm:$0xff] %v4058_v58  ;;  %v4063_v59 = vpop.permute.xlu0 %100  ;;  %v1678_v58 = vld [vmem:[%s5334_s2 + $0x108] sm:$0xff] }
 0x201   :  { %3011 = vset.pattern.permute.xlu1 %v5485_v17  ;;  %1716 = vperm.xlu0 %3016, %v1646_v46   ;;  %v1693_v46 = vld [vmem:[%s5334_s2 + $0x180] sm:$0xff] }
 0x202   :  { %1796 = vperm.xlu1 %3011, %v1662_v44  }
 0x203   :  { %v4069_v36 = vpop.permute.xlu1 %1122 }
 0x204   :  { %5549 = vst [vmem:[#allocation179_spill] sm:$0xff] %v4069_v36  ;;  %v4074_v25 = vpop.permute.xlu0 %115  ;;  %v1664_v36 = vld [vmem:[%s5334_s2 + $0x98] sm:$0xff] }
 0x205   :  { %5550 = vst [vmem:[#allocation180_spill] sm:$0xff] %v4074_v25  ;;  %1956 = vperm.xlu0 %3016, %v1694_v18  }
 0x206   :  { %1711 = vperm.xlu1 %3011, %v1645_v53   ;;  %v1677_v53 = vld [vmem:[%s5334_s2 + $0x100] sm:$0xff] }
 0x208   :  { %v4082_v44 = vpop.permute.xlu1 %1262  ;;  %v4084_v49 = vpop.permute.xlu0 %125 }
 0x209   :  { %5551 = vst [vmem:[#allocation181_spill] sm:$0xff] %v4084_v49  ;;  %1876 = vperm.xlu0 %3016, %v1678_v58   ;;  %v1663_v58 = vld [vmem:[%s5334_s2 + $0x90] sm:$0xff] }
 0x20a   :  { %1951 = vperm.xlu1 %3011, %v1693_v46  }
 0x20c   :  { %v4092_v18 = vpop.permute.xlu1 %1266  ;;  %v4094_v50 = vpop.permute.xlu0 %135 }
 0x20d   :  { %5552 = vst [vmem:[#allocation182_spill] sm:$0xff] %v4092_v18  ;;  %5553 = vst [vmem:[#allocation183_spill] sm:$0xff] %v4094_v50  ;;  %1806 = vperm.xlu0 %3016, %v1664_v36   ;;  %v1696_v50 = vld [vmem:[%s5334_s2 + $0x198] sm:$0xff]  ;;  %v1647_v36 = vld [vmem:[%s5334_s2 + $0x10] sm:$0xff] }
 0x20e   :  { %1871 = vperm.xlu1 %3011, %v1677_v53  }
 0x210   :  { %v4102_v46 = vpop.permute.xlu1 %1274  ;;  %v4104_v9 = vpop.permute.xlu0 %145 }
 0x211   :  { %5554 = vst [vmem:[#allocation184_spill] sm:$0xff] %v4102_v46  ;;  %5555 = vst [vmem:[#allocation185_spill] sm:$0xff] %v4104_v9  ;;  %1726 = vperm.xlu0 %3016, %v1648_v30   ;;  %v1680_v9 = vld [vmem:[%s5334_s2 + $0x118] sm:$0xff]  ;;  %v1695_v30 = vld [vmem:[%s5334_s2 + $0x190] sm:$0xff] }
 0x212   :  { %1801 = vperm.xlu1 %3011, %v1663_v58  }
 0x214   :  { %v4112_v53 = vpop.permute.xlu1 %1282  ;;  %v4114_v49 = vpop.permute.xlu0 %155 }
 0x215   :  { %5556 = vst [vmem:[#allocation186_spill] sm:$0xff] %v4112_v53  ;;  %5557 = vst [vmem:[#allocation187_spill] sm:$0xff] %v4114_v49  ;;  %1966 = vperm.xlu0 %3016, %v1696_v50   ;;  %v1666_v49 = vld [vmem:[%s5334_s2 + $0xa8] sm:$0xff]  ;;  %v1679_v50 = vld [vmem:[%s5334_s2 + $0x110] sm:$0xff] }
 0x216   :  { %1721 = vperm.xlu1 %3011, %v1647_v36  }
 0x218   :  { %v4122_v58 = vpop.permute.xlu1 %1290  ;;  %v4124_v43 = vpop.permute.xlu0 %165 }
 0x219   :  { %5558 = vst [vmem:[#allocation188_spill] sm:$0xff] %v4122_v58  ;;  %5559 = vst [vmem:[#allocation189_spill] sm:$0xff] %v4124_v43  ;;  %1886 = vperm.xlu0 %3016, %v1680_v9   ;;  %v1650_v43 = vld [vmem:[%s5334_s2 + $0x28] sm:$0xff]  ;;  %v1665_v9 = vld [vmem:[%s5334_s2 + $0xa0] sm:$0xff] }
 0x21a   :  { %1961 = vperm.xlu1 %3011, %v1695_v30  }
 0x21c   :  { %v4132_v36 = vpop.permute.xlu1 %1298  ;;  %v4134_v53 = vpop.permute.xlu0 %175 }
 0x21d   :  { %5560 = vst [vmem:[#allocation190_spill] sm:$0xff] %v4132_v36  ;;  %1816 = vperm.xlu0 %3016, %v1666_v49   ;;  %v1698_v36 = vld [vmem:[%s5334_s2 + $0x1a8] sm:$0xff]  ;;  %v1649_v49 = vld [vmem:[%s5334_s2 + $0x20] sm:$0xff] }
 0x21e   :  { %1881 = vperm.xlu1 %3011, %v1679_v50  }
 0x220   :  { %v4142_v30 = vpop.permute.xlu1 %1306  ;;  %v4144_v58 = vpop.permute.xlu0 %185 }
 0x221   :  { %5561 = vst [vmem:[#allocation191_spill] sm:$0xff] %v4142_v30  ;;  %1736 = vperm.xlu0 %3016, %v1650_v43   ;;  %v1682_v30 = vld [vmem:[%s5334_s2 + $0x128] sm:$0xff]  ;;  %v1697_v43 = vld [vmem:[%s5334_s2 + $0x1a0] sm:$0xff] }
 0x222   :  { %1811 = vperm.xlu1 %3011, %v1665_v9  }
 0x224   :  { %v4152_v50 = vpop.permute.xlu1 %1314  ;;  %v4154_v52 = vpop.permute.xlu0 %195 }
 0x225   :  { %5562 = vst [vmem:[#allocation192_spill] sm:$0xff] %v4152_v50  ;;  %5563 = vst [vmem:[#allocation193_spill] sm:$0xff] %v4154_v52  ;;  %1976 = vperm.xlu0 %3016, %v1698_v36   ;;  %v1668_v50 = vld [vmem:[%s5334_s2 + $0xb8] sm:$0xff]  ;;  %v1681_v36 = vld [vmem:[%s5334_s2 + $0x120] sm:$0xff] }
 0x226   :  { %1731 = vperm.xlu1 %3011, %v1649_v49  }
 0x228   :  { %v4162_v9 = vpop.permute.xlu1 %1322  ;;  %v4164_v16 = vpop.permute.xlu0 %205 }
 0x229   :  { %5564 = vst [vmem:[#allocation194_spill] sm:$0xff] %v4164_v16  ;;  %1896 = vperm.xlu0 %3016, %v1682_v30   ;;  %v1652_v16 = vld [vmem:[%s5334_s2 + $0x38] sm:$0xff]  ;;  %v1667_v30 = vld [vmem:[%s5334_s2 + $0xb0] sm:$0xff] }
 0x22a   :  { %1971 = vperm.xlu1 %3011, %v1697_v43  }
 0x22c   :  { %v4172_v49 = vpop.permute.xlu1 %1330  ;;  %v4174_v37 = vpop.permute.xlu0 %215 }
 0x22d   :  { %5565 = vst [vmem:[#allocation195_spill] sm:$0xff] %v4172_v49  ;;  %5566 = vst [vmem:[#allocation196_spill] sm:$0xff] %v4174_v37  ;;  %1826 = vperm.xlu0 %3016, %v1668_v50   ;;  %v1700_v37 = vld [vmem:[%s5334_s2 + $0x1b8] sm:$0xff]  ;;  %v1651_v50 = vld [vmem:[%s5334_s2 + $0x30] sm:$0xff] }
 0x22e   :  { %1891 = vperm.xlu1 %3011, %v1681_v36  }
 0x230   :  { %v4182_v43 = vpop.permute.xlu1 %1338  ;;  %v4184_v26 = vpop.permute.xlu0 %225 }
 0x231   :  { %5567 = vst [vmem:[#allocation197_spill] sm:$0xff] %v4182_v43  ;;  %5568 = vst [vmem:[#allocation198_spill] sm:$0xff] %v4184_v26  ;;  %1746 = vperm.xlu0 %3016, %v1652_v16   ;;  %v1684_v26 = vld [vmem:[%s5334_s2 + $0x138] sm:$0xff]  ;;  %v1699_v16 = vld [vmem:[%s5334_s2 + $0x1b0] sm:$0xff] }
 0x232   :  { %1821 = vperm.xlu1 %3011, %v1667_v30  }
 0x234   :  { %v4192_v36 = vpop.permute.xlu1 %1346  ;;  %v4194_v61 = vpop.permute.xlu0 %235 }
 0x235   :  { %5569 = vst [vmem:[#allocation199_spill] sm:$0xff] %v4192_v36  ;;  %5570 = vst [vmem:[#allocation200_spill] sm:$0xff] %v4194_v61  ;;  %1986 = vperm.xlu0 %3016, %v1700_v37   ;;  %v1670_v61 = vld [vmem:[%s5334_s2 + $0xc8] sm:$0xff]  ;;  %v1683_v37 = vld [vmem:[%s5334_s2 + $0x130] sm:$0xff] }
 0x236   :  { %1741 = vperm.xlu1 %3011, %v1651_v50  }
 0x238   :  { %v4202_v30 = vpop.permute.xlu1 %1354  ;;  %v4204_v24 = vpop.permute.xlu0 %245 }
 0x239   :  { %5571 = vst [vmem:[#allocation201_spill] sm:$0xff] %v4202_v30  ;;  %5572 = vst [vmem:[#allocation202_spill] sm:$0xff] %v4204_v24  ;;  %1906 = vperm.xlu0 %3016, %v1684_v26   ;;  %v1654_v24 = vld [vmem:[%s5334_s2 + $0x48] sm:$0xff]  ;;  %v1669_v26 = vld [vmem:[%s5334_s2 + $0xc0] sm:$0xff] }
 0x23a   :  { %1981 = vperm.xlu1 %3011, %v1699_v16  }
 0x23c   :  { %v4212_v50 = vpop.permute.xlu1 %1362  ;;  %v4214_v36 = vpop.permute.xlu0 %255 }
 0x23d   :  { %5573 = vst [vmem:[#allocation203_spill] sm:$0xff] %v4212_v50  ;;  %1836 = vperm.xlu0 %3016, %v1670_v61   ;;  %v1701_v50 = vld [vmem:[%s5334_s2 + $0x1c0] sm:$0xff] }
 0x23e   :  { %1901 = vperm.xlu1 %3011, %v1683_v37   ;;  %v1653_v61 = vld [vmem:[%s5334_s2 + $0x40] sm:$0xff] }
 0x240   :  { %v4222_v16 = vpop.permute.xlu1 %1370  ;;  %v4224_v30 = vpop.permute.xlu0 %265 }
 0x241   :  { %5574 = vst [vmem:[#allocation204_spill] sm:$0xff] %v4222_v16  ;;  %5575 = vst [vmem:[#allocation205_spill] sm:$0xff] %v4224_v30  ;;  %1756 = vperm.xlu0 %3016, %v1654_v24   ;;  %v1685_v16 = vld [vmem:[%s5334_s2 + $0x140] sm:$0xff] }
 0x242   :  { %1831 = vperm.xlu1 %3011, %v1669_v26  }
 0x244   :  { %v4232_v37 = vpop.permute.xlu1 %1378  ;;  %v4234_v11 = vpop.permute.xlu0 %275 }
 0x245   :  { %5576 = vst [vmem:[#allocation206_spill] sm:$0xff] %v4232_v37  ;;  %5577 = vst [vmem:[#allocation207_spill] sm:$0xff] %v4234_v11  ;;  %1991 = vperm.xlu0 %3016, %v1701_v50   ;;  %v3019_v50 = vld [vmem:[%s5333_s1 + $0x1d8] sm:$0xff] }
 0x246   :  { %1751 = vperm.xlu1 %3011, %v1653_v61  }
 0x248   :  { %v4239_v24 = vpop.permute.xlu1 %1386  ;;  %v4241_v26 = vpop.permute.xlu0 %285 }
 0x249   :  { %5578 = vst [vmem:[#allocation208_spill] sm:$0xff] %v4241_v26  ;;  %1911 = vperm.xlu0 %3016, %v1685_v16   ;;  %v1702_v16 = vld [vmem:[%s5334_s2 + $0x1c8] sm:$0xff]  ;;  %v1655_v26 = vld [vmem:[%s5334_s2 + $0x50] sm:$0xff] }
 0x24a   :  { %3012 = vset.pattern.permute.xlu1 %v5490_v1 }
 0x24b   :  { %1494 = vperm.xlu1 %3012, %v3019_v50   ;;  %v1704_v50 = vld [vmem:[%s5334_s2 + $0x1d8] sm:$0xff] }
 0x24c   :  { %v4250_v61 = vpop.permute.xlu1 %1394  ;;  %v4252_v37 = vpop.permute.xlu0 %295 }
 0x24d   :  { %5579 = vst [vmem:[#allocation209_spill] sm:$0xff] %v4250_v61  ;;  %5580 = vst [vmem:[#allocation210_spill] sm:$0xff] %v4252_v37  ;;  %1841 = vperm.xlu0 %3016, %v1671_v60   ;;  %v1686_v60 = vld [vmem:[%s5334_s2 + $0x148] sm:$0xff]  ;;  %v5593_v61 = vld [vmem:[#allocation8_spill] sm:$0xff] }
 0x24f   :  { %3013 = vset.pattern.permute.xlu1 %v5485_v17 }
 0x250   :  { %1996 = vperm.xlu1 %3013, %v1702_v16   ;;  %v4261_v11 = vpop.permute.xlu1 %1402  ;;  %v4263_v46 = vpop.permute.xlu0 %305  ;;  %v1672_v16 = vld [vmem:[%s5334_s2 + $0xd8] sm:$0xff] }
 0x251   :  { %5581 = vst [vmem:[#allocation211_spill] sm:$0xff] %v4261_v11  ;;  %5582 = vst [vmem:[#allocation212_spill] sm:$0xff] %v4263_v46  ;;  %1761 = vperm.xlu0 %3016, %v1655_v26   ;;  %v1673_v26 = vld [vmem:[%s5334_s2 + $0xe0] sm:$0xff] }
 0x254   :  { %1916 = vperm.xlu1 %3013, %v1686_v60   ;;  %v4271_v37 = vpop.permute.xlu1 %1410  ;;  %v4273_v19 = vpop.permute.xlu0 %315  ;;  %v1656_v60 = vld [vmem:[%s5334_s2 + $0x58] sm:$0xff] }
 0x255   :  { %5583 = vst [vmem:[#allocation213_spill] sm:$0xff] %v4271_v37  ;;  %5584 = vst [vmem:[#allocation214_spill] sm:$0xff] %v4273_v19  ;;  %2006 = vperm.xlu0 %3016, %v1704_v50   ;;  %v1657_v50 = vld [vmem:[%s5334_s2 + $0x60] sm:$0xff] }
 0x258   :  { %1846 = vperm.xlu1 %3013, %v1672_v16   ;;  %v4281_v46 = vpop.permute.xlu1 %1418  ;;  %v4283_v11 = vpop.permute.xlu0 %325  ;;  %v413_v16 = vlaneseq }
 0x259   :  { %5585 = vst [vmem:[#allocation215_spill] sm:$0xff] %v4281_v46  ;;  %5586 = vst [vmem:[#allocation216_spill] sm:$0xff] %v4283_v11  ;;  %1851 = vperm.xlu0 %3016, %v1673_v26   ;;  %v1706_v11 = vld [vmem:[%s5334_s2 + $0x1e8] sm:$0xff] }
 0x25c   :  { %1766 = vperm.xlu1 %3013, %v1656_v60   ;;  %v4291_v19 = vpop.permute.xlu1 %1426  ;;  %v4293_v37 = vpop.permute.xlu0 %335  ;;  %v3020_v60 = vld [vmem:[%s5333_s1 + $0x1e8] sm:$0xff] }
 0x25d   :  { %5587 = vst [vmem:[#allocation217_spill] sm:$0xff] %v4291_v19  ;;  %1771 = vperm.xlu0 %3016, %v1657_v50   ;;  %v4306_v19 = vshrl.u32 %v413_v16, 7  ;;  %v1675_v50 = vld [vmem:[%s5334_s2 + $0xf0] sm:$0xff] }
 0x25e   :  { %v1659_v16 = vld [vmem:[%s5334_s2 + $0x70] sm:$0xff] }
 0x25f   :  { %v1127_v25 = vsub.s32 2, %v4306_v19 }
 0x260   :  { %3014 = vset.pattern.permute.xlu1 %v5490_v1  ;;  %v4299_v26 = vpop.permute.xlu1 %1434  ;;  %v4301_v46 = vpop.permute.xlu0 %345 }
 0x261   :  { %5588 = vst [vmem:[#allocation218_spill] sm:$0xff] %v4299_v26  ;;  %5589 = vst [vmem:[#allocation219_spill] sm:$0xff] %v4301_v46  ;;  %1502 = vperm.xlu1 %3014, %v3020_v60   ;;  %2016 = vperm.xlu0 %3016, %v1706_v11   ;;  %v739_v26 = vsub.s32 1, %v4306_v19  ;;  %v415_v11 = vsub.s32 0, %v4306_v19  ;;  %v4327_v60 = vld [vmem:[%s5332_s0] sm:$0xf] }
 0x262   :  { %v5609_v46 = vld [vmem:[#allocation28_spill] sm:$0xff]  ;;  %s3050_s0 = smov [#allocation3]  }
 0x263   :  { %s2767_s11 = sshll.u32 %s3050_s0, 4  ;;  %s2768_s11 = int_to_ptr.vmem [resolvable:$true] %s2767_s11 }
 0x264   :  { %v4315_v54 = vpop.permute.xlu1 %1442  ;;  %v4317_v43 = vpop.permute.xlu0 %355  ;;  %s3022_s12 = scalar_lea.vmem %s2768_s11, 16  ;;  %s3026_s13 = scalar_lea.vmem %s2768_s11, 32 }
 0x265   :  { %5590 = vst [vmem:[#allocation220_spill] sm:$0xff] %v4315_v54  ;;  %5591 = vst [vmem:[#allocation221_spill] sm:$0xff] %v4317_v43  ;;  %3015 = vset.pattern.permute.xlu1 %v5485_v17  ;;  %1861 = vperm.xlu0 %3016, %v1675_v50   ;;  %v1687_v54 = vld [vmem:[%s5334_s2 + $0x150] sm:$0xff]  ;;  %v4333_v43 = vrot.slane %v4327_v60, %v739_v26  ;;  %v1688_v26 = vld [vmem:[%s5334_s2 + $0x158] sm:$0xff]  ;;  %p3023_p0 = scmp.ne.s32.totalorder %s2768_s11, %s3022_s12  ;;  %p3027_p1 = scmp.lt.s32.totalorder %s2768_s11, %s2768_s11 }
 0x266   :  { %2001 = vperm.xlu1 %3015, %v1703_v41   ;;  %v4340_v41 = vrot.slane %v4327_v60, %v415_v11  ;;  %p3028_p2 = scmp.lt.s32.totalorder %s3026_s13, %s3022_s12 }
 0x267   :  { %v748_v30 = vmul.f32 %v4333_v43, %v5600_v13  ;;  %v1691_v13 = vld [vmem:[%s5334_s2 + $0x170] sm:$0xff] }
 0x268   :  { %v4335_v50 = vpop.permute.xlu1 %1450  ;;  %v4337_v48 = vpop.permute.xlu0 %365  ;;  %v420_v56 = vmul.f32 %v4340_v41, %v5593_v61  ;;  %v424_v23 = vmul.f32 %v4340_v41, %v5599_v62  ;;  %v5601_v61 = vld [vmem:[#allocation14_spill] sm:$0xff]  ;;  %v5606_v62 = vld [vmem:[#allocation25_spill] sm:$0xff]  ;;  %p3029_p3 = por %p3028_p2, %p3027_p1 }
 0x269   :  { %5592 = vst [vmem:[#allocation222_spill] sm:$0xff] %v4337_v48  ;;  %1781 = vperm.xlu0 %3016, %v1659_v16   ;;  %v744_v16 = vmul.f32 %v4333_v43, %v5594_v34  ;;  %v5595_v48 = vld [vmem:[#allocation10_spill] sm:$0xff]  ;;  %v426_v57 = vmul.f32 %v4340_v41, %v5601_v61  ;;  %v5602_v34 = vld [vmem:[#allocation15_spill] sm:$0xff]  ;;  %v760_v8 = vmul.f32 %v4333_v43, %v5606_v62 }
 0x26a   :  { %1921 = vperm.xlu1 %3015, %v1687_v54   ;;  %v422_v11 = vmul.f32 %v4340_v41, %v5595_v48  ;;  %v5596_v54 = vld [vmem:[#allocation11_spill] sm:$0xff]  ;;  %v750_v18 = vmul.f32 %v4333_v43, %v5602_v34  ;;  %v5603_v48 = vld [vmem:[#allocation22_spill] sm:$0xff]  ;;  %v4408_v7 = vadd.f32 %v748_v30, %v424_v23  ;;  %v1515_v30 = vsub.s32 3, %v4306_v19  ;;  %v5630_v19 = vld [vmem:[#allocation44_spill] sm:$0xff]  ;;  %p3030_p4 = pnand %p3029_p3, %p3023_p0 }
 0x26b   :  { %v746_v15 = vmul.f32 %v4333_v43, %v5596_v54  ;;  %v434_v54 = vmul.f32 %v4340_v41, %v5603_v48  ;;  %v5607_v61 = vld [vmem:[#allocation26_spill] sm:$0xff]  ;;  %v5608_v34 = vld [vmem:[#allocation27_spill] sm:$0xff]  ;;  %v4401_v28 = vadd.f32 %v744_v16, %v420_v56 }
 0x26c   :  { %v4357_v52 = vpop.permute.xlu1 %1458  ;;  %v4359_v0 = vpop.permute.xlu0 %375  ;;  %v762_v48 = vmul.f32 %v4333_v43, %v5608_v34  ;;  %v5611_v62 = vld [vmem:[#allocation6_spill] sm:$0xff]  ;;  %v741_v34 = vmul.f32 %v4333_v43, %v5614_v45  ;;  %5616 = vst [vmem:[#allocation13_spill] sm:$0xff] %v4408_v7  ;;  %v4410_v33 = vadd.f32 %v750_v18, %v426_v57  ;;  %v5635_v7 = vld [vmem:[#allocation61_spill] sm:$0xff] }
 0x26d   :  { %5597 = vst [vmem:[#allocation8_spill] sm:$0xff] %v4357_v52  ;;  %5598 = vst [vmem:[#allocation9_spill] sm:$0xff] %v4359_v0  ;;  %2021 = vperm.xlu0 %3016, %v1707_v29   ;;  %v758_v52 = vmul.f32 %v4333_v43, %v5604_v21  ;;  %v5605_v0 = vld [vmem:[#allocation24_spill] sm:$0xff]  ;;  %v438_v29 = vmul.f32 %v4340_v41, %v5607_v61  ;;  %v440_v21 = vmul.f32 %v4340_v41, %v5609_v46  ;;  %v2221_v45 = vld [vmem:[%s5336_s4] sm:$0xff] }
 0x26e   :  { %v436_v55 = vmul.f32 %v4340_v41, %v5605_v0  ;;  %1926 = vperm.xlu1 %3015, %v1688_v26   ;;  %v764_v0 = vmul.f32 %v4333_v43, %v5610_v10  ;;  %v1674_v26 = vld [vmem:[%s5334_s2 + $0xe8] sm:$0xff]  ;;  %v4393_v32 = vmul.f32 %v4340_v41, %v5611_v62  ;;  %v4403_v46 = vadd.f32 %v746_v15, %v422_v11 }
 0x26f   :  { %v4406_v10 = vrot.slane %v4327_v60, %v1127_v25  ;;  %5617 = vst [vmem:[#allocation14_spill] sm:$0xff] %v4410_v33  ;;  %v822_v62 = vadd.f32 %v758_v52, %v434_v54  ;;  %v4417_v56 = vadd.f32 %v762_v48, %v438_v29  ;;  %v5620_v16 = vld [vmem:[#allocation30_spill] sm:$0xff]  ;;  %v5621_v11 = vld [vmem:[#allocation31_spill] sm:$0xff]  ;;  %v433_v54 = vmul.f32 %v4340_v41, %v4134_v53  ;;  %v5626_v48 = vld [vmem:[#allocation40_spill] sm:$0xff] }
 0x270   :  { %v4395_v49 = vpop.permute.xlu1 %1466  ;;  %v4397_v61 = vpop.permute.xlu0 %385  ;;  %5615 = vst [vmem:[#allocation12_spill] sm:$0xff] %v4403_v46  ;;  %v4412_v40 = vadd.f32 %v760_v8, %v436_v55  ;;  %v4419_v15 = vadd.f32 %v764_v0, %v440_v21  ;;  %v442_v25 = vmul.f32 %v4340_v41, %v5620_v16  ;;  %v766_v23 = vmul.f32 %v4333_v43, %v5621_v11  ;;  %v1658_v55 = vld [vmem:[%s5334_s2 + $0x68] sm:$0xff]  ;;  %v5627_v0 = vld [vmem:[#allocation41_spill] sm:$0xff] }
 0x271   :  { %5612 = vst [vmem:[#allocation10_spill] sm:$0xff] %v4395_v49  ;;  %5613 = vst [vmem:[#allocation11_spill] sm:$0xff] %v4397_v61  ;;  %1941 = vperm.xlu0 %3016, %v1691_v13   ;;  %v5622_v8 = vld [vmem:[#allocation38_spill] sm:$0xff]  ;;  %v5623_v52 = vld [vmem:[#allocation39_spill] sm:$0xff]  ;;  %v452_v21 = vmul.f32 %v4340_v41, %v5626_v48  ;;  %v456_v53 = vmul.f32 %v4340_v41, %v5630_v19  ;;  %v757_v48 = vmul.f32 %v4333_v43, %v3721_v4 }
 0x272   :  { %1856 = vperm.xlu1 %3015, %v1674_v26   ;;  %5618 = vst [vmem:[#allocation15_spill] sm:$0xff] %v4417_v56  ;;  %5619 = vst [vmem:[#allocation22_spill] sm:$0xff] %v4419_v15  ;;  %v450_v57 = vmul.f32 %v4340_v41, %v5622_v8  ;;  %v774_v18 = vmul.f32 %v4333_v43, %v5623_v52  ;;  %v776_v26 = vmul.f32 %v4333_v43, %v5627_v0  ;;  %v5628_v16 = vld [vmem:[#allocation42_spill] sm:$0xff]  ;;  %v5629_v8 = vld [vmem:[#allocation43_spill] sm:$0xff] }
 0x273   :  { %v454_v11 = vmul.f32 %v4340_v41, %v5628_v16  ;;  %v778_v52 = vmul.f32 %v4333_v43, %v5629_v8  ;;  %v5631_v61 = vld [vmem:[#allocation45_spill] sm:$0xff]  ;;  %v2223_v0 = vld [vmem:[%s5336_s4 + $0x10] sm:$0xff]  ;;  %v5633_v16 = vld [vmem:[#allocation58_spill] sm:$0xff]  ;;  %v4467_v15 = vrot.slane %v4327_v60, %v1515_v30  ;;  %v1146_v4 = vmul.f32 %v4406_v10, %v3921_v39 }
 0x274   :  { %v4435_v13 = vpop.permute.xlu1 %1474  ;;  %v4437_v29 = vpop.permute.xlu0 %395  ;;  %v780_v33 = vmul.f32 %v4333_v43, %v5631_v61  ;;  %v5634_v8 = vld [vmem:[#allocation60_spill] sm:$0xff]  ;;  %v792_v61 = vmul.f32 %v4333_v43, %v5635_v7  ;;  %v821_v49 = vadd.f32 %v757_v48, %v433_v54  ;;  %v4479_v7 = vadd.f32 %v774_v18, %v450_v57  ;;  %v5636_v57 = vld [vmem:[#allocation63_spill] sm:$0xff]  ;;  %v5639_v48 = vld [vmem:[#allocation78_spill] sm:$0xff] }
 0x275   :  { %5624 = vst [vmem:[#allocation23_spill] sm:$0xff] %v4435_v13  ;;  %5625 = vst [vmem:[#allocation24_spill] sm:$0xff] %v4437_v29  ;;  %2239 = vperm.xlu0 %3016, %v2221_v45   ;;  %v5632_v29 = vld [vmem:[#allocation57_spill] sm:$0xff]  ;;  %v790_v45 = vmul.f32 %v4333_v43, %v5633_v16  ;;  %v468_v19 = vmul.f32 %v4340_v41, %v5634_v8  ;;  %v4477_v8 = vadd.f32 %v766_v23, %v442_v25  ;;  %v5637_v18 = vld [vmem:[#allocation64_spill] sm:$0xff] }
 0x276   :  { %v466_v13 = vmul.f32 %v4340_v41, %v5632_v29  ;;  %1776 = vperm.xlu1 %3015, %v1658_v55   ;;  %v417_v29 = vmul.f32 %v4340_v41, %v4052_v51  ;;  %v418_v55 = vmul.f32 %v4340_v41, %v4063_v59  ;;  %v4481_v56 = vadd.f32 %v776_v26, %v452_v21  ;;  %v2225_v25 = vld [vmem:[%s5336_s4 + $0x20] sm:$0xff] }
 0x277   :  { %v4483_v51 = vadd.f32 %v778_v52, %v454_v11  ;;  %v4485_v60 = vadd.f32 %v780_v33, %v456_v53  ;;  %v742_v39 = vmul.f32 %v4333_v43, %v3672_v47  ;;  %v1145_v59 = vmul.f32 %v4406_v10, %v3717_v6  ;;  %v3021_v6 = vld [vmem:[%s5333_s1 + $0x1f8] sm:$0xff] }
 0x278   :  { %v4473_v16 = vpop.permute.xlu1 %1482  ;;  %v4475_v46 = vpop.permute.xlu0 %405  ;;  %v1533_v30 = vmul.f32 %v4467_v15, %v4162_v9  ;;  %v854_v23 = vadd.f32 %v790_v45, %v466_v13  ;;  %v470_v33 = vmul.f32 %v4340_v41, %v5636_v57  ;;  %v794_v54 = vmul.f32 %v4333_v43, %v5637_v18  ;;  %v5638_v52 = vld [vmem:[#allocation77_spill] sm:$0xff] }
 0x279   :  { %2249 = vperm.xlu0 %3016, %v2223_v0   ;;  %v805_v47 = vadd.f32 %v741_v34, %v417_v29  ;;  %v4504_v9 = vadd.f32 %v792_v61, %v468_v19  ;;  %v806_v21 = vadd.f32 %v742_v39, %v418_v55  ;;  %v1209_v13 = vadd.f32 %v1145_v59, %v821_v49  ;;  %v5641_v39 = vld [vmem:[#allocation67_spill] sm:$0xff] }
 0x27a   :  { %3017 = vset.pattern.permute.xlu1 %v5490_v1  ;;  %v1210_v1 = vadd.f32 %v1146_v4, %v822_v62  ;;  %v1130_v53 = vmul.f32 %v4406_v10, %v5638_v52  ;;  %v743_v0 = vmul.f32 %v4333_v43, %v5639_v48  ;;  %v1129_v34 = vmul.f32 %v4406_v10, %v3866_v31  ;;  %v1705_v62 = vld [vmem:[%s5334_s2 + $0x1e0] sm:$0xff]  ;;  %v2624_v31 = vld [vmem:[%s5337_s5 + $0x8] sm:$0xff] }
 0x27b   :  { %1510 = vperm.xlu1 %3017, %v3021_v6   ;;  %v1178_v45 = vmul.f32 %v4406_v10, %v4017_v3  ;;  %v1534_v49 = vmul.f32 %v4467_v15, %v3911_v42  ;;  %v1518_v19 = vmul.f32 %v4467_v15, %v4082_v44  ;;  %v465_v61 = vmul.f32 %v4340_v41, %v4293_v37  ;;  %v5640_v4 = vld [vmem:[#allocation66_spill] sm:$0xff] }
 0x27c   :  { %v4506_v26 = vpop.permute.xlu1 %1490  ;;  %v1792_v11 = vpop.permute.xlu0 %1791  ;;  %v1597_v29 = vadd.f32 %v1533_v30, %v1209_v13  ;;  %v4528_v3 = vadd.f32 %v794_v54, %v470_v33  ;;  %v4532_v55 = vmul.f32 %v4340_v41, %v5640_v4  ;;  %v4536_v42 = vmul.f32 %v4333_v43, %v5641_v39 }
 0x27d   :  { %2259 = vperm.xlu0 %3016, %v2225_v25   ;;  %v1193_v44 = vadd.f32 %v1129_v34, %v805_v47  ;;  %v789_v37 = vmul.f32 %v4333_v43, %v3817_v20  ;;  %v1194_v25 = vadd.f32 %v1130_v53, %v806_v21  ;;  %v1598_v57 = vadd.f32 %v1534_v49, %v1210_v1  ;;  %v1689_v20 = vld [vmem:[%s5334_s2 + $0x160] sm:$0xff] }
 0x27e   :  { %v2045_v59 = vadd.f32 %v1792_v11, %v1597_v29  ;;  %v4542_v33 = vadd.f32 %v743_v0, %v4393_v32  ;;  %v1517_v18 = vmul.f32 %v4467_v15, %v3862_v27  ;;  %v1162_v54 = vmul.f32 %v4406_v10, %v3969_v63  ;;  %v2625_v27 = vld [vmem:[%s5337_s5 + $0x10] sm:$0xff] }
 0x27f   :  { %3018 = vset.pattern.permute.xlu1 %v5485_v17  ;;  %v1242_v6 = vadd.f32 %v1178_v45, %v854_v23  ;;  %v449_v47 = vmul.f32 %v4340_v41, %v4214_v36  ;;  %v853_v1 = vadd.f32 %v789_v37, %v465_v61  ;;  %v1582_v21 = vadd.f32 %v1518_v19, %v1194_v25 }
 0x280   :  { %2011 = vperm.xlu1 %3018, %v1705_v62   ;;  %v1717_v30 = vpop.permute.xlu0 %1716  ;;  %v773_v63 = vmul.f32 %v4333_v43, %v3769_v12  ;;  %v1177_v23 = vmul.f32 %v4406_v10, %v3813_v22  ;;  %v1566_v11 = vmul.f32 %v4467_v15, %v4007_v2  ;;  %v1581_v13 = vadd.f32 %v1517_v18, %v1193_v44  ;;  %v1690_v2 = vld [vmem:[%s5334_s2 + $0x168] sm:$0xff] }
 0x281   :  { %v1797_v17 = vpop.permute.xlu1 %1796  ;;  %2646 = vperm.xlu0 %3016, %v2624_v31   ;;  %v1565_v36 = vmul.f32 %v4467_v15, %v4335_v50  ;;  %v2109_v52 = vmax.f32 %v2045_v59, 0.0  ;;  %v2030_v53 = vadd.f32 %v1717_v30, %v1582_v21  ;;  %v1148_v34 = vmul.f32 %v4406_v10, %v3927_v35  ;;  %v2626_v35 = vld [vmem:[%s5337_s5 + $0x18] sm:$0xff] }
 0x282   :  { %v2046_v32 = vadd.f32 %v1797_v17, %v1598_v57  ;;  %v1226_v12 = vadd.f32 %v1162_v54, %v4479_v7  ;;  %v435_v22 = vmul.f32 %v4340_v41, %v4144_v58  ;;  %v1630_v45 = vadd.f32 %v1566_v11, %v1242_v6  ;;  %v5642_v30 = vld [vmem:[#allocation80_spill] sm:$0xff] }
 0x283   :  { %v837_v50 = vadd.f32 %v773_v63, %v449_v47  ;;  %v1241_v61 = vadd.f32 %v1177_v23, %v853_v1  ;;  %v759_v7 = vmul.f32 %v4333_v43, %v3727_v5  ;;  %v1161_v58 = vmul.f32 %v4406_v10, %v3765_v14  ;;  %v5643_v5 = vld [vmem:[#allocation135_spill] sm:$0xff]  ;;  %v2627_v47 = vld [vmem:[%s5337_s5 + $0x20] sm:$0xff] }
 0x284   :  { %1931 = vperm.xlu1 %3018, %v1689_v20   ;;  %v1957_v48 = vpop.permute.xlu0 %1956  ;;  %v2110_v0 = vmax.f32 %v2046_v32, 0.0  ;;  %v1550_v29 = vmul.f32 %v4467_v15, %v3959_v38  ;;  %v1549_v31 = vmul.f32 %v4467_v15, %v4239_v24  ;;  %v2094_v4 = vmax.f32 %v2030_v53, 0.0  ;;  %v1676_v24 = vld [vmem:[%s5334_s2 + $0xf8] sm:$0xff]  ;;  %v5644_v1 = vld [vmem:[#allocation91_spill] sm:$0xff] }
 0x285   :  { %v1712_v62 = vpop.permute.xlu1 %1711  ;;  %2651 = vperm.xlu0 %3016, %v2625_v27   ;;  %v2078_v39 = vadd.f32 %v1957_v48, %v1630_v45  ;;  %v1629_v59 = vadd.f32 %v1565_v36, %v1241_v61  ;;  %v4585_v25 = vmul.f32 %v4333_v43, %v5642_v30  ;;  %v1132_v14 = vmul.f32 %v4406_v10, %v5643_v5  ;;  %v5645_v32 = vld [vmem:[#allocation132_spill] sm:$0xff]  ;;  %v5646_v27 = vld [vmem:[#allocation147_spill] sm:$0xff] }
 0x286   :  { %v2029_v49 = vadd.f32 %v1712_v62, %v1581_v13  ;;  %v2935_v19 = vpack.c.bf16 %v2110_v0, %v2109_v52  ;;  %v1212_v57 = vadd.f32 %v1148_v34, %v4412_v40  ;;  %v1614_v38 = vadd.f32 %v1550_v29, %v1226_v12  ;;  %v5647_v23 = vld [vmem:[#allocation195_spill] sm:$0xff]  ;;  %v5648_v0 = vld [vmem:[#allocation133_spill] sm:$0xff] }
 0x287   :  { %v823_v54 = vadd.f32 %v759_v7, %v435_v22  ;;  %v1225_v20 = vadd.f32 %v1161_v58, %v837_v50  ;;  %v1147_v21 = vmul.f32 %v4406_v10, %v5644_v1  ;;  %v1520_v40 = vmul.f32 %v4467_v15, %v5645_v32  ;;  %v5649_v22 = vld [vmem:[#allocation62_spill] sm:$0xff]  ;;  %v1660_v50 = vld [vmem:[%s5334_s2 + $0x78] sm:$0xff] }
 0x288   :  { %v2093_v44 = vmax.f32 %v2029_v49, 0.0  ;;  %1936 = vperm.xlu1 %3018, %v1690_v2   ;;  %v1877_v37 = vpop.permute.xlu0 %1876  ;;  %2936 = vmatprep.subr.bf16.mxu0 %v2935_v19  ;;  %v1536_v63 = vmul.f32 %v4467_v15, %v5646_v27  ;;  %v1535_v11 = vmul.f32 %v4467_v15, %v5647_v23  ;;  %v2142_v13 = vmax.f32 %v2078_v39, 0.0  ;;  %v5650_v49 = vld [vmem:[#allocation219_spill] sm:$0xff]  ;;  %v5651_v58 = vld [vmem:[#allocation92_spill] sm:$0xff]  ;;  %v5656_v1 = vld [vmem:[#allocation205_spill] sm:$0xff] }
 0x289   :  { %v1952_v18 = vpop.permute.xlu1 %1951  ;;  %2656 = vperm.xlu0 %3016, %v2626_v35   ;;  %v2062_v36 = vadd.f32 %v1877_v37, %v1614_v38  ;;  %v1613_v53 = vadd.f32 %v1549_v31, %v1225_v20  ;;  %v1131_v34 = vmul.f32 %v4406_v10, %v5648_v0  ;;  %v1196_v12 = vadd.f32 %v1132_v14, %v4401_v28  ;;  %v2628_v28 = vld [vmem:[%s5337_s5 + $0x28] sm:$0xff]  ;;  %v5652_v31 = vld [vmem:[#allocation93_spill] sm:$0xff] }
 0x28a   :  { %v2077_v6 = vadd.f32 %v1952_v18, %v1629_v59  ;;  %v2937_v17 = vpack.c.bf16 %v2094_v4, %v2093_v44  ;;  %v1180_v45 = vmul.f32 %v4406_v10, %v5649_v22  ;;  %v1600_v62 = vadd.f32 %v1536_v63, %v1212_v57  ;;  %v5653_v39 = vld [vmem:[#allocation119_spill] sm:$0xff]  ;;  %v5654_v37 = vld [vmem:[#allocation182_spill] sm:$0xff]  ;;  %v5657_v23 = vld [vmem:[#allocation105_spill] sm:$0xff] }
 0x28b   :  { %v467_v19 = vmul.f32 %v4340_v41, %v5650_v49  ;;  %v1211_v7 = vadd.f32 %v1147_v21, %v823_v54  ;;  %v4619_v29 = vmul.f32 %v4406_v10, %v5651_v58  ;;  %v4623_v4 = vmul.f32 %v4333_v43, %v5652_v31 }
 0x28c   :  { %1866 = vperm.xlu1 %3018, %v1676_v24   ;;  %v1807_v52 = vpop.permute.xlu0 %1806  ;;  %2938 = vmatpush3.bf16.msra.mxu0 %v2937_v17  ;;  %v2141_v48 = vmax.f32 %v2077_v6, 0.0  ;;  %v791_v44 = vmul.f32 %v4333_v43, %v5653_v39  ;;  %v1519_v59 = vmul.f32 %v4467_v15, %v5654_v37  ;;  %v2126_v30 = vmax.f32 %v2062_v36, 0.0  ;;  %v5655_v24 = vld [vmem:[#allocation162_spill] sm:$0xff]  ;;  %v2630_v39 = vld [vmem:[%s5337_s5 + $0x38] sm:$0xff] }
 0x28d   :  { %v1872_v2 = vpop.permute.xlu1 %1871  ;;  %2661 = vperm.xlu0 %3016, %v2627_v47   ;;  %v2048_v5 = vadd.f32 %v1807_v52, %v1600_v62  ;;  %v1599_v38 = vadd.f32 %v1535_v11, %v1211_v7  ;;  %v1195_v18 = vadd.f32 %v1131_v34, %v4542_v33  ;;  %v1164_v54 = vmul.f32 %v4406_v10, %v5655_v24  ;;  %v1708_v47 = vld [vmem:[%s5334_s2 + $0x1f8] sm:$0xff]  ;;  %v2629_v33 = vld [vmem:[%s5337_s5 + $0x30] sm:$0xff] }
 0x28e   :  { %v2061_v61 = vadd.f32 %v1872_v2, %v1613_v53  ;;  %v2967_v35 = vpack.c.bf16 %v2142_v13, %v2141_v48  ;;  %v1244_v6 = vadd.f32 %v1180_v45, %v4504_v9  ;;  %v1584_v17 = vadd.f32 %v1520_v40, %v1196_v12  ;;  %v5658_v40 = vld [vmem:[#allocation118_spill] sm:$0xff]  ;;  %v5659_v13 = vld [vmem:[#allocation171_spill] sm:$0xff]  ;;  %v5660_v53 = vld [vmem:[#allocation8_spill] sm:$0xff] }
 0x28f   :  { %v451_v21 = vmul.f32 %v4340_v41, %v5656_v1  ;;  %v855_v32 = vadd.f32 %v791_v44, %v467_v19  ;;  %v775_v9 = vmul.f32 %v4333_v43, %v5657_v23  ;;  %v1179_v11 = vmul.f32 %v4406_v10, %v5658_v40  ;;  %v5661_v45 = vld [vmem:[#allocation150_spill] sm:$0xff]  ;;  %v5663_v44 = vld [vmem:[#allocation104_spill] sm:$0xff]  ;;  %v5664_v37 = vld [vmem:[#allocation137_spill] sm:$0xff] }
 0x290   :  { %v2125_v14 = vmax.f32 %v2061_v61, 0.0  ;;  %1786 = vperm.xlu1 %3018, %v1660_v50   ;;  %v1727_v57 = vpop.permute.xlu0 %1726  ;;  %2968 = vmatprep.subr.bf16.mxu1 %v2967_v35  ;;  %v1568_v36 = vmul.f32 %v4467_v15, %v5659_v13  ;;  %v1583_v52 = vadd.f32 %v1519_v59, %v1195_v18  ;;  %v1567_v48 = vmul.f32 %v4467_v15, %v5660_v53  ;;  %v5662_v50 = vld [vmem:[#allocation193_spill] sm:$0xff]  ;;  %v5668_v1 = vld [vmem:[#allocation180_spill] sm:$0xff]  ;;  %v5669_v13 = vld [vmem:[#allocation134_spill] sm:$0xff] }
 0x291   :  { %v1802_v20 = vpop.permute.xlu1 %1801  ;;  %2666 = vperm.xlu0 %3016, %v2628_v28   ;;  %v2112_v0 = vmax.f32 %v2048_v5, 0.0  ;;  %v2032_v34 = vadd.f32 %v1727_v57, %v1584_v17  ;;  %v1150_v62 = vmul.f32 %v4406_v10, %v5661_v45  ;;  %v1228_v2 = vadd.f32 %v1164_v54, %v4481_v56  ;;  %v1692_v35 = vld [vmem:[%s5334_s2 + $0x178] sm:$0xff] }
 0x292   :  { %v2047_v27 = vadd.f32 %v1802_v20, %v1599_v38  ;;  %v2969_v63 = vpack.c.bf16 %v2126_v30, %v2125_v14  ;;  %v437_v49 = vmul.f32 %v4340_v41, %v5662_v50  ;;  %v1632_v19 = vadd.f32 %v1568_v36, %v1244_v6  ;;  %v5665_v30 = vld [vmem:[#allocation160_spill] sm:$0xff]  ;;  %v5666_v14 = vld [vmem:[#allocation209_spill] sm:$0xff]  ;;  %v2158_v38 = vld [vmem:[%s5335_s3 + $0x8] sm:$0xff] }
 0x293   :  { %v839_v7 = vadd.f32 %v775_v9, %v451_v21  ;;  %v1243_v31 = vadd.f32 %v1179_v11, %v855_v32  ;;  %v1163_v56 = vmul.f32 %v4406_v10, %v5663_v44  ;;  %v1134_v59 = vmul.f32 %v4406_v10, %v5664_v37  ;;  %v5667_v20 = vld [vmem:[#allocation15_spill] sm:$0xff]  ;;  %2381 = vmatprep.mubr.f32.mxu0 %v2158_v38  ;;  %v2631_v11 = vld [vmem:[%s5337_s5 + $0x40] sm:$0xff] }
 0x294   :  { %v2111_v12 = vmax.f32 %v2047_v27, 0.0  ;;  %2026 = vperm.xlu1 %3018, %v1708_v47   ;;  %v1967_v22 = vpop.permute.xlu0 %1966  ;;  %2970 = vmatpush3.bf16.msra.mxu1 %v2969_v63  ;;  %v1552_v5 = vmul.f32 %v4467_v15, %v5665_v30  ;;  %v1551_v57 = vmul.f32 %v4467_v15, %v5666_v14  ;;  %v2096_v18 = vmax.f32 %v2032_v34, 0.0  ;;  %v2222_v63 = vld [vmem:[%s5336_s4 + $0x8] sm:$0xff]  ;;  %v5672_v34 = vld [vmem:[#allocation197_spill] sm:$0xff] }
 0x295   :  { %v1722_v61 = vpop.permute.xlu1 %1721  ;;  %2671 = vperm.xlu0 %3016, %v2629_v33   ;;  %v2080_v24 = vadd.f32 %v1967_v22, %v1632_v19  ;;  %v1631_v17 = vadd.f32 %v1567_v48, %v1243_v31  ;;  %v1214_v47 = vadd.f32 %v1150_v62, %v5667_v20  ;;  %v421_v21 = vmul.f32 %v4340_v41, %v5668_v1  ;;  %v5671_v48 = vld [vmem:[#allocation148_spill] sm:$0xff]  ;;  %v5673_v50 = vld [vmem:[#allocation79_spill] sm:$0xff]  ;;  %v5674_v19 = vld [vmem:[#allocation65_spill] sm:$0xff] }
 0x296   :  { %v2939_v28 = vpack.c.bf16 %v2112_v0, %v2111_v12  ;;  %v2031_v58 = vadd.f32 %v1722_v61, %v1583_v52  ;;  %v1616_v32 = vadd.f32 %v1552_v5, %v1228_v2  ;;  %v825_v33 = vadd.f32 %v4623_v4, %v437_v49  ;;  %v5670_v52 = vld [vmem:[#allocation12_spill] sm:$0xff]  ;;  %v5675_v31 = vld [vmem:[#allocation221_spill] sm:$0xff]  ;;  %v5676_v30 = vld [vmem:[#allocation82_spill] sm:$0xff] }
 0x297   :  { %v1227_v40 = vadd.f32 %v1163_v56, %v839_v7  ;;  %v1522_v36 = vmul.f32 %v4467_v15, %v5669_v13  ;;  %v1198_v53 = vadd.f32 %v1134_v59, %v5670_v52  ;;  %v1538_v0 = vmul.f32 %v4467_v15, %v5671_v48  ;;  %v2632_v59 = vld [vmem:[%s5337_s5 + $0x48] sm:$0xff]  ;;  %v5677_v5 = vld [vmem:[#allocation121_spill] sm:$0xff]  ;;  %v2633_v13 = vld [vmem:[%s5337_s5 + $0x50] sm:$0xff] }
 0x298   :  { %v2095_v54 = vmax.f32 %v2031_v58, 0.0  ;;  %1946 = vperm.xlu1 %3018, %v1692_v35   ;;  %v1887_v6 = vpop.permute.xlu0 %1886  ;;  %2940 = vmatprep.subr.bf16.mxu0 %v2939_v28  ;;  %v1537_v12 = vmul.f32 %v4467_v15, %v5672_v34  ;;  %v2144_v22 = vmax.f32 %v2080_v24, 0.0  ;;  %v1133_v49 = vmul.f32 %v4406_v10, %v5673_v50  ;;  %v2224_v58 = vld [vmem:[%s5336_s4 + $0x18] sm:$0xff]  ;;  %v5683_v48 = vld [vmem:[#allocation59_spill] sm:$0xff] }
 0x299   :  { %v1962_v27 = vpop.permute.xlu1 %1961  ;;  %2676 = vperm.xlu0 %3016, %v2630_v39   ;;  %v2064_v4 = vadd.f32 %v1887_v6, %v1616_v32  ;;  %v1615_v2 = vadd.f32 %v1551_v57, %v1227_v40  ;;  %v1182_v61 = vmul.f32 %v4406_v10, %v5674_v19  ;;  %v809_v35 = vadd.f32 %v4585_v25, %v421_v21  ;;  %v5678_v57 = vld [vmem:[#allocation184_spill] sm:$0xff] }
 0x29a   :  { %v2941_v23 = vpack.c.bf16 %v2096_v18, %v2095_v54  ;;  %v2079_v9 = vadd.f32 %v1962_v27, %v1631_v17  ;;  %v1602_v7 = vadd.f32 %v1538_v0, %v1214_v47  ;;  %v469_v39 = vmul.f32 %v4340_v41, %v5675_v31  ;;  %v2160_v24 = vld [vmem:[%s5335_s3 + $0x18] sm:$0xff]  ;;  %v2623_v27 = vld [vmem:[%s5337_s5] sm:$0xff] }
 0x29b   :  { %v1213_v37 = vadd.f32 %v4619_v29, %v825_v33  ;;  %v4704_v25 = vmul.f32 %v4333_v43, %v5676_v30  ;;  %v793_v14 = vmul.f32 %v4333_v43, %v5677_v5  ;;  %v1521_v38 = vmul.f32 %v4467_v15, %v5678_v57  ;;  %v5679_v47 = vld [vmem:[#allocation164_spill] sm:$0xff]  ;;  %2526 = vmatprep.mubr.f32.mxu1 %v2160_v24  ;;  %v5680_v33 = vld [vmem:[#allocation207_spill] sm:$0xff]  ;;  %v5688_v30 = vld [vmem:[#allocation106_spill] sm:$0xff] }
 0x29c   :  { %v2143_v45 = vmax.f32 %v2079_v9, 0.0  ;;  %2244 = vperm.xlu1 %3018, %v2222_v63   ;;  %v1817_v62 = vpop.permute.xlu0 %1816  ;;  %2942 = vmatpush3.bf16.msra.mxu0 %v2941_v23  ;;  %v1586_v18 = vadd.f32 %v1522_v36, %v1198_v53  ;;  %v2128_v29 = vmax.f32 %v2064_v4, 0.0  ;;  %v1166_v1 = vmul.f32 %v4406_v10, %v5679_v47  ;;  %v5681_v36 = vld [vmem:[#allocation107_spill] sm:$0xff]  ;;  %v5682_v52 = vld [vmem:[#allocation120_spill] sm:$0xff] }
 0x29d   :  { %v1882_v28 = vpop.permute.xlu1 %1881  ;;  %2681 = vperm.xlu0 %3016, %v2631_v11   ;;  %v2050_v54 = vadd.f32 %v1817_v62, %v1602_v7  ;;  %v1601_v20 = vadd.f32 %v1537_v12, %v1213_v37  ;;  %v1246_v21 = vadd.f32 %v1182_v61, %v4528_v3  ;;  %v1197_v63 = vadd.f32 %v1133_v49, %v809_v35  ;;  %v5684_v12 = vld [vmem:[#allocation10_spill] sm:$0xff]  ;;  %v5685_v50 = vld [vmem:[#allocation152_spill] sm:$0xff] }
 0x29e   :  { %v2971_v44 = vpack.c.bf16 %v2144_v22, %v2143_v45  ;;  %v2063_v56 = vadd.f32 %v1882_v28, %v1615_v2  ;;  %v453_v23 = vmul.f32 %v4340_v41, %v5680_v33  ;;  %v857_v9 = vadd.f32 %v793_v14, %v469_v39  ;;  %v5686_v61 = vld [vmem:[#allocation194_spill] sm:$0xff]  ;;  %v2634_v37 = vld [vmem:[%s5337_s5 + $0x58] sm:$0xff] }
 0x29f   :  { %v777_v3 = vmul.f32 %v4333_v43, %v5681_v36  ;;  %v1181_v53 = vmul.f32 %v4406_v10, %v5682_v52  ;;  %v1570_v0 = vmul.f32 %v4467_v15, %v5683_v48  ;;  %v1585_v34 = vadd.f32 %v1521_v38, %v1197_v63  ;;  %v5689_v14 = vld [vmem:[#allocation161_spill] sm:$0xff]  ;;  %v5690_v38 = vld [vmem:[#allocation211_spill] sm:$0xff] }
 0x2a0   :  { %v2127_v6 = vmax.f32 %v2063_v56, 0.0  ;;  %2254 = vperm.xlu1 %3018, %v2224_v58   ;;  %v1737_v17 = vpop.permute.xlu0 %1736  ;;  %2972 = vmatprep.subr.bf16.mxu1 %v2971_v44  ;;  %v1569_v22 = vmul.f32 %v4467_v15, %v5684_v12  ;;  %v2114_v4 = vmax.f32 %v2050_v54, 0.0  ;;  %v1152_v49 = vmul.f32 %v4406_v10, %v5685_v50  ;;  %v2226_v58 = vld [vmem:[%s5336_s4 + $0x28] sm:$0xff]  ;;  %v2635_v36 = vld [vmem:[%s5337_s5 + $0x60] sm:$0xff] }
 0x2a1   :  { %v1812_v32 = vpop.permute.xlu1 %1811  ;;  %2686 = vperm.xlu0 %3016, %v2632_v59   ;;  %v2034_v45 = vadd.f32 %v1737_v17, %v1586_v18  ;;  %v1230_v19 = vadd.f32 %v1166_v1, %v4483_v51  ;;  %v439_v35 = vmul.f32 %v4340_v41, %v5686_v61  ;;  %v1634_v7 = vadd.f32 %v1570_v0, %v1246_v21  ;;  %v5687_v59 = vld [vmem:[#allocation95_spill] sm:$0xff]  ;;  %v5692_v1 = vld [vmem:[#allocation22_spill] sm:$0xff]  ;;  %v5696_v0 = vld [vmem:[#allocation149_spill] sm:$0xff] }
 0x2a2   :  { %v2973_v40 = vpack.c.bf16 %v2128_v29, %v2127_v6  ;;  %v2049_v11 = vadd.f32 %v1812_v32, %v1601_v20  ;;  %v841_v31 = vadd.f32 %v777_v3, %v453_v23  ;;  %v1245_v56 = vadd.f32 %v1181_v53, %v857_v9  ;;  %v5691_v20 = vld [vmem:[#allocation139_spill] sm:$0xff]  ;;  %v5693_v32 = vld [vmem:[#allocation181_spill] sm:$0xff]  ;;  %v5694_v3 = vld [vmem:[#allocation94_spill] sm:$0xff] }
 0x2a3   :  { %v763_v51 = vmul.f32 %v4333_v43, %v5687_v59  ;;  %v1165_v5 = vmul.f32 %v4406_v10, %v5688_v30  ;;  %v1554_v57 = vmul.f32 %v4467_v15, %v5689_v14  ;;  %v1553_v18 = vmul.f32 %v4467_v15, %v5690_v38  ;;  %v2227_v23 = vld [vmem:[%s5336_s4 + $0x30] sm:$0xff]  ;;  %v5701_v30 = vld [vmem:[#allocation81_spill] sm:$0xff]  ;;  %v5703_v38 = vld [vmem:[#allocation186_spill] sm:$0xff] }
 0x2a4   :  { %v2113_v62 = vmax.f32 %v2049_v11, 0.0  ;;  %2641 = vperm.xlu1 %3018, %v2623_v27   ;;  %v1977_v2 = vpop.permute.xlu0 %1976  ;;  %2974 = vmatpush3.bf16.msra.mxu1 %v2973_v40  ;;  %v2098_v24 = vmax.f32 %v2034_v45, 0.0  ;;  %v1633_v17 = vadd.f32 %v1569_v22, %v1245_v56  ;;  %v1136_v47 = vmul.f32 %v4406_v10, %v5691_v20  ;;  %v5695_v53 = vld [vmem:[#allocation136_spill] sm:$0xff]  ;;  %v5697_v12 = vld [vmem:[#allocation199_spill] sm:$0xff]  ;;  %v5704_v20 = vld [vmem:[#allocation166_spill] sm:$0xff] }
 0x2a5   :  { %v1732_v28 = vpop.permute.xlu1 %1731  ;;  %2691 = vperm.xlu0 %3016, %v2633_v13   ;;  %v2082_v29 = vadd.f32 %v1977_v2, %v1634_v7  ;;  %v1216_v21 = vadd.f32 %v1152_v49, %v5692_v1  ;;  %v423_v27 = vmul.f32 %v4340_v41, %v5693_v32  ;;  %v1618_v63 = vadd.f32 %v1554_v57, %v1230_v19  ;;  %v5698_v49 = vld [vmem:[#allocation13_spill] sm:$0xff]  ;;  %v5699_v61 = vld [vmem:[#allocation68_spill] sm:$0xff]  ;;  %v5702_v14 = vld [vmem:[#allocation123_spill] sm:$0xff] }
 0x2a6   :  { %v2943_v39 = vpack.c.bf16 %v2114_v4, %v2113_v62  ;;  %v2033_v44 = vadd.f32 %v1732_v28, %v1585_v34  ;;  %v827_v9 = vadd.f32 %v763_v51, %v439_v35  ;;  %v1229_v13 = vadd.f32 %v1165_v5, %v841_v31  ;;  %v2228_v31 = vld [vmem:[%s5336_s4 + $0x38] sm:$0xff]  ;;  %v2637_v51 = vld [vmem:[%s5337_s5 + $0x70] sm:$0xff] }
 0x2a7   :  { %v1151_v52 = vmul.f32 %v4406_v10, %v5694_v3  ;;  %v1524_v48 = vmul.f32 %v4467_v15, %v5695_v53  ;;  %v1540_v34 = vmul.f32 %v4467_v15, %v5696_v0  ;;  %v1539_v22 = vmul.f32 %v4467_v15, %v5697_v12  ;;  %v5708_v3 = vld [vmem:[#allocation172_spill] sm:$0xff] }
 0x2a8   :  { %v2097_v54 = vmax.f32 %v2033_v44, 0.0  ;;  %2264 = vperm.xlu1 %3018, %v2226_v58   ;;  %v1897_v6 = vpop.permute.xlu0 %1896  ;;  %2944 = vmatprep.subr.bf16.mxu0 %v2943_v39  ;;  %v2146_v4 = vmax.f32 %v2082_v29, 0.0  ;;  %v1617_v50 = vadd.f32 %v1553_v18, %v1229_v13  ;;  %v1200_v19 = vadd.f32 %v1136_v47, %v5698_v49  ;;  %v5700_v39 = vld [vmem:[#allocation222_spill] sm:$0xff] }
 0x2a9   :  { %v1972_v33 = vpop.permute.xlu1 %1971  ;;  %2696 = vperm.xlu0 %3016, %v2634_v37   ;;  %v2066_v45 = vadd.f32 %v1897_v6, %v1618_v63  ;;  %v1184_v35 = vmul.f32 %v4406_v10, %v5699_v61  ;;  %v811_v7 = vadd.f32 %v4704_v25, %v423_v27  ;;  %v1604_v28 = vadd.f32 %v1540_v34, %v1216_v21  ;;  %v2229_v21 = vld [vmem:[%s5336_s4 + $0x40] sm:$0xff]  ;;  %v5705_v27 = vld [vmem:[#allocation208_spill] sm:$0xff] }
 0x2aa   :  { %v2945_v40 = vpack.c.bf16 %v2098_v24, %v2097_v54  ;;  %v2081_v11 = vadd.f32 %v1972_v33, %v1633_v17  ;;  %v471_v44 = vmul.f32 %v4340_v41, %v5700_v39  ;;  %v1215_v59 = vadd.f32 %v1151_v52, %v827_v9  ;;  %v5707_v13 = vld [vmem:[#allocation122_spill] sm:$0xff]  ;;  %v5712_v39 = vld [vmem:[#allocation97_spill] sm:$0xff] }
 0x2ab   :  { %v860_v25 = vadd.f32 %v4536_v42, %v4532_v55  ;;  %v1135_v5 = vmul.f32 %v4406_v10, %v5701_v30  ;;  %v795_v57 = vmul.f32 %v4333_v43, %v5702_v14  ;;  %v1523_v18 = vmul.f32 %v4467_v15, %v5703_v38 }
 0x2ac   :  { %v2145_v62 = vmax.f32 %v2081_v11, 0.0  ;;  %2269 = vperm.xlu1 %3018, %v2227_v23   ;;  %v1827_v2 = vpop.permute.xlu0 %1826  ;;  %2946 = vmatpush3.bf16.msra.mxu0 %v2945_v40  ;;  %v2130_v24 = vmax.f32 %v2066_v45, 0.0  ;;  %v1603_v17 = vadd.f32 %v1539_v22, %v1215_v59  ;;  %v1168_v47 = vmul.f32 %v4406_v10, %v5704_v20  ;;  %v5706_v40 = vld [vmem:[#allocation109_spill] sm:$0xff]  ;;  %v5710_v45 = vld [vmem:[#allocation154_spill] sm:$0xff] }
 0x2ad   :  { %v1892_v58 = vpop.permute.xlu1 %1891  ;;  %2701 = vperm.xlu0 %3016, %v2635_v36   ;;  %v2052_v29 = vadd.f32 %v1827_v2, %v1604_v28  ;;  %v1248_v55 = vadd.f32 %v1184_v35, %v860_v25  ;;  %v1588_v42 = vadd.f32 %v1524_v48, %v1200_v19  ;;  %v1199_v32 = vadd.f32 %v1135_v5, %v811_v7  ;;  %v5709_v48 = vld [vmem:[#allocation23_spill] sm:$0xff] }
 0x2ae   :  { %v2975_v56 = vpack.c.bf16 %v2146_v4, %v2145_v62  ;;  %v2065_v37 = vadd.f32 %v1892_v58, %v1617_v50  ;;  %v455_v63 = vmul.f32 %v4340_v41, %v5705_v27  ;;  %v859_v33 = vadd.f32 %v795_v57, %v471_v44  ;;  %v5711_v50 = vld [vmem:[#allocation196_spill] sm:$0xff]  ;;  %v2230_v35 = vld [vmem:[%s5336_s4 + $0x48] sm:$0xff] }
 0x2af   :  { %v779_v11 = vmul.f32 %v4333_v43, %v5706_v40  ;;  %v1183_v36 = vmul.f32 %v4406_v10, %v5707_v13  ;;  %v1572_v52 = vmul.f32 %v4467_v15, %v5708_v3  ;;  %v1587_v53 = vadd.f32 %v1523_v18, %v1199_v32  ;;  %v5716_v18 = vld [vmem:[#allocation141_spill] sm:$0xff]  ;;  %v5718_v32 = vld [vmem:[#allocation84_spill] sm:$0xff] }
 0x2b0   :  { %v2129_v54 = vmax.f32 %v2065_v37, 0.0  ;;  %2274 = vperm.xlu1 %3018, %v2228_v31   ;;  %v1747_v6 = vpop.permute.xlu0 %1746  ;;  %2976 = vmatprep.subr.bf16.mxu1 %v2975_v56  ;;  %v1571_v0 = vmul.f32 %v4467_v15, %v5709_v48  ;;  %v2116_v34 = vmax.f32 %v2052_v29, 0.0  ;;  %v1154_v62 = vmul.f32 %v4406_v10, %v5710_v45  ;;  %v5713_v56 = vld [vmem:[#allocation108_spill] sm:$0xff] }
 0x2b1   :  { %v1822_v1 = vpop.permute.xlu1 %1821  ;;  %2711 = vperm.xlu0 %3016, %v2637_v51   ;;  %v2036_v12 = vadd.f32 %v1747_v6, %v1588_v42  ;;  %v1232_v2 = vadd.f32 %v1168_v47, %v4485_v60  ;;  %v441_v49 = vmul.f32 %v4340_v41, %v5711_v50  ;;  %v1636_v19 = vadd.f32 %v1572_v52, %v1248_v55  ;;  %v5714_v60 = vld [vmem:[#allocation163_spill] sm:$0xff]  ;;  %v5715_v51 = vld [vmem:[#allocation213_spill] sm:$0xff] }
 0x2b2   :  { %v2977_v23 = vpack.c.bf16 %v2130_v24, %v2129_v54  ;;  %v2051_v9 = vadd.f32 %v1822_v1, %v1603_v17  ;;  %v843_v7 = vadd.f32 %v779_v11, %v455_v63  ;;  %v1247_v31 = vadd.f32 %v1183_v36, %v859_v33  ;;  %v5717_v54 = vld [vmem:[#allocation183_spill] sm:$0xff]  ;;  %v5719_v63 = vld [vmem:[#allocation96_spill] sm:$0xff] }
 0x2b3   :  { %v765_v44 = vmul.f32 %v4333_v43, %v5712_v39  ;;  %v1167_v37 = vmul.f32 %v4406_v10, %v5713_v56  ;;  %v1556_v59 = vmul.f32 %v4467_v15, %v5714_v60  ;;  %v1555_v25 = vmul.f32 %v4467_v15, %v5715_v51  ;;  %v2231_v47 = vld [vmem:[%s5336_s4 + $0x50] sm:$0xff]  ;;  %v5726_v60 = vld [vmem:[#allocation9_spill] sm:$0xff] }
 0x2b4   :  { %v2115_v22 = vmax.f32 %v2051_v9, 0.0  ;;  %2279 = vperm.xlu1 %3018, %v2229_v21   ;;  %v1987_v4 = vpop.permute.xlu0 %1986  ;;  %2978 = vmatpush3.bf16.msra.mxu1 %v2977_v23  ;;  %v2100_v30 = vmax.f32 %v2036_v12, 0.0  ;;  %v1635_v38 = vadd.f32 %v1571_v0, %v1247_v31  ;;  %v1138_v24 = vmul.f32 %v4406_v10, %v5716_v18  ;;  %v5721_v9 = vld [vmem:[#allocation201_spill] sm:$0xff]  ;;  %v5723_v0 = vld [vmem:[#allocation14_spill] sm:$0xff] }
 0x2b5   :  { %v1742_v61 = vpop.permute.xlu1 %1741  ;;  %v2084_v5 = vadd.f32 %v1987_v4, %v1636_v19  ;;  %v1218_v29 = vadd.f32 %v1154_v62, %v4477_v8  ;;  %v425_v6 = vmul.f32 %v4340_v41, %v5717_v54  ;;  %v1620_v17 = vadd.f32 %v1556_v59, %v1232_v2  ;;  %v5720_v8 = vld [vmem:[#allocation151_spill] sm:$0xff]  ;;  %v2232_v4 = vld [vmem:[%s5336_s4 + $0x58] sm:$0xff] }
 0x2b6   :  { %v2947_v28 = vpack.c.bf16 %v2116_v34, %v2115_v22  ;;  %v2035_v58 = vadd.f32 %v1742_v61, %v1587_v53  ;;  %v829_v55 = vadd.f32 %v765_v44, %v441_v49  ;;  %v1231_v21 = vadd.f32 %v1167_v37, %v843_v7  ;;  %v5722_v53 = vld [vmem:[#allocation138_spill] sm:$0xff]  ;;  %v5724_v49 = vld [vmem:[#allocation83_spill] sm:$0xff]  ;;  %v5725_v61 = vld [vmem:[#allocation188_spill] sm:$0xff] }
 0x2b7   :  { %v749_v27 = vmul.f32 %v4333_v43, %v5718_v32  ;;  %v1153_v33 = vmul.f32 %v4406_v10, %v5719_v63  ;;  %v1542_v23 = vmul.f32 %v4467_v15, %v5720_v8  ;;  %v1541_v40 = vmul.f32 %v4467_v15, %v5721_v9  ;;  %v2233_v37 = vld [vmem:[%s5336_s4 + $0x60] sm:$0xff]  ;;  %v5733_v9 = vld [vmem:[#allocation47_spill] sm:$0xff] }
 0x2b8   :  { %v2099_v14 = vmax.f32 %v2035_v58, 0.0  ;;  %2284 = vperm.xlu1 %3018, %v2230_v35   ;;  %v1907_v57 = vpop.permute.xlu0 %1906  ;;  %2948 = vmatprep.subr.bf16.mxu0 %v2947_v28  ;;  %v2148_v11 = vmax.f32 %v2084_v5, 0.0  ;;  %v1619_v52 = vadd.f32 %v1555_v25, %v1231_v21  ;;  %v1526_v48 = vmul.f32 %v4467_v15, %v5722_v53  ;;  %v5727_v5 = vld [vmem:[#allocation69_spill] sm:$0xff]  ;;  %v5731_v21 = vld [vmem:[#allocation210_spill] sm:$0xff] }
 0x2b9   :  { %v1982_v20 = vpop.permute.xlu1 %1981  ;;  %v2068_v13 = vadd.f32 %v1907_v57, %v1620_v17  ;;  %v1202_v34 = vadd.f32 %v1138_v24, %v5723_v0  ;;  %v1606_v12 = vadd.f32 %v1542_v23, %v1218_v29  ;;  %v813_v45 = vadd.f32 %v749_v27, %v425_v6  ;;  %v5728_v57 = vld [vmem:[#allocation70_spill] sm:$0xff]  ;;  %v5729_v18 = vld [vmem:[#allocation125_spill] sm:$0xff] }
 0x2ba   :  { %v2949_v42 = vpack.c.bf16 %v2100_v30, %v2099_v14  ;;  %v2083_v1 = vadd.f32 %v1982_v20, %v1635_v38  ;;  %v1217_v50 = vadd.f32 %v1153_v33, %v829_v55  ;;  %v1137_v19 = vmul.f32 %v4406_v10, %v5724_v49  ;;  %v5730_v20 = vld [vmem:[#allocation175_spill] sm:$0xff]  ;;  %v5732_v8 = vld [vmem:[#allocation46_spill] sm:$0xff] }
 0x2bb   :  { %v1525_v35 = vmul.f32 %v4467_v15, %v5725_v61  ;;  %v2132_v7 = vmax.f32 %v2068_v13, 0.0  ;;  %v1590_v44 = vadd.f32 %v1526_v48, %v1202_v34  ;;  %v473_v59 = vmul.f32 %v4340_v41, %v5726_v60  ;;  %v5734_v13 = vld [vmem:[#allocation111_spill] sm:$0xff]  ;;  %v5736_v34 = vld [vmem:[#allocation32_spill] sm:$0xff] }
 0x2bc   :  { %v2147_v36 = vmax.f32 %v2083_v1, 0.0  ;;  %2289 = vperm.xlu1 %3018, %v2231_v47   ;;  %v1837_v3 = vpop.permute.xlu0 %1836  ;;  %2950 = vmatpush3.bf16.msra.mxu0 %v2949_v42  ;;  %v1605_v39 = vadd.f32 %v1541_v40, %v1217_v50  ;;  %v1201_v30 = vadd.f32 %v1137_v19, %v813_v45  ;;  %v474_v14 = vmul.f32 %v4340_v41, %v5727_v5  ;;  %v2234_v1 = vld [vmem:[%s5336_s4 + $0x68] sm:$0xff] }
 0x2bd   :  { %v1902_v22 = vpop.permute.xlu1 %1901  ;;  %v2054_v28 = vadd.f32 %v1837_v3, %v1606_v12  ;;  %v798_v38 = vmul.f32 %v4333_v43, %v5728_v57  ;;  %v797_v24 = vmul.f32 %v4333_v43, %v5729_v18  ;;  %v1186_v47 = vmul.f32 %v4406_v10, %v5730_v20  ;;  %v5735_v3 = vld [vmem:[#allocation124_spill] sm:$0xff]  ;;  %v5746_v18 = vld [vmem:[#allocation185_spill] sm:$0xff] }
 0x2be   :  { %v2979_v62 = vpack.c.bf16 %v2148_v11, %v2147_v36  ;;  %v2067_v2 = vadd.f32 %v1902_v22, %v1619_v52  ;;  %v1589_v17 = vadd.f32 %v1525_v35, %v1201_v30  ;;  %v457_v32 = vmul.f32 %v4340_v41, %v5731_v21  ;;  %v5737_v22 = vld [vmem:[#allocation168_spill] sm:$0xff]  ;;  %v5739_v35 = vld [vmem:[#allocation33_spill] sm:$0xff]  ;;  %v5748_v21 = vld [vmem:[#allocation86_spill] sm:$0xff] }
 0x2bf   :  { %v2118_v29 = vmax.f32 %v2054_v28, 0.0  ;;  %v861_v27 = vadd.f32 %v797_v24, %v473_v59  ;;  %v458_v23 = vmul.f32 %v4340_v41, %v5732_v8  ;;  %v782_v40 = vmul.f32 %v4333_v43, %v5733_v9  ;;  %v5743_v59 = vld [vmem:[#allocation215_spill] sm:$0xff]  ;;  %v5744_v30 = vld [vmem:[#allocation16_spill] sm:$0xff]  ;;  %v5750_v8 = vld [vmem:[#allocation98_spill] sm:$0xff] }
 0x2c0   :  { %v2131_v58 = vmax.f32 %v2067_v2, 0.0  ;;  %2294 = vperm.xlu1 %3018, %v2232_v4   ;;  %v1757_v31 = vpop.permute.xlu0 %1756  ;;  %2980 = vmatprep.subr.bf16.mxu1 %v2979_v62  ;;  %v862_v11 = vadd.f32 %v798_v38, %v474_v14  ;;  %v781_v36 = vmul.f32 %v4333_v43, %v5734_v13  ;;  %v1185_v52 = vmul.f32 %v4406_v10, %v5735_v3  ;;  %v2235_v62 = vld [vmem:[%s5336_s4 + $0x70] sm:$0xff]  ;;  %v5738_v2 = vld [vmem:[#allocation198_spill] sm:$0xff] }
 0x2c1   :  { %v1832_v56 = vpop.permute.xlu1 %1831  ;;  %v2038_v54 = vadd.f32 %v1757_v31, %v1590_v44  ;;  %v1573_v53 = vmul.f32 %v4467_v15, %v4473_v16  ;;  %v444_v12 = vmul.f32 %v4340_v41, %v5736_v34  ;;  %v1170_v4 = vmul.f32 %v4406_v10, %v5737_v22  ;;  %v5745_v14 = vld [vmem:[#allocation156_spill] sm:$0xff]  ;;  %v5751_v9 = vld [vmem:[#allocation203_spill] sm:$0xff] }
 0x2c2   :  { %v2981_v51 = vpack.c.bf16 %v2132_v7, %v2131_v58  ;;  %v2053_v25 = vadd.f32 %v1832_v56, %v1605_v39  ;;  %v1250_v45 = vadd.f32 %v1186_v47, %v862_v11  ;;  %v443_v50 = vmul.f32 %v4340_v41, %v5738_v2  ;;  %v5740_v58 = vld [vmem:[#allocation99_spill] sm:$0xff]  ;;  %v5741_v39 = vld [vmem:[#allocation110_spill] sm:$0xff]  ;;  %v5747_v47 = vld [vmem:[#allocation17_spill] sm:$0xff] }
 0x2c3   :  { %v2102_v48 = vmax.f32 %v2038_v54, 0.0  ;;  %v845_v49 = vadd.f32 %v781_v36, %v457_v32  ;;  %v1249_v16 = vadd.f32 %v1185_v52, %v861_v27  ;;  %v768_v7 = vmul.f32 %v4333_v43, %v5739_v35  ;;  %v5749_v27 = vld [vmem:[#allocation165_spill] sm:$0xff]  ;;  %v5752_v13 = vld [vmem:[#allocation143_spill] sm:$0xff] }
 0x2c4   :  { %v2117_v6 = vmax.f32 %v2053_v25, 0.0  ;;  %2299 = vperm.xlu1 %3018, %v2233_v37   ;;  %2982 = vmatpush3.bf16.msra.mxu1 %v2981_v51  ;;  %v1992_v55 = vpop.permute.xlu0 %1991  ;;  %v846_v28 = vadd.f32 %v782_v40, %v458_v23  ;;  %v767_v31 = vmul.f32 %v4333_v43, %v5740_v58  ;;  %v1169_v44 = vmul.f32 %v4406_v10, %v5741_v39  ;;  %v5742_v37 = vld [vmem:[#allocation173_spill] sm:$0xff] }
 0x2c5   :  { %v1752_v42 = vpop.permute.xlu1 %1751  ;;  %v1574_v60 = vmul.f32 %v4467_v15, %v5742_v37  ;;  %v1557_v51 = vmul.f32 %v4467_v15, %v5743_v59  ;;  %v1637_v25 = vadd.f32 %v1573_v53, %v1249_v16  ;;  %v428_v5 = vmul.f32 %v4340_v41, %v5744_v30  ;;  %v2638_v37 = vld [vmem:[%s5337_s5 + $0x78] sm:$0xff] }
 0x2c6   :  { %v2951_v63 = vpack.c.bf16 %v2118_v29, %v2117_v6  ;;  %v2037_v33 = vadd.f32 %v1752_v42, %v1589_v17  ;;  %v1156_v57 = vmul.f32 %v4406_v10, %v5745_v14  ;;  %v1234_v38 = vadd.f32 %v1170_v4, %v846_v28  ;;  %v2236_v29 = vld [vmem:[%s5336_s4 + $0x78] sm:$0xff] }
 0x2c7   :  { %v427_v24 = vmul.f32 %v4340_v41, %v5746_v18  ;;  %v831_v54 = vadd.f32 %v767_v31, %v443_v50  ;;  %v2085_v6 = vadd.f32 %v1992_v55, %v1637_v25  ;;  %v1233_v17 = vadd.f32 %v1169_v44, %v845_v49  ;;  %v5754_v50 = vld [vmem:[#allocation153_spill] sm:$0xff]  ;;  %v5756_v31 = vld [vmem:[#allocation140_spill] sm:$0xff]  ;;  %v5757_v18 = vld [vmem:[#allocation71_spill] sm:$0xff] }
 0x2c8   :  { %v2101_v0 = vmax.f32 %v2037_v33, 0.0  ;;  %2304 = vperm.xlu1 %3018, %v2234_v1   ;;  %2952 = vmatprep.subr.bf16.mxu0 %v2951_v63  ;;  %v1912_v56 = vpop.permute.xlu0 %1911  ;;  %v1638_v20 = vadd.f32 %v1574_v60, %v1250_v45  ;;  %v752_v42 = vmul.f32 %v4333_v43, %v5747_v47  ;;  %v832_v1 = vadd.f32 %v768_v7, %v444_v12 }
 0x2c9   :  { %v751_v32 = vmul.f32 %v4333_v43, %v5748_v21  ;;  %v1558_v63 = vmul.f32 %v4467_v15, %v5749_v27  ;;  %v1155_v23 = vmul.f32 %v4406_v10, %v5750_v8  ;;  %v1543_v40 = vmul.f32 %v4467_v15, %v5751_v9 }
 0x2ca   :  { %v2953_v19 = vpack.c.bf16 %v2102_v48, %v2101_v0  ;;  %v4884_v61 = vpop.permute.xlu1 %1494  ;;  %v1621_v55 = vadd.f32 %v1557_v51, %v1233_v17  ;;  %v1140_v36 = vmul.f32 %v4406_v10, %v5752_v13  ;;  %v1220_v3 = vadd.f32 %v1156_v57, %v832_v1  ;;  %v2636_v0 = vld [vmem:[%s5337_s5 + $0x68] sm:$0xff] }
 0x2cb   :  { %v815_v52 = vadd.f32 %v751_v32, %v427_v24  ;;  %v1622_v48 = vadd.f32 %v1558_v63, %v1234_v38  ;;  %v2149_v34 = vmax.f32 %v2085_v6, 0.0  ;;  %v1219_v22 = vadd.f32 %v1155_v23, %v831_v54  ;;  %v5759_v17 = vld [vmem:[#allocation11_spill] sm:$0xff]  ;;  %v5761_v63 = vld [vmem:[#allocation177_spill] sm:$0xff] }
 0x2cc   :  { %2309 = vperm.xlu1 %3018, %v2235_v62   ;;  %2954 = vmatpush3.bf16.msra.mxu0 %v2953_v19  ;;  %v1842_v53 = vpop.permute.xlu0 %1841  ;;  %v2069_v12 = vadd.f32 %v1912_v56, %v1621_v55  ;;  %v816_v45 = vadd.f32 %v752_v42, %v428_v5  ;;  %v5753_v62 = vld [vmem:[#allocation85_spill] sm:$0xff]  ;;  %v1544_v49 = vmul.f32 %v4467_v15, %v5754_v50  ;;  %v5755_v19 = vld [vmem:[#allocation190_spill] sm:$0xff]  ;;  %v5760_v32 = vld [vmem:[#allocation127_spill] sm:$0xff] }
 0x2cd   :  { %v1139_v2 = vmul.f32 %v4406_v10, %v5753_v62  ;;  %v1527_v35 = vmul.f32 %v4467_v15, %v5755_v19  ;;  %v1607_v7 = vadd.f32 %v1543_v40, %v1219_v22  ;;  %v1528_v39 = vmul.f32 %v4467_v15, %v5756_v31  ;;  %v5764_v22 = vld [vmem:[#allocation48_spill] sm:$0xff]  ;;  %v5767_v19 = vld [vmem:[#allocation50_spill] sm:$0xff] }
 0x2ce   :  { %v1204_v44 = vadd.f32 %v1140_v36, %v816_v45  ;;  %v1608_v56 = vadd.f32 %v1544_v49, %v1220_v3  ;;  %v2133_v60 = vmax.f32 %v2069_v12, 0.0  ;;  %v476_v24 = vmul.f32 %v4340_v41, %v5757_v18  ;;  %v5762_v36 = vld [vmem:[#allocation126_spill] sm:$0xff] }
 0x2cf   :  { %v1997_v33 = vpop.permute.xlu1 %1996  ;;  %v2055_v59 = vadd.f32 %v1842_v53, %v1607_v7  ;;  %v1203_v51 = vadd.f32 %v1139_v2, %v815_v52  ;;  %v799_v27 = vmul.f32 %v4333_v43, %v5760_v32  ;;  %v1576_v55 = vmul.f32 %v4467_v15, %v4884_v61  ;;  %v5763_v53 = vld [vmem:[#allocation212_spill] sm:$0xff]  ;;  %v5765_v61 = vld [vmem:[#allocation49_spill] sm:$0xff]  ;;  %v5774_v18 = vld [vmem:[#allocation18_spill] sm:$0xff] }
 0x2d0   :  { %v2086_v11 = vadd.f32 %v1997_v33, %v1638_v20  ;;  %2314 = vperm.xlu1 %3018, %v2236_v29   ;;  %v1762_v30 = vpop.permute.xlu0 %1761  ;;  %v5758_v29 = vld [vmem:[#allocation72_spill] sm:$0xff]  ;;  %v1592_v6 = vadd.f32 %v1528_v39, %v1204_v44  ;;  %v475_v20 = vmul.f32 %v4340_v41, %v5759_v17  ;;  %v1188_v33 = vmul.f32 %v4406_v10, %v5761_v63  ;;  %v5766_v2 = vld [vmem:[#allocation113_spill] sm:$0xff]  ;;  %v5769_v39 = vld [vmem:[#allocation34_spill] sm:$0xff] }
 0x2d1   :  { %v1591_v14 = vadd.f32 %v1527_v35, %v1203_v51  ;;  %v800_v54 = vmul.f32 %v4333_v43, %v5758_v29  ;;  %v2119_v47 = vmax.f32 %v2055_v59, 0.0  ;;  %v1187_v3 = vmul.f32 %v4406_v10, %v5762_v36  ;;  %v5771_v51 = vld [vmem:[#allocation101_spill] sm:$0xff]  ;;  %v5775_v29 = vld [vmem:[#allocation158_spill] sm:$0xff]  ;;  %v5776_v17 = vld [vmem:[#allocation187_spill] sm:$0xff] }
 0x2d2   :  { %v2150_v4 = vmax.f32 %v2086_v11, 0.0  ;;  %v863_v40 = vadd.f32 %v799_v27, %v475_v20  ;;  %v784_v45 = vmul.f32 %v4333_v43, %v5765_v61  ;;  %v783_v50 = vmul.f32 %v4333_v43, %v5766_v2  ;;  %v5777_v32 = vld [vmem:[#allocation19_spill] sm:$0xff] }
 0x2d3   :  { %v1917_v16 = vpop.permute.xlu1 %1916  ;;  %v2039_v42 = vadd.f32 %v1762_v30, %v1591_v14  ;;  %v864_v9 = vadd.f32 %v800_v54, %v476_v24  ;;  %v1172_v35 = vmul.f32 %v4406_v10, %v5767_v19  ;;  %v446_v44 = vmul.f32 %v4340_v41, %v5769_v39  ;;  %v5772_v30 = vld [vmem:[#allocation112_spill] sm:$0xff]  ;;  %v5773_v14 = vld [vmem:[#allocation217_spill] sm:$0xff]  ;;  %v5783_v2 = vld [vmem:[#allocation155_spill] sm:$0xff] }
 0x2d4   :  { %v2983_v28 = vpack.c.bf16 %v2150_v4, %v2149_v34  ;;  %v2070_v58 = vadd.f32 %v1917_v16, %v1622_v48  ;;  %2706 = vperm.xlu1 %3018, %v2636_v0   ;;  %v459_v48 = vmul.f32 %v4340_v41, %v5763_v53  ;;  %v1575_v0 = vmul.f32 %v4467_v15, %v4506_v26  ;;  %v2007_v62 = vpop.permute.xlu0 %2006  ;;  %v5768_v26 = vld [vmem:[#allocation200_spill] sm:$0xff]  ;;  %v5782_v53 = vld [vmem:[#allocation145_spill] sm:$0xff] }
 0x2d5   :  { %v2103_v11 = vmax.f32 %v2039_v42, 0.0  ;;  %v1252_v52 = vadd.f32 %v1188_v33, %v864_v9  ;;  %v460_v4 = vmul.f32 %v4340_v41, %v5764_v22  ;;  %v1251_v16 = vadd.f32 %v1187_v3, %v863_v40  ;;  %v5778_v33 = vld [vmem:[#allocation88_spill] sm:$0xff] }
 0x2d6   :  { %v2134_v25 = vmax.f32 %v2070_v58, 0.0  ;;  %2984 = vmatprep.subr.bf16.mxu1 %v2983_v28  ;;  %v445_v7 = vmul.f32 %v4340_v41, %v5768_v26  ;;  %v847_v28 = vadd.f32 %v783_v50, %v459_v48  ;;  %v430_v24 = vmul.f32 %v4340_v41, %v5774_v18 }
 0x2d7   :  { %v1847_v5 = vpop.permute.xlu1 %1846  ;;  %v1640_v49 = vadd.f32 %v1576_v55, %v1252_v52  ;;  %v1639_v31 = vadd.f32 %v1575_v0, %v1251_v16  ;;  %v1158_v54 = vmul.f32 %v4406_v10, %v5775_v29  ;;  %v429_v20 = vmul.f32 %v4340_v41, %v5776_v17  ;;  %v5780_v55 = vld [vmem:[#allocation167_spill] sm:$0xff] }
 0x2d8   :  { %v2985_v57 = vpack.c.bf16 %v2134_v25, %v2133_v60  ;;  %v2056_v38 = vadd.f32 %v1847_v5, %v1608_v56  ;;  %2716 = vperm.xlu1 %3018, %v2638_v37   ;;  %v5770_v56 = vld [vmem:[#allocation35_spill] sm:$0xff]  ;;  %v848_v60 = vadd.f32 %v784_v45, %v460_v4  ;;  %v769_v25 = vmul.f32 %v4333_v43, %v5771_v51  ;;  %v5787_v51 = vld [vmem:[#allocation73_spill] sm:$0xff] }
 0x2d9   :  { %v2088_v58 = vadd.f32 %v2007_v62, %v1640_v49  ;;  %v770_v37 = vmul.f32 %v4333_v43, %v5770_v56  ;;  %v1171_v5 = vmul.f32 %v4406_v10, %v5772_v30  ;;  %v754_v27 = vmul.f32 %v4333_v43, %v5777_v32  ;;  %v5784_v16 = vld [vmem:[#allocation87_spill] sm:$0xff]  ;;  %v5788_v30 = vld [vmem:[#allocation74_spill] sm:$0xff] }
 0x2da   :  { %v2120_v1 = vmax.f32 %v2056_v38, 0.0  ;;  %2986 = vmatpush3.bf16.msra.mxu1 %v2985_v57  ;;  %v1559_v57 = vmul.f32 %v4467_v15, %v5773_v14  ;;  %v1142_v48 = vmul.f32 %v4406_v10, %v5782_v53  ;;  %v1546_v50 = vmul.f32 %v4467_v15, %v5783_v2  ;;  %v5797_v2 = vld [vmem:[#allocation52_spill] sm:$0xff] }
 0x2db   :  { %v1767_v21 = vpop.permute.xlu1 %1766  ;;  %v2152_v42 = vmax.f32 %v2088_v58, 0.0  ;;  %v834_v63 = vadd.f32 %v770_v37, %v446_v44  ;;  %v818_v62 = vadd.f32 %v754_v27, %v430_v24  ;;  %v1141_v19 = vmul.f32 %v4406_v10, %v5784_v16  ;;  %v5786_v58 = vld [vmem:[#allocation142_spill] sm:$0xff]  ;;  %v5798_v16 = vld [vmem:[#allocation115_spill] sm:$0xff] }
 0x2dc   :  { %v2955_v8 = vpack.c.bf16 %v2120_v1, %v2119_v47  ;;  %v2040_v23 = vadd.f32 %v1767_v21, %v1592_v6  ;;  %v1236_v6 = vadd.f32 %v1172_v35, %v848_v60  ;;  %v833_v47 = vadd.f32 %v769_v25, %v445_v7  ;;  %v5785_v35 = vld [vmem:[#allocation191_spill] sm:$0xff] }
 0x2dd   :  { %v1235_v21 = vadd.f32 %v1171_v5, %v847_v28  ;;  %v1222_v0 = vadd.f32 %v1158_v54, %v834_v63  ;;  %v1529_v26 = vmul.f32 %v4467_v15, %v5785_v35  ;;  %v1206_v39 = vadd.f32 %v1142_v48, %v818_v62  ;;  %v5799_v35 = vld [vmem:[#allocation174_spill] sm:$0xff] }
 0x2de   :  { %v2104_v13 = vmax.f32 %v2040_v23, 0.0  ;;  %2956 = vmatprep.subr.bf16.mxu0 %v2955_v8  ;;  %v753_v8 = vmul.f32 %v4333_v43, %v5778_v33  ;;  %v5779_v23 = vld [vmem:[#allocation100_spill] sm:$0xff]  ;;  %v478_v25 = vmul.f32 %v4340_v41, %v5787_v51  ;;  %v802_v5 = vmul.f32 %v4333_v43, %v5788_v30 }
 0x2df   :  { %v1157_v9 = vmul.f32 %v4406_v10, %v5779_v23  ;;  %v1623_v52 = vadd.f32 %v1559_v57, %v1235_v21  ;;  %v1610_v44 = vadd.f32 %v1546_v50, %v1222_v0  ;;  %v786_v50 = vmul.f32 %v4333_v43, %v5797_v2 }
 0x2e0   :  { %v2957_v34 = vpack.c.bf16 %v2104_v13, %v2103_v11  ;;  %v4949_v12 = vpop.permute.xlu1 %1502  ;;  %v1560_v11 = vmul.f32 %v4467_v15, %v5780_v55  ;;  %v5781_v13 = vld [vmem:[#allocation204_spill] sm:$0xff]  ;;  %v817_v22 = vadd.f32 %v753_v8, %v429_v20  ;;  %v866_v27 = vadd.f32 %v802_v5, %v478_v25 }
 0x2e1   :  { %v1545_v36 = vmul.f32 %v4467_v15, %v5781_v13  ;;  %v1221_v4 = vadd.f32 %v1157_v9, %v833_v47  ;;  %v5791_v47 = vld [vmem:[#allocation178_spill] sm:$0xff]  ;;  %v1578_v8 = vmul.f32 %v4467_v15, %v4949_v12 }
 0x2e2   :  { %2958 = vmatpush3.bf16.msra.mxu0 %v2957_v34  ;;  %v1852_v34 = vpop.permute.xlu0 %1851  ;;  %v1624_v45 = vadd.f32 %v1560_v11, %v1236_v6  ;;  %v1205_v37 = vadd.f32 %v1141_v19, %v817_v22  ;;  %v5790_v6 = vld [vmem:[#allocation129_spill] sm:$0xff]  ;;  %v5794_v22 = vld [vmem:[#allocation20_spill] sm:$0xff]  ;;  %v785_v19 = vmul.f32 %v4333_v43, %v5798_v16 }
 0x2e3   :  { %v1609_v7 = vadd.f32 %v1545_v36, %v1221_v4  ;;  %v801_v17 = vmul.f32 %v4333_v43, %v5790_v6  ;;  %v432_v12 = vmul.f32 %v4340_v41, %v5794_v22  ;;  %v5795_v4 = vld [vmem:[#allocation21_spill] sm:$0xff] }
 0x2e4   :  { %v1593_v24 = vadd.f32 %v1529_v26, %v1205_v37  ;;  %v1577_v26 = vmul.f32 %v4467_v15, %v5799_v35 }
 0x2e5   :  { %v2002_v59 = vpop.permute.xlu1 %2001  ;;  %v2057_v56 = vadd.f32 %v1852_v34, %v1609_v7  ;;  %v5800_v7 = vld [vmem:[#allocation36_spill] sm:$0xff] }
 0x2e6   :  { %v2087_v38 = vadd.f32 %v2002_v59, %v1639_v31  ;;  %v1530_v31 = vmul.f32 %v4467_v15, %v5786_v58  ;;  %v1772_v14 = vpop.permute.xlu0 %1771  ;;  %v5801_v58 = vld [vmem:[#allocation37_spill] sm:$0xff] }
 0x2e7   :  { %v2041_v21 = vadd.f32 %v1772_v14, %v1593_v24  ;;  %v5804_v14 = vld [vmem:[#allocation103_spill] sm:$0xff]  ;;  %v5806_v24 = vld [vmem:[#allocation218_spill] sm:$0xff] }
 0x2e8   :  { %v2151_v1 = vmax.f32 %v2087_v38, 0.0  ;;  %v5789_v38 = vld [vmem:[#allocation24_spill] sm:$0xff]  ;;  %v1594_v20 = vadd.f32 %v1530_v31, %v1206_v39  ;;  %v772_v31 = vmul.f32 %v4333_v43, %v5801_v58  ;;  %v5802_v39 = vld [vmem:[#allocation53_spill] sm:$0xff]  ;;  %v5819_v58 = vld [vmem:[#allocation130_spill] sm:$0xff] }
 0x2e9   :  { %v1922_v40 = vpop.permute.xlu1 %1921  ;;  %v477_v18 = vmul.f32 %v4340_v41, %v5789_v38  ;;  %v2105_v13 = vmax.f32 %v2041_v21, 0.0  ;;  %v5805_v38 = vld [vmem:[#allocation114_spill] sm:$0xff] }
 0x2ea   :  { %v2987_v3 = vpack.c.bf16 %v2152_v42, %v2151_v1  ;;  %v2071_v61 = vadd.f32 %v1922_v40, %v1623_v52  ;;  %v1190_v42 = vmul.f32 %v4406_v10, %v5791_v47  ;;  %v2121_v1 = vmax.f32 %v2057_v56, 0.0  ;;  %v5792_v40 = vld [vmem:[#allocation128_spill] sm:$0xff]  ;;  %v5803_v56 = vld [vmem:[#allocation202_spill] sm:$0xff] }
 0x2eb   :  { %v865_v33 = vadd.f32 %v801_v17, %v477_v18  ;;  %v1189_v55 = vmul.f32 %v4406_v10, %v5792_v40  ;;  %v447_v37 = vmul.f32 %v4340_v41, %v5803_v56  ;;  %v1173_v18 = vmul.f32 %v4406_v10, %v5805_v38  ;;  %v5807_v17 = vld [vmem:[#allocation159_spill] sm:$0xff] }
 0x2ec   :  { %2988 = vmatprep.subr.bf16.mxu1 %v2987_v3  ;;  %v2135_v60 = vmax.f32 %v2071_v61, 0.0  ;;  %v1254_v11 = vadd.f32 %v1190_v42, %v866_v27  ;;  %v5793_v3 = vld [vmem:[#allocation214_spill] sm:$0xff]  ;;  %v756_v61 = vmul.f32 %v4333_v43, %v5795_v4  ;;  %v5808_v42 = vld [vmem:[#allocation189_spill] sm:$0xff] }
 0x2ed   :  { %v1927_v49 = vpop.permute.xlu1 %1926  ;;  %v461_v52 = vmul.f32 %v4340_v41, %v5793_v3  ;;  %v1253_v34 = vadd.f32 %v1189_v55, %v865_v33  ;;  %v5811_v55 = vld [vmem:[#allocation102_spill] sm:$0xff] }
 0x2ee   :  { %v2072_v28 = vadd.f32 %v1927_v49, %v1624_v45  ;;  %v1642_v53 = vadd.f32 %v1578_v8, %v1254_v11  ;;  %v5796_v45 = vld [vmem:[#allocation51_spill] sm:$0xff]  ;;  %v2017_v49 = vpop.permute.xlu0 %2016  ;;  %v820_v25 = vadd.f32 %v756_v61, %v432_v12  ;;  %v5809_v8 = vld [vmem:[#allocation54_spill] sm:$0xff]  ;;  %v1159_v11 = vmul.f32 %v4406_v10, %v5811_v55  ;;  %v5827_v55 = vld [vmem:[#allocation56_spill] sm:$0xff] }
 0x2ef   :  { %v462_v62 = vmul.f32 %v4340_v41, %v5796_v45  ;;  %v1641_v51 = vadd.f32 %v1577_v26, %v1253_v34  ;;  %v5814_v12 = vld [vmem:[#allocation75_spill] sm:$0xff]  ;;  %v5817_v26 = vld [vmem:[#allocation76_spill] sm:$0xff] }
 0x2f0   :  { %v2136_v59 = vmax.f32 %v2072_v28, 0.0  ;;  %v448_v28 = vmul.f32 %v4340_v41, %v5800_v7  ;;  %v480_v4 = vmul.f32 %v4340_v41, %v5814_v12  ;;  %v5815_v61 = vld [vmem:[#allocation131_spill] sm:$0xff]  ;;  %v5818_v7 = vld [vmem:[#allocation89_spill] sm:$0xff]  ;;  %v5829_v12 = vld [vmem:[#allocation116_spill] sm:$0xff] }
 0x2f1   :  { %v1857_v57 = vpop.permute.xlu1 %1856  ;;  %v850_v30 = vadd.f32 %v786_v50, %v462_v62  ;;  %v803_v45 = vmul.f32 %v4333_v43, %v5815_v61  ;;  %v5816_v62 = vld [vmem:[#allocation146_spill] sm:$0xff] }
 0x2f2   :  { %v2989_v29 = vpack.c.bf16 %v2136_v59, %v2135_v60  ;;  %v2058_v54 = vadd.f32 %v1857_v57, %v1610_v44  ;;  %v1174_v44 = vmul.f32 %v4406_v10, %v5802_v39  ;;  %v849_v60 = vadd.f32 %v785_v19, %v461_v52  ;;  %v1862_v21 = vpop.permute.xlu0 %1861  ;;  %v5813_v52 = vld [vmem:[#allocation206_spill] sm:$0xff]  ;;  %v5820_v39 = vld [vmem:[#allocation157_spill] sm:$0xff] }
 0x2f3   :  { %v2090_v59 = vadd.f32 %v2017_v49, %v1642_v53  ;;  %v771_v57 = vmul.f32 %v4333_v43, %v5804_v14  ;;  %v836_v6 = vadd.f32 %v772_v31, %v448_v28  ;;  %v1547_v53 = vmul.f32 %v4467_v15, %v5813_v52  ;;  %v5822_v14 = vld [vmem:[#allocation144_spill] sm:$0xff] }
 0x2f4   :  { %v2122_v32 = vmax.f32 %v2058_v54, 0.0  ;;  %2990 = vmatpush3.bf16.msra.mxu1 %v2989_v29  ;;  %v1561_v29 = vmul.f32 %v4467_v15, %v5806_v24  ;;  %v1238_v47 = vadd.f32 %v1174_v44, %v850_v30  ;;  %v1237_v33 = vadd.f32 %v1173_v18, %v849_v60  ;;  %v5821_v60 = vld [vmem:[#allocation192_spill] sm:$0xff] }
 0x2f5   :  { %v1777_v63 = vpop.permute.xlu1 %1776  ;;  %v2154_v27 = vmax.f32 %v2090_v59, 0.0  ;;  %v1144_v2 = vmul.f32 %v4406_v10, %v5816_v62  ;;  %v1143_v28 = vmul.f32 %v4406_v10, %v5818_v7  ;;  %v1191_v31 = vmul.f32 %v4406_v10, %v5819_v58  ;;  %v5823_v18 = vld [vmem:[#allocation216_spill] sm:$0xff]  ;;  %v5831_v58 = vld [vmem:[#allocation170_spill] sm:$0xff] }
 0x2f6   :  { %v2959_v23 = vpack.c.bf16 %v2122_v32, %v2121_v1  ;;  %v2042_v9 = vadd.f32 %v1777_v63, %v1594_v20  ;;  %v1160_v20 = vmul.f32 %v4406_v10, %v5807_v17  ;;  %v431_v1 = vmul.f32 %v4340_v41, %v5808_v42  ;;  %v1782_v56 = vpop.permute.xlu0 %1781  ;;  %v5830_v62 = vld [vmem:[#allocation220_spill] sm:$0xff] }
 0x2f7   :  { %v835_v32 = vadd.f32 %v771_v57, %v447_v37  ;;  %v1625_v22 = vadd.f32 %v1561_v29, %v1237_v33  ;;  %v1548_v44 = vmul.f32 %v4467_v15, %v5820_v39  ;;  %v1531_v59 = vmul.f32 %v4467_v15, %v5821_v60 }
 0x2f8   :  { %v2106_v36 = vmax.f32 %v2042_v9, 0.0  ;;  %2960 = vmatprep.subr.bf16.mxu0 %v2959_v23  ;;  %v464_v23 = vmul.f32 %v4340_v41, %v5809_v8  ;;  %v5810_v9 = vld [vmem:[#allocation90_spill] sm:$0xff]  ;;  %v1224_v50 = vadd.f32 %v1160_v20, %v836_v6  ;;  %v1532_v57 = vmul.f32 %v4467_v15, %v5822_v14 }
 0x2f9   :  { %v755_v40 = vmul.f32 %v4333_v43, %v5810_v9  ;;  %v1223_v16 = vadd.f32 %v1159_v11, %v835_v32  ;;  %v1208_v38 = vadd.f32 %v1144_v2, %v820_v25  ;;  %v463_v24 = vmul.f32 %v4340_v41, %v5823_v18  ;;  %v5825_v32 = vld [vmem:[#allocation117_spill] sm:$0xff]  ;;  %v5828_v11 = vld [vmem:[#allocation176_spill] sm:$0xff] }
 0x2fa   :  { %v2961_v48 = vpack.c.bf16 %v2106_v36, %v2105_v13  ;;  %v5013_v0 = vpop.permute.xlu1 %1510  ;;  %v5812_v13 = vld [vmem:[#allocation169_spill] sm:$0xff]  ;;  %v1612_v29 = vadd.f32 %v1548_v44, %v1224_v50  ;;  %v1563_v2 = vmul.f32 %v4467_v15, %v5830_v62 }
 0x2fb   :  { %v1562_v36 = vmul.f32 %v4467_v15, %v5812_v13  ;;  %v819_v49 = vadd.f32 %v755_v40, %v431_v1  ;;  %v1611_v30 = vadd.f32 %v1547_v53, %v1223_v16  ;;  %v1579_v13 = vmul.f32 %v4467_v15, %v5828_v11  ;;  %v2161_v18 = vld [vmem:[%s5335_s3 + $0x20] sm:$0xff]  ;;  %v2186_v11 = vld [vmem:[%s5335_s3 + $0xe8] sm:$0xff] }
 0x2fc   :  { %2962 = vmatpush3.bf16.msra.mxu0 %v2961_v48  ;;  %v479_v48 = vmul.f32 %v4340_v41, %v4475_v46  ;;  %v804_v46 = vmul.f32 %v4333_v43, %v5817_v26  ;;  %v1596_v52 = vadd.f32 %v1532_v57, %v1208_v38  ;;  %v2197_v62 = vld [vmem:[%s5335_s3 + $0x140] sm:$0xff] }
 0x2fd   :  { %v1626_v35 = vadd.f32 %v1562_v36, %v1238_v47  ;;  %v1207_v6 = vadd.f32 %v1143_v28, %v819_v49  ;;  %v5824_v47 = vld [vmem:[#allocation55_spill] sm:$0xff] }
 0x2fe   :  { %v788_v42 = vmul.f32 %v4333_v43, %v5824_v47  ;;  %v868_v1 = vadd.f32 %v804_v46, %v480_v4  ;;  %v1175_v4 = vmul.f32 %v4406_v10, %v5829_v12  ;;  %v2169_v47 = vld [vmem:[%s5335_s3 + $0x60] sm:$0xff] }
 0x2ff   :  { %v2012_v5 = vpop.permute.xlu1 %2011  ;;  %v1595_v25 = vadd.f32 %v1531_v59, %v1207_v6  ;;  %v2159_v6 = vld [vmem:[%s5335_s3 + $0x10] sm:$0xff]  ;;  %v2193_v12 = vld [vmem:[%s5335_s3 + $0x120] sm:$0xff] }
 0x300   :  { %v2089_v54 = vadd.f32 %v2012_v5, %v1641_v51  ;;  %v867_v51 = vadd.f32 %v803_v45, %v479_v48 }
 0x301   :  { %v2043_v48 = vadd.f32 %v1782_v56, %v1595_v25  ;;  %v2177_v25 = vld [vmem:[%s5335_s3 + $0xa0] sm:$0xff] }
 0x302   :  { %v2153_v63 = vmax.f32 %v2089_v54, 0.0  ;;  %v2059_v54 = vadd.f32 %v1862_v21, %v1611_v30  ;;  %v1255_v9 = vadd.f32 %v1191_v31, %v867_v51  ;;  %v1176_v21 = vmul.f32 %v4406_v10, %v5827_v55  ;;  %v2157_v51 = vld [vmem:[%s5335_s3] sm:$0xff] }
 0x303   :  { %v1932_v3 = vpop.permute.xlu1 %1931  ;;  %v2107_v26 = vmax.f32 %v2043_v48, 0.0  ;;  %v2181_v55 = vld [vmem:[%s5335_s3 + $0xc0] sm:$0xff] }
 0x304   :  { %v2991_v34 = vpack.c.bf16 %v2154_v27, %v2153_v63  ;;  %v2073_v19 = vadd.f32 %v1932_v3, %v1625_v22  ;;  %v787_v27 = vmul.f32 %v4333_v43, %v5825_v32  ;;  %v5826_v63 = vld [vmem:[#allocation179_spill] sm:$0xff]  ;;  %v2022_v3 = vpop.permute.xlu0 %2021  ;;  %v2123_v53 = vmax.f32 %v2059_v54, 0.0  ;;  %v2165_v54 = vld [vmem:[%s5335_s3 + $0x40] sm:$0xff]  ;;  %v2168_v32 = vld [vmem:[%s5335_s3 + $0x58] sm:$0xff] }
 0x305   :  { %v1192_v33 = vmul.f32 %v4406_v10, %v5826_v63  ;;  %v1580_v43 = vmul.f32 %v4467_v15, %v5013_v0  ;;  %v852_v22 = vadd.f32 %v788_v42, %v464_v23  ;;  %v1643_v50 = vadd.f32 %v1579_v13, %v1255_v9  ;;  %v2163_v42 = vld [vmem:[%s5335_s3 + $0x30] sm:$0xff]  ;;  %v2180_v13 = vld [vmem:[%s5335_s3 + $0xb8] sm:$0xff]  ;;  %v2189_v48 = vld [vmem:[%s5335_s3 + $0x100] sm:$0xff] }
 0x306   :  { %2992 = vmatprep.subr.bf16.mxu1 %v2991_v34  ;;  %v2137_v17 = vmax.f32 %v2073_v19, 0.0  ;;  %v851_v36 = vadd.f32 %v787_v27, %v463_v24  ;;  %v1564_v10 = vmul.f32 %v4467_v15, %v5831_v58  ;;  %v2166_v24 = vld [vmem:[%s5335_s3 + $0x48] sm:$0xff]  ;;  %v2173_v27 = vld [vmem:[%s5335_s3 + $0x80] sm:$0xff]  ;;  %v2167_v63 = vld [vmem:[%s5335_s3 + $0x50] sm:$0xff] }
 0x307   :  { %v1937_v37 = vpop.permute.xlu1 %1936  ;;  %v1256_v61 = vadd.f32 %v1192_v33, %v868_v1  ;;  %v1240_v19 = vadd.f32 %v1176_v21, %v852_v22  ;;  %v2091_v46 = vadd.f32 %v2022_v3, %v1643_v50  ;;  %v2174_v1 = vld [vmem:[%s5335_s3 + $0x88] sm:$0xff]  ;;  %v2171_v9 = vld [vmem:[%s5335_s3 + $0x70] sm:$0xff]  ;;  %v2188_v22 = vld [vmem:[%s5335_s3 + $0xf8] sm:$0xff] }
 0x308   :  { %v2074_v5 = vadd.f32 %v1937_v37, %v1626_v35  ;;  %v1239_v35 = vadd.f32 %v1175_v4, %v851_v36  ;;  %v1942_v28 = vpop.permute.xlu0 %1941  ;;  %v2178_v33 = vld [vmem:[%s5335_s3 + $0xa8] sm:$0xff]  ;;  %v2175_v21 = vld [vmem:[%s5335_s3 + $0x90] sm:$0xff]  ;;  %v2185_v36 = vld [vmem:[%s5335_s3 + $0xe0] sm:$0xff] }
 0x309   :  { %v1644_v0 = vadd.f32 %v1580_v43, %v1256_v61  ;;  %v2155_v56 = vmax.f32 %v2091_v46, 0.0  ;;  %v1628_v59 = vadd.f32 %v1564_v10, %v1240_v19  ;;  %v2179_v3 = vld [vmem:[%s5335_s3 + $0xb0] sm:$0xff]  ;;  %v2198_v61 = vld [vmem:[%s5335_s3 + $0x148] sm:$0xff]  ;;  %v2205_v46 = vld [vmem:[%s5335_s3 + $0x180] sm:$0xff] }
 0x30a   :  { %v2138_v20 = vmax.f32 %v2074_v5, 0.0  ;;  %v1627_v31 = vadd.f32 %v1563_v2, %v1239_v35  ;;  %v2162_v5 = vld [vmem:[%s5335_s3 + $0x28] sm:$0xff]  ;;  %v2183_v43 = vld [vmem:[%s5335_s3 + $0xd0] sm:$0xff] }
 0x30b   :  { %v1867_v8 = vpop.permute.xlu1 %1866  ;;  %v2187_v4 = vld [vmem:[%s5335_s3 + $0xf0] sm:$0xff]  ;;  %v2202_v50 = vld [vmem:[%s5335_s3 + $0x168] sm:$0xff] }
 0x30c   :  { %v2993_v40 = vpack.c.bf16 %v2138_v20, %v2137_v17  ;;  %v2060_v41 = vadd.f32 %v1867_v8, %v1612_v29  ;;  %v2075_v37 = vadd.f32 %v1942_v28, %v1627_v31  ;;  %v2170_v17 = vld [vmem:[%s5335_s3 + $0x68] sm:$0xff]  ;;  %v2164_v20 = vld [vmem:[%s5335_s3 + $0x38] sm:$0xff]  ;;  %v2191_v2 = vld [vmem:[%s5335_s3 + $0x110] sm:$0xff] }
 0x30d   :  { %v2172_v8 = vld [vmem:[%s5335_s3 + $0x78] sm:$0xff]  ;;  %v2195_v19 = vld [vmem:[%s5335_s3 + $0x130] sm:$0xff]  ;;  %v2206_v35 = vld [vmem:[%s5335_s3 + $0x188] sm:$0xff] }
 0x30e   :  { %v2124_v34 = vmax.f32 %v2060_v41, 0.0  ;;  %2994 = vmatpush3.bf16.msra.mxu1 %v2993_v40  ;;  %v2139_v15 = vmax.f32 %v2075_v37, 0.0  ;;  %v2182_v40 = vld [vmem:[%s5335_s3 + $0xc8] sm:$0xff]  ;;  %v2176_v41 = vld [vmem:[%s5335_s3 + $0x98] sm:$0xff]  ;;  %v2203_v58 = vld [vmem:[%s5335_s3 + $0x170] sm:$0xff] }
 0x30f   :  { %v1787_v45 = vpop.permute.xlu1 %1786  ;;  %v2204_v28 = vld [vmem:[%s5335_s3 + $0x178] sm:$0xff]  ;;  %v2214_v10 = vld [vmem:[%s5335_s3 + $0x1c8] sm:$0xff] }
 0x310   :  { %v2963_v49 = vpack.c.bf16 %v2124_v34, %v2123_v53  ;;  %v2044_v16 = vadd.f32 %v1787_v45, %v1596_v52  ;;  %v2190_v52 = vld [vmem:[%s5335_s3 + $0x108] sm:$0xff]  ;;  %v2184_v53 = vld [vmem:[%s5335_s3 + $0xd8] sm:$0xff] }
 0x311   :  { %v2194_v34 = vld [vmem:[%s5335_s3 + $0x128] sm:$0xff]  ;;  %v2192_v45 = vld [vmem:[%s5335_s3 + $0x118] sm:$0xff] }
 0x312   :  { %v2108_v7 = vmax.f32 %v2044_v16, 0.0  ;;  %2964 = vmatprep.subr.bf16.mxu0 %v2963_v49  ;;  %v2196_v49 = vld [vmem:[%s5335_s3 + $0x138] sm:$0xff]  ;;  %v2201_v16 = vld [vmem:[%s5335_s3 + $0x160] sm:$0xff] }
 0x313   :  { %v2027_v23 = vpop.permute.xlu1 %2026  ;;  %v2208_v31 = vld [vmem:[%s5335_s3 + $0x198] sm:$0xff] }
 0x314   :  { %v2965_v39 = vpack.c.bf16 %v2108_v7, %v2107_v26  ;;  %v2092_v44 = vadd.f32 %v2027_v23, %v1644_v0  ;;  %v2200_v26 = vld [vmem:[%s5335_s3 + $0x158] sm:$0xff]  ;;  %v2199_v7 = vld [vmem:[%s5335_s3 + $0x150] sm:$0xff]  ;;  %v2210_v0 = vld [vmem:[%s5335_s3 + $0x1a8] sm:$0xff] }
 0x315   :  { %v2209_v23 = vld [vmem:[%s5335_s3 + $0x1a0] sm:$0xff]  ;;  %v2212_v37 = vld [vmem:[%s5335_s3 + $0x1b8] sm:$0xff] }
 0x316   :  { %v2156_v60 = vmax.f32 %v2092_v44, 0.0  ;;  %2966 = vmatpush3.bf16.msra.mxu0 %v2965_v39  ;;  %v2213_v39 = vld [vmem:[%s5335_s3 + $0x1c0] sm:$0xff]  ;;  %v2207_v44 = vld [vmem:[%s5335_s3 + $0x190] sm:$0xff] }
 0x317   :  { %v1947_v30 = vpop.permute.xlu1 %1946 }
 0x318   :  { %v2995_v14 = vpack.c.bf16 %v2156_v60, %v2155_v56  ;;  %v2076_v57 = vadd.f32 %v1947_v30, %v1628_v59  ;;  %v2218_v56 = vld [vmem:[%s5335_s3 + $0x1e8] sm:$0xff]  ;;  %v2217_v60 = vld [vmem:[%s5335_s3 + $0x1e0] sm:$0xff]  ;;  %v2211_v59 = vld [vmem:[%s5335_s3 + $0x1b0] sm:$0xff] }
 0x319   :  { %2382 = vmatmul.mubr.f32.vlgmr.msra.gmra.mrb[0].mxu0 %v2157_v51  ;;  %v2216_v51 = vld [vmem:[%s5335_s3 + $0x1d8] sm:$0xff]  ;;  %v2215_v30 = vld [vmem:[%s5335_s3 + $0x1d0] sm:$0xff] }
 0x31a   :  { %v2140_v38 = vmax.f32 %v2076_v57, 0.0  ;;  %2996 = vmatprep.subr.bf16.mxu1 %v2995_v14  ;;  %2386 = vmatprep.mubr.f32.mxu0 %v2162_v5  ;;  %v2220_v5 = vld [vmem:[%s5335_s3 + $0x1f8] sm:$0xff]  ;;  %v2219_v14 = vld [vmem:[%s5335_s3 + $0x1f0] sm:$0xff]  ;;  %v2240_v57 = vpop.permute.xlu0 %2239 }
 0x31c   :  { %v2997_v29 = vpack.c.bf16 %v2140_v38, %v2139_v15  ;;  %v2245_v15 = vpop.permute.xlu1 %2244 }
 0x31d   :  { %2387 = vmatmul.mubr.f32.gmra.mrb[2].mxu0 %v2161_v18 }
 0x31e   :  { %2998 = vmatpush3.bf16.msra.mxu1 %v2997_v29  ;;  %2391 = vmatprep.mubr.f32.mxu0 %v2166_v24  ;;  %v2250_v38 = vpop.permute.xlu0 %2249 }
 0x320   :  { %v2255_v18 = vpop.permute.xlu1 %2254 }
 0x321   :  { %2392 = vmatmul.mubr.f32.gmra.mrb[4].mxu0 %v2165_v54  ;;  %2527 = vmatmul.mubr.f32.vlgmr.msra.gmra.mrb[0].mxu1 %v2159_v6 }
 0x322   :  { %2396 = vmatprep.mubr.f32.mxu0 %v2170_v17  ;;  %2531 = vmatprep.mubr.f32.mxu1 %v2164_v20  ;;  %v2260_v24 = vpop.permute.xlu0 %2259 }
 0x324   :  { %v2642_v29 = vpop.permute.xlu1 %2641 }
 0x325   :  { %2397 = vmatmul.mubr.f32.gmra.mrb[6].mxu0 %v2169_v47  ;;  %2532 = vmatmul.mubr.f32.gmra.mrb[2].mxu1 %v2163_v42 }
 0x326   :  { %2401 = vmatprep.mubr.f32.mxu0 %v2174_v1  ;;  %2536 = vmatprep.mubr.f32.mxu1 %v2168_v32  ;;  %v2647_v54 = vpop.permute.xlu0 %2646 }
 0x328   :  { %v5281_v6 = vpop.permute.xlu1 %2264 }
 0x329   :  { %2402 = vmatmul.mubr.f32.gmra.mrb[8].mxu0 %v2173_v27  ;;  %2537 = vmatmul.mubr.f32.gmra.mrb[4].mxu1 %v2167_v63 }
 0x32a   :  { %2406 = vmatprep.mubr.f32.mxu0 %v2178_v33  ;;  %2541 = vmatprep.mubr.f32.mxu1 %v2172_v8  ;;  %v2652_v17 = vpop.permute.xlu0 %2651 }
 0x32c   :  { %v5283_v20 = vpop.permute.xlu1 %2269 }
 0x32d   :  { %2407 = vmatmul.mubr.f32.gmra.mrb[10].mxu0 %v2177_v25  ;;  %2542 = vmatmul.mubr.f32.gmra.mrb[6].mxu1 %v2171_v9 }
 0x32e   :  { %2411 = vmatprep.mubr.f32.mxu0 %v2182_v40  ;;  %2546 = vmatprep.mubr.f32.mxu1 %v2176_v41  ;;  %v5285_v47 = vpop.permute.xlu0 %2656 }
 0x330   :  { %v5287_v42 = vpop.permute.xlu1 %2274 }
 0x331   :  { %2412 = vmatmul.mubr.f32.gmra.mrb[12].mxu0 %v2181_v55  ;;  %2547 = vmatmul.mubr.f32.gmra.mrb[8].mxu1 %v2175_v21 }
 0x332   :  { %2416 = vmatprep.mubr.f32.mxu0 %v2186_v11  ;;  %2551 = vmatprep.mubr.f32.mxu1 %v2180_v13  ;;  %v5289_v32 = vpop.permute.xlu0 %2661 }
 0x334   :  { %v5291_v8 = vpop.permute.xlu1 %2279 }
 0x335   :  { %2417 = vmatmul.mubr.f32.gmra.mrb[14].mxu0 %v2185_v36  ;;  %2552 = vmatmul.mubr.f32.gmra.mrb[10].mxu1 %v2179_v3 }
 0x336   :  { %2421 = vmatprep.mubr.f32.mxu0 %v2190_v52  ;;  %2556 = vmatprep.mubr.f32.mxu1 %v2184_v53  ;;  %v5293_v40 = vpop.permute.xlu0 %2666 }
 0x338   :  { %v5295_v52 = vpop.permute.xlu1 %2284 }
 0x339   :  { %2422 = vmatmul.mubr.f32.gmra.mrb[16].mxu0 %v2189_v48  ;;  %2557 = vmatmul.mubr.f32.gmra.mrb[12].mxu1 %v2183_v43 }
 0x33a   :  { %2426 = vmatprep.mubr.f32.mxu0 %v2194_v34  ;;  %2561 = vmatprep.mubr.f32.mxu1 %v2188_v22 }
 0x33d   :  { %2427 = vmatmul.mubr.f32.gmra.mrb[18].mxu0 %v2193_v12  ;;  %2562 = vmatmul.mubr.f32.gmra.mrb[14].mxu1 %v2187_v4 }
 0x33e   :  { %2431 = vmatprep.mubr.f32.mxu0 %v2198_v61  ;;  %2566 = vmatprep.mubr.f32.mxu1 %v2192_v45  ;;  %v5297_v45 = vpop.permute.xlu0 %2671 }
 0x341   :  { %2432 = vmatmul.mubr.f32.gmra.mrb[20].mxu0 %v2197_v62  ;;  %2567 = vmatmul.mubr.f32.gmra.mrb[16].mxu1 %v2191_v2 }
 0x342   :  { %2436 = vmatprep.mubr.f32.mxu0 %v2202_v50  ;;  %2571 = vmatprep.mubr.f32.mxu1 %v2196_v49 }
 0x345   :  { %2437 = vmatmul.mubr.f32.gmra.mrb[22].mxu0 %v2201_v16  ;;  %2572 = vmatmul.mubr.f32.gmra.mrb[18].mxu1 %v2195_v19 }
 0x346   :  { %2441 = vmatprep.mubr.f32.mxu0 %v2206_v35  ;;  %2576 = vmatprep.mubr.f32.mxu1 %v2200_v26 }
 0x349   :  { %2442 = vmatmul.mubr.f32.gmra.mrb[24].mxu0 %v2205_v46  ;;  %2577 = vmatmul.mubr.f32.gmra.mrb[20].mxu1 %v2199_v7 }
 0x34a   :  { %2446 = vmatprep.mubr.f32.mxu0 %v2210_v0  ;;  %2581 = vmatprep.mubr.f32.mxu1 %v2204_v28  ;;  %v5299_v0 = vpop.permute.xlu1 %2289 }
 0x34d   :  { %2447 = vmatmul.mubr.f32.gmra.mrb[26].mxu0 %v2209_v23  ;;  %2582 = vmatmul.mubr.f32.gmra.mrb[22].mxu1 %v2203_v58 }
 0x34e   :  { %2451 = vmatprep.mubr.f32.mxu0 %v2214_v10  ;;  %2586 = vmatprep.mubr.f32.mxu1 %v2208_v31 }
 0x351   :  { %2452 = vmatmul.mubr.f32.gmra.mrb[28].mxu0 %v2213_v39  ;;  %2587 = vmatmul.mubr.f32.gmra.mrb[24].mxu1 %v2207_v44 }
 0x352   :  { %2456 = vmatprep.mubr.f32.mxu0 %v2218_v56  ;;  %2591 = vmatprep.mubr.f32.mxu1 %v2212_v37 }
 0x355   :  { %2457 = vmatmul.mubr.f32.gmra.mrb[30].mxu0 %v2217_v60  ;;  %2592 = vmatmul.mubr.f32.gmra.mrb[26].mxu1 %v2211_v59 }
 0x356   :  { %2596 = vmatprep.mubr.f32.mxu1 %v2216_v51 }
 0x359   :  { %2597 = vmatmul.mubr.f32.gmra.mrb[28].mxu1 %v2215_v30  ;;  %v2677_v30 = vpop.permute.xlu0 %2676 }
 0x35a   :  { %2601 = vmatprep.mubr.f32.mxu1 %v2220_v5 }
 0x35d   :  { %2602 = vmatmul.mubr.f32.gmra.mrb[30].mxu1 %v2219_v14 }
 0x3ec   :  { %v2807_v1 = vpop.f32.mrb[0].mxu0 }
 0x3ed   :  { %v2808_v27 = vpop.f32.mrb[1].mxu0 }
 0x3ee   :  { %v2809_v63 = vadd.f32 %v2808_v27, %v2807_v1 }
 0x3f0   :  { %v2810_v33 = vpop.f32.mrb[2].mxu0  ;;  %v2384_v13 = vadd.f32 %v2809_v63, %v2240_v57 }
 0x3f1   :  { %v2811_v25 = vpop.f32.mrb[3].mxu0 }
 0x3f2   :  { %v2812_v9 = vadd.f32 %v2811_v25, %v2810_v33  ;;  %v5301_v25 = vpop.permute.xlu1 %2294 }
 0x3f4   :  { %v2813_v41 = vpop.f32.mrb[4].mxu0  ;;  %v2887_v55 = vpop.f32.mrb[0].mxu1  ;;  %v2389_v12 = vadd.f32 %v2812_v9, %v2245_v15 }
 0x3f5   :  { %v2814_v21 = vpop.f32.mrb[5].mxu0  ;;  %v2888_v11 = vpop.f32.mrb[1].mxu1 }
 0x3f6   :  { %v2815_v36 = vadd.f32 %v2814_v21, %v2813_v41  ;;  %v2889_v3 = vadd.f32 %v2888_v11, %v2887_v55 }
 0x3f8   :  { %v2529_v53 = vadd.f32 %v2889_v3, %v2384_v13  ;;  %v2816_v48 = vpop.f32.mrb[6].mxu0  ;;  %v2890_v43 = vpop.f32.mrb[2].mxu1  ;;  %v2394_v35 = vadd.f32 %v2815_v36, %v2250_v38 }
 0x3f9   :  { %v2817_v34 = vpop.f32.mrb[7].mxu0  ;;  %v2891_v22 = vpop.f32.mrb[3].mxu1 }
 0x3fa   :  { %v2818_v4 = vadd.f32 %v2817_v34, %v2816_v48  ;;  %v2892_v61 = vadd.f32 %v2891_v22, %v2890_v43  ;;  %v2607_v62 = vmax.f32 %v2529_v53, 0.0  ;;  %v2682_v53 = vpop.permute.xlu0 %2681 }
 0x3fc   :  { %v2534_v2 = vadd.f32 %v2892_v61, %v2389_v12  ;;  %v2819_v50 = vpop.f32.mrb[8].mxu0  ;;  %v2893_v49 = vpop.f32.mrb[4].mxu1  ;;  %v2719_v28 = vmul.f32 %v2642_v29, %v2607_v62  ;;  %v2399_v39 = vadd.f32 %v2818_v4, %v2255_v18 }
 0x3fd   :  { %v2820_v16 = vpop.f32.mrb[9].mxu0  ;;  %v2894_v19 = vpop.f32.mrb[5].mxu1 }
 0x3fe   :  { %v2608_v26 = vmax.f32 %v2534_v2, 0.0  ;;  %v2821_v46 = vadd.f32 %v2820_v16, %v2819_v50  ;;  %v2895_v7 = vadd.f32 %v2894_v19, %v2893_v49  ;;  %v5307_v50 = vpop.permute.xlu1 %2299 }
 0x400   :  { %v2720_v23 = vmul.f32 %v2647_v54, %v2608_v26  ;;  %v2539_v58 = vadd.f32 %v2895_v7, %v2394_v35  ;;  %v2822_v10 = vpop.f32.mrb[10].mxu0  ;;  %v2896_v31 = vpop.f32.mrb[6].mxu1  ;;  %v2404_v38 = vadd.f32 %v2821_v46, %v2260_v24 }
 0x401   :  { %v2823_v44 = vpop.f32.mrb[11].mxu0  ;;  %v2897_v56 = vpop.f32.mrb[7].mxu1 }
 0x402   :  { %v2735_v37 = vadd.f32 %v2720_v23, %v2719_v28  ;;  %v2609_v60 = vmax.f32 %v2539_v58, 0.0  ;;  %v2824_v59 = vadd.f32 %v2823_v44, %v2822_v10  ;;  %v2898_v51 = vadd.f32 %v2897_v56, %v2896_v31  ;;  %v2687_v58 = vpop.permute.xlu0 %2686 }
 0x404   :  { %v2721_v5 = vmul.f32 %v2652_v17, %v2609_v60  ;;  %v2544_v14 = vadd.f32 %v2898_v51, %v2399_v39  ;;  %v2825_v57 = vpop.f32.mrb[12].mxu0  ;;  %v2899_v15 = vpop.f32.mrb[8].mxu1  ;;  %v2409_v21 = vadd.f32 %v2824_v59, %v5281_v6 }
 0x405   :  { %v2826_v1 = vpop.f32.mrb[13].mxu0  ;;  %v2900_v27 = vpop.f32.mrb[9].mxu1 }
 0x406   :  { %v2736_v29 = vadd.f32 %v2735_v37, %v2721_v5  ;;  %v2610_v54 = vmax.f32 %v2544_v14, 0.0  ;;  %v2827_v63 = vadd.f32 %v2826_v1, %v2825_v57  ;;  %v2901_v33 = vadd.f32 %v2900_v27, %v2899_v15  ;;  %v2305_v5 = vpop.permute.xlu1 %2304 }
 0x408   :  { %v2722_v18 = vmul.f32 %v5285_v47, %v2610_v54  ;;  %v2549_v9 = vadd.f32 %v2901_v33, %v2404_v38  ;;  %v2828_v41 = vpop.f32.mrb[14].mxu0  ;;  %v2902_v55 = vpop.f32.mrb[10].mxu1  ;;  %v2414_v12 = vadd.f32 %v2827_v63, %v5283_v20 }
 0x409   :  { %v2829_v17 = vpop.f32.mrb[15].mxu0  ;;  %v2903_v11 = vpop.f32.mrb[11].mxu1 }
 0x40a   :  { %v2737_v13 = vadd.f32 %v2736_v29, %v2722_v18  ;;  %v2611_v36 = vmax.f32 %v2549_v9, 0.0  ;;  %v2830_v24 = vadd.f32 %v2829_v17, %v2828_v41  ;;  %v2904_v3 = vadd.f32 %v2903_v11, %v2902_v55 }
 0x40c   :  { %v2723_v48 = vmul.f32 %v5289_v32, %v2611_v36  ;;  %v2554_v43 = vadd.f32 %v2904_v3, %v2409_v21  ;;  %v2831_v34 = vpop.f32.mrb[16].mxu0  ;;  %v2905_v22 = vpop.f32.mrb[12].mxu1  ;;  %v2419_v32 = vadd.f32 %v2830_v24, %v5287_v42 }
 0x40d   :  { %v2832_v47 = vpop.f32.mrb[17].mxu0  ;;  %v2906_v4 = vpop.f32.mrb[13].mxu1 }
 0x40e   :  { %v2738_v61 = vadd.f32 %v2737_v13, %v2723_v48  ;;  %v2612_v62 = vmax.f32 %v2554_v43, 0.0  ;;  %v2833_v2 = vadd.f32 %v2832_v47, %v2831_v34  ;;  %v2907_v6 = vadd.f32 %v2906_v4, %v2905_v22 }
 0x410   :  { %v2724_v49 = vmul.f32 %v5293_v40, %v2612_v62  ;;  %v2559_v16 = vadd.f32 %v2907_v6, %v2414_v12  ;;  %v2834_v19 = vpop.f32.mrb[18].mxu0  ;;  %v2908_v35 = vpop.f32.mrb[14].mxu1  ;;  %v2424_v56 = vadd.f32 %v2833_v2, %v5291_v8 }
 0x411   :  { %v2835_v26 = vpop.f32.mrb[19].mxu0  ;;  %v2909_v46 = vpop.f32.mrb[15].mxu1 }
 0x412   :  { %v2739_v7 = vadd.f32 %v2738_v61, %v2724_v49  ;;  %v2613_v28 = vmax.f32 %v2559_v16, 0.0  ;;  %v2836_v20 = vadd.f32 %v2835_v26, %v2834_v19  ;;  %v2910_v23 = vadd.f32 %v2909_v46, %v2908_v35  ;;  %v2692_v8 = vpop.permute.xlu0 %2691 }
 0x414   :  { %v2725_v10 = vmul.f32 %v5297_v45, %v2613_v28  ;;  %v2564_v31 = vadd.f32 %v2910_v23, %v2419_v32  ;;  %v2837_v39 = vpop.f32.mrb[20].mxu0  ;;  %v2911_v44 = vpop.f32.mrb[16].mxu1  ;;  %v2429_v1 = vadd.f32 %v2836_v20, %v5295_v52 }
 0x415   :  { %v2838_v40 = vpop.f32.mrb[21].mxu0  ;;  %v2912_v37 = vpop.f32.mrb[17].mxu1 }
 0x416   :  { %v2740_v60 = vadd.f32 %v2739_v7, %v2725_v10  ;;  %v2614_v59 = vmax.f32 %v2564_v31, 0.0  ;;  %v2839_v51 = vadd.f32 %v2838_v40, %v2837_v39  ;;  %v2913_v42 = vadd.f32 %v2912_v37, %v2911_v44  ;;  %v2310_v52 = vpop.permute.xlu1 %2309 }
 0x418   :  { %v2726_v14 = vmul.f32 %v2677_v30, %v2614_v59  ;;  %v2569_v57 = vadd.f32 %v2913_v42, %v2424_v56  ;;  %v2840_v15 = vpop.f32.mrb[22].mxu0  ;;  %v2914_v38 = vpop.f32.mrb[18].mxu1  ;;  %v2434_v21 = vadd.f32 %v2839_v51, %v5299_v0 }
 0x419   :  { %v2841_v27 = vpop.f32.mrb[23].mxu0  ;;  %v2915_v45 = vpop.f32.mrb[19].mxu1 }
 0x41a   :  { %v2741_v29 = vadd.f32 %v2740_v60, %v2726_v14  ;;  %v2615_v54 = vmax.f32 %v2569_v57, 0.0  ;;  %v2842_v63 = vadd.f32 %v2841_v27, %v2840_v15  ;;  %v2916_v33 = vadd.f32 %v2915_v45, %v2914_v38  ;;  %v2697_v0 = vpop.permute.xlu0 %2696 }
 0x41c   :  { %v2727_v18 = vmul.f32 %v2682_v53, %v2615_v54  ;;  %v2574_v9 = vadd.f32 %v2916_v33, %v2429_v1  ;;  %v2843_v41 = vpop.f32.mrb[24].mxu0  ;;  %v2917_v55 = vpop.f32.mrb[20].mxu1  ;;  %v2439_v22 = vadd.f32 %v2842_v63, %v5301_v25 }
 0x41d   :  { %v2844_v17 = vpop.f32.mrb[25].mxu0  ;;  %v2918_v30 = vpop.f32.mrb[21].mxu1 }
 0x41e   :  { %v2742_v11 = vadd.f32 %v2741_v29, %v2727_v18  ;;  %v2616_v13 = vmax.f32 %v2574_v9, 0.0  ;;  %v2845_v36 = vadd.f32 %v2844_v17, %v2843_v41  ;;  %v2919_v24 = vadd.f32 %v2918_v30, %v2917_v55  ;;  %v2315_v25 = vpop.permute.xlu1 %2314  ;;  %v2702_v59 = vpop.permute.xlu0 %2701 }
 0x420   :  { %v2728_v3 = vmul.f32 %v2687_v58, %v2616_v13  ;;  %v2579_v48 = vadd.f32 %v2919_v24, %v2434_v21  ;;  %v2846_v43 = vpop.f32.mrb[26].mxu0  ;;  %v2920_v34 = vpop.f32.mrb[22].mxu1  ;;  %v2444_v19 = vadd.f32 %v2845_v36, %v5307_v50 }
 0x421   :  { %v2847_v12 = vpop.f32.mrb[27].mxu0  ;;  %v2921_v53 = vpop.f32.mrb[23].mxu1 }
 0x422   :  { %v2743_v47 = vadd.f32 %v2742_v11, %v2728_v3  ;;  %v2617_v4 = vmax.f32 %v2579_v48, 0.0  ;;  %v2848_v61 = vadd.f32 %v2847_v12, %v2846_v43  ;;  %v2922_v62 = vadd.f32 %v2921_v53, %v2920_v34  ;;  %v2707_v27 = vpop.permute.xlu1 %2706  ;;  %v2712_v9 = vpop.permute.xlu0 %2711 }
 0x423   :  { %v2757_v43 = vstv %s5338_s6 }
 0x424   :  { %v2729_v2 = vmul.f32 %v2692_v8, %v2617_v4  ;;  %v2584_v6 = vadd.f32 %v2922_v62, %v2439_v22  ;;  %v2849_v49 = vpop.f32.mrb[28].mxu0  ;;  %v2923_v16 = vpop.f32.mrb[24].mxu1  ;;  %v2449_v31 = vadd.f32 %v2848_v61, %v2305_v5 }
 0x425   :  { %v2850_v35 = vpop.f32.mrb[29].mxu0  ;;  %v2924_v32 = vpop.f32.mrb[25].mxu1 }
 0x426   :  { %v2744_v26 = vadd.f32 %v2743_v47, %v2729_v2  ;;  %v2618_v46 = vmax.f32 %v2584_v6, 0.0  ;;  %v2851_v7 = vadd.f32 %v2850_v35, %v2849_v49  ;;  %v2925_v28 = vadd.f32 %v2924_v32, %v2923_v16  ;;  %v2717_v30 = vpop.permute.xlu1 %2716 }
 0x428   :  { %v2730_v20 = vmul.f32 %v2697_v0, %v2618_v46  ;;  %v2589_v23 = vadd.f32 %v2925_v28, %v2444_v19  ;;  %v2852_v58 = vpop.f32.mrb[30].mxu0  ;;  %v2926_v10 = vpop.f32.mrb[26].mxu1  ;;  %v2454_v57 = vadd.f32 %v2851_v7, %v2310_v52 }
 0x429   :  { %v2853_v39 = vpop.f32.mrb[31].mxu0  ;;  %v2927_v44 = vpop.f32.mrb[27].mxu1 }
 0x42a   :  { %v2745_v56 = vadd.f32 %v2744_v26, %v2730_v20  ;;  %v2619_v40 = vmax.f32 %v2589_v23, 0.0  ;;  %v2854_v37 = vadd.f32 %v2853_v39, %v2852_v58  ;;  %v2928_v60 = vadd.f32 %v2927_v44, %v2926_v10 }
 0x42c   :  { %v2731_v50 = vmul.f32 %v2702_v59, %v2619_v40  ;;  %v2594_v51 = vadd.f32 %v2928_v60, %v2449_v31  ;;  %v2929_v42 = vpop.f32.mrb[28].mxu1  ;;  %v2459_v63 = vadd.f32 %v2854_v37, %v2315_v25 }
 0x42d   :  { %v2930_v14 = vpop.f32.mrb[29].mxu1 }
 0x42e   :  { %v2746_v15 = vadd.f32 %v2745_v56, %v2731_v50  ;;  %v2620_v38 = vmax.f32 %v2594_v51, 0.0  ;;  %v2931_v1 = vadd.f32 %v2930_v14, %v2929_v42 }
 0x430   :  { %v2732_v45 = vmul.f32 %v2707_v27, %v2620_v38  ;;  %v2599_v29 = vadd.f32 %v2931_v1, %v2454_v57  ;;  %v2932_v54 = vpop.f32.mrb[30].mxu1 }
 0x431   :  { %v2933_v5 = vpop.f32.mrb[31].mxu1 }
 0x432   :  { %v2747_v33 = vadd.f32 %v2746_v15, %v2732_v45  ;;  %v2621_v8 = vmax.f32 %v2599_v29, 0.0  ;;  %v2934_v18 = vadd.f32 %v2933_v5, %v2932_v54 }
 0x434   :  { %v2733_v41 = vmul.f32 %v2712_v9, %v2621_v8  ;;  %v2604_v55 = vadd.f32 %v2934_v18, %v2459_v63 }
 0x436   :  { %v2748_v21 = vadd.f32 %v2747_v33, %v2733_v41  ;;  %v2622_v17 = vmax.f32 %v2604_v55, 0.0 }
 0x438   :  { %v2734_v11 = vmul.f32 %v2717_v30, %v2622_v17 }
 0x43a   :  { %v2749_v13 = vadd.f32 %v2748_v21, %v2734_v11 }
 0x43c   :  { %v2750_v36 = vrot.slane %v2749_v13, 4 }
 0x43e   :  { %v2751_v24 = vadd.f32 %v2750_v36, %v2749_v13 }
 0x440   :  { %v2752_v52 = vrot.slane %v2751_v24, 2 }
 0x442   :  { %v2753_v3 = vadd.f32 %v2752_v52, %v2751_v24 }
 0x444   :  { %v2754_v48 = vrot.slane %v2753_v3, 1 }
 0x446   :  { %v2755_v34 = vadd.f32 %v2754_v48, %v2753_v3 }
 0x448   :  { %v2758_v22 = vadd.f32 %v2757_v43, %v2755_v34 }
 0x44a   :  { %v2759_v12 = vmax.f32 %v2758_v22, 0.0 }
 0x44c   :  { %2760 = vst [vmem:[#allocation3] sm:$0x1] %v2759_v12 }
 0x44d   :  { %3033 = shalt.err (!%p3030_p4)
}
 0x44e   :  { %s3034_s16 = scalar_lea.hbm %s5339_s7, 16 }
 0x44f   :  { %p3035_p5 = scmp.ne.s32.totalorder %s5339_s7, %s3034_s16  ;;  %p3038_p6 = scmp.lt.u32.totalorder %s3034_s16, %s5339_s7 }
 0x451   :  { %p3040_p7 = pnand %p3038_p6, %p3035_p5 }
 0x453   :  { %3043 = shalt.err (!%p3040_p7)
}
 0x454   :  { %2770 = dma.vmem_to_hbm [thread:$0]  %s2768_s11, 16, %s5339_s7, [#allocation4]  }
 0x455   :  { %3044 = dma.done.wait [#allocation4], 16  }
 0x456   :  { %3045 = vsyncadd [#allocation4], 4294967280 }
 0x457   :  { %2774 = vsyncpa [#allocation4], 1 }

</bundles_post_ra>
